<compile_context>
chip_gen: v7x
topology: tpu7x:2x2x1
jax: 0.10.0
libtpu: 0.0.40
codegen_flags: <defaults>
</compile_context>

<pallas_src>
import jax
import jax.numpy as jnp
from jax.experimental import pallas as pl
from jax.experimental.pallas import tpu as pltpu

KH = KW = 3  # 3x3 conv


def conv_gelu_kernel(x_ref, w_ref, b_ref, o_ref):
    # x_ref: (N, C, H, W) VMEM   -- whole input, native NCHW layout
    # w_ref: (C*9,) SMEM         -- flattened OIHW weights (single out channel)
    # b_ref: (1,)   SMEM
    # o_ref: (N, 1, H, W) VMEM   -- final result, no wrapper post-processing
    N, C, H, W = x_ref.shape

    # Hoist all 45 SMEM scalar reads out of the tap loops (trace-time unroll).
    w = [w_ref[i] for i in range(C * KH * KW)]
    b = b_ref[0]

    # Boundary masks for the roll wraparound (built once, reused for every n).
    col = jax.lax.broadcasted_iota(jnp.int32, (H, W), 1)
    row = jax.lax.broadcasted_iota(jnp.int32, (H, W), 0)
    zero = jnp.zeros((H, W), jnp.float32)

    for n in range(N):  # N is tiny; unrolled at trace time
        # Load each channel plane exactly once.
        planes = [x_ref[n, c, :, :].astype(jnp.float32) for c in range(C)]

        # Factorized shifted accumulation:
        #   P[kh][kw] = sum_c w[c,kh,kw] * x_c        (channel reduction, no shift)
        #   Q[kh]     = mask(roll_w(P[kh][0],+1)) + P[kh][1] + mask(roll_w(P[kh][2],-1))
        #   acc       = mask(roll_h(Q[0],+1))     + Q[1]    + mask(roll_h(Q[2],-1))
        # Rolls ride the XLU slot; masks are vselects in VALU slack.
        # Masking is applied AFTER the rolls so wrapped taps become the SAME
        # zero-padding taps exactly.
        q = []
        for kh in range(KH):
            p = []
            for kw in range(KW):
                t = planes[0] * w[kh * KW + kw]
                for c in range(1, C):
                    t = t + planes[c] * w[c * KH * KW + kh * KW + kw]
                p.append(t)
            left = jnp.where(col == 0, zero, pltpu.roll(p[0], 1, axis=1))
            right = jnp.where(col == W - 1, zero, pltpu.roll(p[2], W - 1, axis=1))
            q.append(left + p[1] + right)
        top = jnp.where(row == 0, zero, pltpu.roll(q[0], 1, axis=0))
        bot = jnp.where(row == H - 1, zero, pltpu.roll(q[2], H - 1, axis=0))
        acc = top + q[1] + bot

        # GELU (tanh approx) epilogue fused on the same vregs, one store per image.
        v1 = acc + b
        v2 = v1 * 0.5
        v5 = (v1 * v1 * v1) * 0.044715
        v7 = (v1 + v5) * 0.7978845608028654
        v10 = v2 * (jnp.tanh(v7) + 1.0)
        o_ref[n, 0, :, :] = v10.astype(o_ref.dtype)


@jax.jit
def conv_gelu(x_nchw, weight_oihw, bias):
    N, C, H, W = x_nchw.shape
    w_flat = weight_oihw.reshape(-1).astype(jnp.float32)  # (C*9,)
    b = bias.astype(jnp.float32)                          # (1,)

    out = pl.pallas_call(
        conv_gelu_kernel,
        out_shape=jax.ShapeDtypeStruct((N, 1, H, W), jnp.float32),
        in_specs=[
            pl.BlockSpec(memory_space=pltpu.MemorySpace.VMEM),  # whole x -> VMEM
            pl.BlockSpec(memory_space=pltpu.MemorySpace.SMEM),  # weights
            pl.BlockSpec(memory_space=pltpu.MemorySpace.SMEM),  # bias
        ],
        out_specs=pl.BlockSpec(memory_space=pltpu.MemorySpace.VMEM),
    )(x_nchw, w_flat, b)
    return out.astype(x_nchw.dtype)


def reference(x_nchw, weight_oihw, bias):
    v1 = jax.lax.conv_general_dilated(
        x_nchw, weight_oihw, window_strides=(1, 1), padding="SAME",
        dimension_numbers=("NCHW", "OIHW", "NCHW")) + bias.reshape(1, 1, 1, 1)
    v2 = v1 * 0.5
    v5 = (v1 * v1 * v1) * 0.044715
    v7 = (v1 + v5) * 0.7978845608028654
    return v2 * (jnp.tanh(v7) + 1.0)


if __name__ == "__main__":
    key = jax.random.PRNGKey(0)
    kx, kw, kb = jax.random.split(key, 3)

    # Small shapes consistent with the module: C_in = 5 fixed by Conv2d(5, 1, 3).
    N, C, H, W = 2, 5, 32, 32
    x = jax.random.normal(kx, (N, C, H, W), dtype=jnp.float32)

    # Deterministic Conv2d(5, 1, 3) parameter init (PyTorch-like fan-in bound).
    fan_in = C * KH * KW
    bound = 1.0 / (fan_in ** 0.5)
    weight = jax.random.uniform(kw, (1, C, KH, KW), jnp.float32, -bound, bound)
    bias = jax.random.uniform(kb, (1,), jnp.float32, -bound, bound)

    out = jax.block_until_ready(conv_gelu(x, weight, bias))

    ref = reference(x, weight, bias)
    assert out.shape == (N, 1, H, W)
    assert jnp.allclose(out, ref, atol=1e-5, rtol=1e-5), "mismatch vs reference"

    print("KERNEL_OK")
</pallas_src>

<mosaic_0001>
module attributes {stable_mosaic.version = 11 : i64} {
  func.func @conv_gelu_kernel(%arg0: memref<2x5x32x32xf32, #tpu.memory_space<vmem>>, %arg1: memref<45xf32, #tpu.memory_space<smem>>, %arg2: memref<1xf32, #tpu.memory_space<smem>>, %arg3: memref<2x1x32x32xf32, #tpu.memory_space<vmem>>) attributes {dimension_semantics = [], scalar_prefetch = 0 : i64, scratch_operands = 0 : i64, tpu.core_type = #tpu.core_type<tc>} {
    %c0 = arith.constant 0 : index
    %0 = memref.load %arg1[%c0] : memref<45xf32, #tpu.memory_space<smem>>
    %c1 = arith.constant 1 : index
    %1 = memref.load %arg1[%c1] : memref<45xf32, #tpu.memory_space<smem>>
    %c2 = arith.constant 2 : index
    %2 = memref.load %arg1[%c2] : memref<45xf32, #tpu.memory_space<smem>>
    %c3 = arith.constant 3 : index
    %3 = memref.load %arg1[%c3] : memref<45xf32, #tpu.memory_space<smem>>
    %c4 = arith.constant 4 : index
    %4 = memref.load %arg1[%c4] : memref<45xf32, #tpu.memory_space<smem>>
    %c5 = arith.constant 5 : index
    %5 = memref.load %arg1[%c5] : memref<45xf32, #tpu.memory_space<smem>>
    %c6 = arith.constant 6 : index
    %6 = memref.load %arg1[%c6] : memref<45xf32, #tpu.memory_space<smem>>
    %c7 = arith.constant 7 : index
    %7 = memref.load %arg1[%c7] : memref<45xf32, #tpu.memory_space<smem>>
    %c8 = arith.constant 8 : index
    %8 = memref.load %arg1[%c8] : memref<45xf32, #tpu.memory_space<smem>>
    %c9 = arith.constant 9 : index
    %9 = memref.load %arg1[%c9] : memref<45xf32, #tpu.memory_space<smem>>
    %c10 = arith.constant 10 : index
    %10 = memref.load %arg1[%c10] : memref<45xf32, #tpu.memory_space<smem>>
    %c11 = arith.constant 11 : index
    %11 = memref.load %arg1[%c11] : memref<45xf32, #tpu.memory_space<smem>>
    %c12 = arith.constant 12 : index
    %12 = memref.load %arg1[%c12] : memref<45xf32, #tpu.memory_space<smem>>
    %c13 = arith.constant 13 : index
    %13 = memref.load %arg1[%c13] : memref<45xf32, #tpu.memory_space<smem>>
    %c14 = arith.constant 14 : index
    %14 = memref.load %arg1[%c14] : memref<45xf32, #tpu.memory_space<smem>>
    %c15 = arith.constant 15 : index
    %15 = memref.load %arg1[%c15] : memref<45xf32, #tpu.memory_space<smem>>
    %c16 = arith.constant 16 : index
    %16 = memref.load %arg1[%c16] : memref<45xf32, #tpu.memory_space<smem>>
    %c17 = arith.constant 17 : index
    %17 = memref.load %arg1[%c17] : memref<45xf32, #tpu.memory_space<smem>>
    %c18 = arith.constant 18 : index
    %18 = memref.load %arg1[%c18] : memref<45xf32, #tpu.memory_space<smem>>
    %c19 = arith.constant 19 : index
    %19 = memref.load %arg1[%c19] : memref<45xf32, #tpu.memory_space<smem>>
    %c20 = arith.constant 20 : index
    %20 = memref.load %arg1[%c20] : memref<45xf32, #tpu.memory_space<smem>>
    %c21 = arith.constant 21 : index
    %21 = memref.load %arg1[%c21] : memref<45xf32, #tpu.memory_space<smem>>
    %c22 = arith.constant 22 : index
    %22 = memref.load %arg1[%c22] : memref<45xf32, #tpu.memory_space<smem>>
    %c23 = arith.constant 23 : index
    %23 = memref.load %arg1[%c23] : memref<45xf32, #tpu.memory_space<smem>>
    %c24 = arith.constant 24 : index
    %24 = memref.load %arg1[%c24] : memref<45xf32, #tpu.memory_space<smem>>
    %c25 = arith.constant 25 : index
    %25 = memref.load %arg1[%c25] : memref<45xf32, #tpu.memory_space<smem>>
    %c26 = arith.constant 26 : index
    %26 = memref.load %arg1[%c26] : memref<45xf32, #tpu.memory_space<smem>>
    %c27 = arith.constant 27 : index
    %27 = memref.load %arg1[%c27] : memref<45xf32, #tpu.memory_space<smem>>
    %c28 = arith.constant 28 : index
    %28 = memref.load %arg1[%c28] : memref<45xf32, #tpu.memory_space<smem>>
    %c29 = arith.constant 29 : index
    %29 = memref.load %arg1[%c29] : memref<45xf32, #tpu.memory_space<smem>>
    %c30 = arith.constant 30 : index
    %30 = memref.load %arg1[%c30] : memref<45xf32, #tpu.memory_space<smem>>
    %c31 = arith.constant 31 : index
    %31 = memref.load %arg1[%c31] : memref<45xf32, #tpu.memory_space<smem>>
    %c32 = arith.constant 32 : index
    %32 = memref.load %arg1[%c32] : memref<45xf32, #tpu.memory_space<smem>>
    %c33 = arith.constant 33 : index
    %33 = memref.load %arg1[%c33] : memref<45xf32, #tpu.memory_space<smem>>
    %c34 = arith.constant 34 : index
    %34 = memref.load %arg1[%c34] : memref<45xf32, #tpu.memory_space<smem>>
    %c35 = arith.constant 35 : index
    %35 = memref.load %arg1[%c35] : memref<45xf32, #tpu.memory_space<smem>>
    %c36 = arith.constant 36 : index
    %36 = memref.load %arg1[%c36] : memref<45xf32, #tpu.memory_space<smem>>
    %c37 = arith.constant 37 : index
    %37 = memref.load %arg1[%c37] : memref<45xf32, #tpu.memory_space<smem>>
    %c38 = arith.constant 38 : index
    %38 = memref.load %arg1[%c38] : memref<45xf32, #tpu.memory_space<smem>>
    %c39 = arith.constant 39 : index
    %39 = memref.load %arg1[%c39] : memref<45xf32, #tpu.memory_space<smem>>
    %c40 = arith.constant 40 : index
    %40 = memref.load %arg1[%c40] : memref<45xf32, #tpu.memory_space<smem>>
    %c41 = arith.constant 41 : index
    %41 = memref.load %arg1[%c41] : memref<45xf32, #tpu.memory_space<smem>>
    %c42 = arith.constant 42 : index
    %42 = memref.load %arg1[%c42] : memref<45xf32, #tpu.memory_space<smem>>
    %c43 = arith.constant 43 : index
    %43 = memref.load %arg1[%c43] : memref<45xf32, #tpu.memory_space<smem>>
    %c44 = arith.constant 44 : index
    %44 = memref.load %arg1[%c44] : memref<45xf32, #tpu.memory_space<smem>>
    %c0_0 = arith.constant 0 : index
    %45 = memref.load %arg2[%c0_0] : memref<1xf32, #tpu.memory_space<smem>>
    %46 = tpu.iota {dimensions = array<i32: 1>} : vector<32x32xi32>
    %47 = tpu.iota {dimensions = array<i32: 0>} : vector<32x32xi32>
    %cst = arith.constant 0.000000e+00 : f32
    %48 = vector.broadcast %cst : f32 to vector<32x32xf32>
    %c0_1 = arith.constant 0 : index
    %c0_2 = arith.constant 0 : index
    %c0_3 = arith.constant 0 : index
    %c0_4 = arith.constant 0 : index
    %49 = vector.load %arg0[%c0_1, %c0_2, %c0_3, %c0_4] : memref<2x5x32x32xf32, #tpu.memory_space<vmem>>, vector<1x1x32x32xf32>
    %50 = vector.shape_cast %49 : vector<1x1x32x32xf32> to vector<32x32xf32>
    %c0_5 = arith.constant 0 : index
    %c1_6 = arith.constant 1 : index
    %c0_7 = arith.constant 0 : index
    %c0_8 = arith.constant 0 : index
    %51 = vector.load %arg0[%c0_5, %c1_6, %c0_7, %c0_8] : memref<2x5x32x32xf32, #tpu.memory_space<vmem>>, vector<1x1x32x32xf32>
    %52 = vector.shape_cast %51 : vector<1x1x32x32xf32> to vector<32x32xf32>
    %c0_9 = arith.constant 0 : index
    %c2_10 = arith.constant 2 : index
    %c0_11 = arith.constant 0 : index
    %c0_12 = arith.constant 0 : index
    %53 = vector.load %arg0[%c0_9, %c2_10, %c0_11, %c0_12] : memref<2x5x32x32xf32, #tpu.memory_space<vmem>>, vector<1x1x32x32xf32>
    %54 = vector.shape_cast %53 : vector<1x1x32x32xf32> to vector<32x32xf32>
    %c0_13 = arith.constant 0 : index
    %c3_14 = arith.constant 3 : index
    %c0_15 = arith.constant 0 : index
    %c0_16 = arith.constant 0 : index
    %55 = vector.load %arg0[%c0_13, %c3_14, %c0_15, %c0_16] : memref<2x5x32x32xf32, #tpu.memory_space<vmem>>, vector<1x1x32x32xf32>
    %56 = vector.shape_cast %55 : vector<1x1x32x32xf32> to vector<32x32xf32>
    %c0_17 = arith.constant 0 : index
    %c4_18 = arith.constant 4 : index
    %c0_19 = arith.constant 0 : index
    %c0_20 = arith.constant 0 : index
    %57 = vector.load %arg0[%c0_17, %c4_18, %c0_19, %c0_20] : memref<2x5x32x32xf32, #tpu.memory_space<vmem>>, vector<1x1x32x32xf32>
    %58 = vector.shape_cast %57 : vector<1x1x32x32xf32> to vector<32x32xf32>
    %59 = vector.broadcast %0 : f32 to vector<32x32xf32>
    %60 = arith.mulf %50, %59 : vector<32x32xf32>
    %61 = vector.broadcast %9 : f32 to vector<32x32xf32>
    %62 = arith.mulf %52, %61 : vector<32x32xf32>
    %63 = arith.addf %60, %62 : vector<32x32xf32>
    %64 = vector.broadcast %18 : f32 to vector<32x32xf32>
    %65 = arith.mulf %54, %64 : vector<32x32xf32>
    %66 = arith.addf %63, %65 : vector<32x32xf32>
    %67 = vector.broadcast %27 : f32 to vector<32x32xf32>
    %68 = arith.mulf %56, %67 : vector<32x32xf32>
    %69 = arith.addf %66, %68 : vector<32x32xf32>
    %70 = vector.broadcast %36 : f32 to vector<32x32xf32>
    %71 = arith.mulf %58, %70 : vector<32x32xf32>
    %72 = arith.addf %69, %71 : vector<32x32xf32>
    %73 = vector.broadcast %1 : f32 to vector<32x32xf32>
    %74 = arith.mulf %50, %73 : vector<32x32xf32>
    %75 = vector.broadcast %10 : f32 to vector<32x32xf32>
    %76 = arith.mulf %52, %75 : vector<32x32xf32>
    %77 = arith.addf %74, %76 : vector<32x32xf32>
    %78 = vector.broadcast %19 : f32 to vector<32x32xf32>
    %79 = arith.mulf %54, %78 : vector<32x32xf32>
    %80 = arith.addf %77, %79 : vector<32x32xf32>
    %81 = vector.broadcast %28 : f32 to vector<32x32xf32>
    %82 = arith.mulf %56, %81 : vector<32x32xf32>
    %83 = arith.addf %80, %82 : vector<32x32xf32>
    %84 = vector.broadcast %37 : f32 to vector<32x32xf32>
    %85 = arith.mulf %58, %84 : vector<32x32xf32>
    %86 = arith.addf %83, %85 : vector<32x32xf32>
    %87 = vector.broadcast %2 : f32 to vector<32x32xf32>
    %88 = arith.mulf %50, %87 : vector<32x32xf32>
    %89 = vector.broadcast %11 : f32 to vector<32x32xf32>
    %90 = arith.mulf %52, %89 : vector<32x32xf32>
    %91 = arith.addf %88, %90 : vector<32x32xf32>
    %92 = vector.broadcast %20 : f32 to vector<32x32xf32>
    %93 = arith.mulf %54, %92 : vector<32x32xf32>
    %94 = arith.addf %91, %93 : vector<32x32xf32>
    %95 = vector.broadcast %29 : f32 to vector<32x32xf32>
    %96 = arith.mulf %56, %95 : vector<32x32xf32>
    %97 = arith.addf %94, %96 : vector<32x32xf32>
    %98 = vector.broadcast %38 : f32 to vector<32x32xf32>
    %99 = arith.mulf %58, %98 : vector<32x32xf32>
    %100 = arith.addf %97, %99 : vector<32x32xf32>
    %c0_i32 = arith.constant 0 : i32
    %101 = vector.broadcast %c0_i32 : i32 to vector<32x32xi32>
    %102 = arith.cmpi eq, %46, %101 : vector<32x32xi32>
    %c1_i32 = arith.constant 1 : i32
    %103 = tpu.dynamic_rotate %72 by %c1_i32 dim 1 : vector<32x32xf32>, i32 -> vector<32x32xf32>
    %104 = arith.select %102, %48, %103 : vector<32x32xi1>, vector<32x32xf32>
    %c31_i32 = arith.constant 31 : i32
    %105 = vector.broadcast %c31_i32 : i32 to vector<32x32xi32>
    %106 = arith.cmpi eq, %46, %105 : vector<32x32xi32>
    %c31_i32_21 = arith.constant 31 : i32
    %107 = tpu.dynamic_rotate %100 by %c31_i32_21 dim 1 : vector<32x32xf32>, i32 -> vector<32x32xf32>
    %108 = arith.select %106, %48, %107 : vector<32x32xi1>, vector<32x32xf32>
    %109 = arith.addf %104, %86 : vector<32x32xf32>
    %110 = arith.addf %109, %108 : vector<32x32xf32>
    %111 = vector.broadcast %3 : f32 to vector<32x32xf32>
    %112 = arith.mulf %50, %111 : vector<32x32xf32>
    %113 = vector.broadcast %12 : f32 to vector<32x32xf32>
    %114 = arith.mulf %52, %113 : vector<32x32xf32>
    %115 = arith.addf %112, %114 : vector<32x32xf32>
    %116 = vector.broadcast %21 : f32 to vector<32x32xf32>
    %117 = arith.mulf %54, %116 : vector<32x32xf32>
    %118 = arith.addf %115, %117 : vector<32x32xf32>
    %119 = vector.broadcast %30 : f32 to vector<32x32xf32>
    %120 = arith.mulf %56, %119 : vector<32x32xf32>
    %121 = arith.addf %118, %120 : vector<32x32xf32>
    %122 = vector.broadcast %39 : f32 to vector<32x32xf32>
    %123 = arith.mulf %58, %122 : vector<32x32xf32>
    %124 = arith.addf %121, %123 : vector<32x32xf32>
    %125 = vector.broadcast %4 : f32 to vector<32x32xf32>
    %126 = arith.mulf %50, %125 : vector<32x32xf32>
    %127 = vector.broadcast %13 : f32 to vector<32x32xf32>
    %128 = arith.mulf %52, %127 : vector<32x32xf32>
    %129 = arith.addf %126, %128 : vector<32x32xf32>
    %130 = vector.broadcast %22 : f32 to vector<32x32xf32>
    %131 = arith.mulf %54, %130 : vector<32x32xf32>
    %132 = arith.addf %129, %131 : vector<32x32xf32>
    %133 = vector.broadcast %31 : f32 to vector<32x32xf32>
    %134 = arith.mulf %56, %133 : vector<32x32xf32>
    %135 = arith.addf %132, %134 : vector<32x32xf32>
    %136 = vector.broadcast %40 : f32 to vector<32x32xf32>
    %137 = arith.mulf %58, %136 : vector<32x32xf32>
    %138 = arith.addf %135, %137 : vector<32x32xf32>
    %139 = vector.broadcast %5 : f32 to vector<32x32xf32>
    %140 = arith.mulf %50, %139 : vector<32x32xf32>
    %141 = vector.broadcast %14 : f32 to vector<32x32xf32>
    %142 = arith.mulf %52, %141 : vector<32x32xf32>
    %143 = arith.addf %140, %142 : vector<32x32xf32>
    %144 = vector.broadcast %23 : f32 to vector<32x32xf32>
    %145 = arith.mulf %54, %144 : vector<32x32xf32>
    %146 = arith.addf %143, %145 : vector<32x32xf32>
    %147 = vector.broadcast %32 : f32 to vector<32x32xf32>
    %148 = arith.mulf %56, %147 : vector<32x32xf32>
    %149 = arith.addf %146, %148 : vector<32x32xf32>
    %150 = vector.broadcast %41 : f32 to vector<32x32xf32>
    %151 = arith.mulf %58, %150 : vector<32x32xf32>
    %152 = arith.addf %149, %151 : vector<32x32xf32>
    %c0_i32_22 = arith.constant 0 : i32
    %153 = vector.broadcast %c0_i32_22 : i32 to vector<32x32xi32>
    %154 = arith.cmpi eq, %46, %153 : vector<32x32xi32>
    %c1_i32_23 = arith.constant 1 : i32
    %155 = tpu.dynamic_rotate %124 by %c1_i32_23 dim 1 : vector<32x32xf32>, i32 -> vector<32x32xf32>
    %156 = arith.select %154, %48, %155 : vector<32x32xi1>, vector<32x32xf32>
    %c31_i32_24 = arith.constant 31 : i32
    %157 = vector.broadcast %c31_i32_24 : i32 to vector<32x32xi32>
    %158 = arith.cmpi eq, %46, %157 : vector<32x32xi32>
    %c31_i32_25 = arith.constant 31 : i32
    %159 = tpu.dynamic_rotate %152 by %c31_i32_25 dim 1 : vector<32x32xf32>, i32 -> vector<32x32xf32>
    %160 = arith.select %158, %48, %159 : vector<32x32xi1>, vector<32x32xf32>
    %161 = arith.addf %156, %138 : vector<32x32xf32>
    %162 = arith.addf %161, %160 : vector<32x32xf32>
    %163 = vector.broadcast %6 : f32 to vector<32x32xf32>
    %164 = arith.mulf %50, %163 : vector<32x32xf32>
    %165 = vector.broadcast %15 : f32 to vector<32x32xf32>
    %166 = arith.mulf %52, %165 : vector<32x32xf32>
    %167 = arith.addf %164, %166 : vector<32x32xf32>
    %168 = vector.broadcast %24 : f32 to vector<32x32xf32>
    %169 = arith.mulf %54, %168 : vector<32x32xf32>
    %170 = arith.addf %167, %169 : vector<32x32xf32>
    %171 = vector.broadcast %33 : f32 to vector<32x32xf32>
    %172 = arith.mulf %56, %171 : vector<32x32xf32>
    %173 = arith.addf %170, %172 : vector<32x32xf32>
    %174 = vector.broadcast %42 : f32 to vector<32x32xf32>
    %175 = arith.mulf %58, %174 : vector<32x32xf32>
    %176 = arith.addf %173, %175 : vector<32x32xf32>
    %177 = vector.broadcast %7 : f32 to vector<32x32xf32>
    %178 = arith.mulf %50, %177 : vector<32x32xf32>
    %179 = vector.broadcast %16 : f32 to vector<32x32xf32>
    %180 = arith.mulf %52, %179 : vector<32x32xf32>
    %181 = arith.addf %178, %180 : vector<32x32xf32>
    %182 = vector.broadcast %25 : f32 to vector<32x32xf32>
    %183 = arith.mulf %54, %182 : vector<32x32xf32>
    %184 = arith.addf %181, %183 : vector<32x32xf32>
    %185 = vector.broadcast %34 : f32 to vector<32x32xf32>
    %186 = arith.mulf %56, %185 : vector<32x32xf32>
    %187 = arith.addf %184, %186 : vector<32x32xf32>
    %188 = vector.broadcast %43 : f32 to vector<32x32xf32>
    %189 = arith.mulf %58, %188 : vector<32x32xf32>
    %190 = arith.addf %187, %189 : vector<32x32xf32>
    %191 = vector.broadcast %8 : f32 to vector<32x32xf32>
    %192 = arith.mulf %50, %191 : vector<32x32xf32>
    %193 = vector.broadcast %17 : f32 to vector<32x32xf32>
    %194 = arith.mulf %52, %193 : vector<32x32xf32>
    %195 = arith.addf %192, %194 : vector<32x32xf32>
    %196 = vector.broadcast %26 : f32 to vector<32x32xf32>
    %197 = arith.mulf %54, %196 : vector<32x32xf32>
    %198 = arith.addf %195, %197 : vector<32x32xf32>
    %199 = vector.broadcast %35 : f32 to vector<32x32xf32>
    %200 = arith.mulf %56, %199 : vector<32x32xf32>
    %201 = arith.addf %198, %200 : vector<32x32xf32>
    %202 = vector.broadcast %44 : f32 to vector<32x32xf32>
    %203 = arith.mulf %58, %202 : vector<32x32xf32>
    %204 = arith.addf %201, %203 : vector<32x32xf32>
    %c0_i32_26 = arith.constant 0 : i32
    %205 = vector.broadcast %c0_i32_26 : i32 to vector<32x32xi32>
    %206 = arith.cmpi eq, %46, %205 : vector<32x32xi32>
    %c1_i32_27 = arith.constant 1 : i32
    %207 = tpu.dynamic_rotate %176 by %c1_i32_27 dim 1 : vector<32x32xf32>, i32 -> vector<32x32xf32>
    %208 = arith.select %206, %48, %207 : vector<32x32xi1>, vector<32x32xf32>
    %c31_i32_28 = arith.constant 31 : i32
    %209 = vector.broadcast %c31_i32_28 : i32 to vector<32x32xi32>
    %210 = arith.cmpi eq, %46, %209 : vector<32x32xi32>
    %c31_i32_29 = arith.constant 31 : i32
    %211 = tpu.dynamic_rotate %204 by %c31_i32_29 dim 1 : vector<32x32xf32>, i32 -> vector<32x32xf32>
    %212 = arith.select %210, %48, %211 : vector<32x32xi1>, vector<32x32xf32>
    %213 = arith.addf %208, %190 : vector<32x32xf32>
    %214 = arith.addf %213, %212 : vector<32x32xf32>
    %c0_i32_30 = arith.constant 0 : i32
    %215 = vector.broadcast %c0_i32_30 : i32 to vector<32x32xi32>
    %216 = arith.cmpi eq, %47, %215 : vector<32x32xi32>
    %c1_i32_31 = arith.constant 1 : i32
    %217 = tpu.dynamic_rotate %110 by %c1_i32_31 dim 0 : vector<32x32xf32>, i32 -> vector<32x32xf32>
    %218 = arith.select %216, %48, %217 : vector<32x32xi1>, vector<32x32xf32>
    %c31_i32_32 = arith.constant 31 : i32
    %219 = vector.broadcast %c31_i32_32 : i32 to vector<32x32xi32>
    %220 = arith.cmpi eq, %47, %219 : vector<32x32xi32>
    %c31_i32_33 = arith.constant 31 : i32
    %221 = tpu.dynamic_rotate %214 by %c31_i32_33 dim 0 : vector<32x32xf32>, i32 -> vector<32x32xf32>
    %222 = arith.select %220, %48, %221 : vector<32x32xi1>, vector<32x32xf32>
    %223 = arith.addf %218, %162 : vector<32x32xf32>
    %224 = arith.addf %223, %222 : vector<32x32xf32>
    %225 = vector.broadcast %45 : f32 to vector<32x32xf32>
    %226 = arith.addf %224, %225 : vector<32x32xf32>
    %cst_34 = arith.constant 5.000000e-01 : f32
    %227 = vector.broadcast %cst_34 : f32 to vector<32x32xf32>
    %228 = arith.mulf %226, %227 : vector<32x32xf32>
    %229 = arith.mulf %226, %226 : vector<32x32xf32>
    %230 = arith.mulf %229, %226 : vector<32x32xf32>
    %cst_35 = arith.constant 4.471500e-02 : f32
    %231 = vector.broadcast %cst_35 : f32 to vector<32x32xf32>
    %232 = arith.mulf %230, %231 : vector<32x32xf32>
    %233 = arith.addf %226, %232 : vector<32x32xf32>
    %cst_36 = arith.constant 0.797884583 : f32
    %234 = vector.broadcast %cst_36 : f32 to vector<32x32xf32>
    %235 = arith.mulf %233, %234 : vector<32x32xf32>
    %236 = math.tanh %235 : vector<32x32xf32>
    %cst_37 = arith.constant 1.000000e+00 : f32
    %237 = vector.broadcast %cst_37 : f32 to vector<32x32xf32>
    %238 = arith.addf %236, %237 : vector<32x32xf32>
    %239 = arith.mulf %228, %238 : vector<32x32xf32>
    %c0_38 = arith.constant 0 : index
    %c0_39 = arith.constant 0 : index
    %c0_40 = arith.constant 0 : index
    %c0_41 = arith.constant 0 : index
    %240 = vector.load %arg3[%c0_38, %c0_39, %c0_40, %c0_41] : memref<2x1x32x32xf32, #tpu.memory_space<vmem>>, vector<1x1x32x32xf32>
    %241 = vector.shape_cast %240 : vector<1x1x32x32xf32> to vector<32x32xf32>
    %242 = vector.shape_cast %239 : vector<32x32xf32> to vector<1x1x32x32xf32>
    tpu.vector_store %arg3[%c0_38, %c0_39, %c0_40, %c0_41], %242 {strides = array<i32>} : memref<2x1x32x32xf32, #tpu.memory_space<vmem>>, vector<1x1x32x32xf32>,
    %c1_42 = arith.constant 1 : index
    %c0_43 = arith.constant 0 : index
    %c0_44 = arith.constant 0 : index
    %c0_45 = arith.constant 0 : index
    %243 = vector.load %arg0[%c1_42, %c0_43, %c0_44, %c0_45] : memref<2x5x32x32xf32, #tpu.memory_space<vmem>>, vector<1x1x32x32xf32>
    %244 = vector.shape_cast %243 : vector<1x1x32x32xf32> to vector<32x32xf32>
    %c1_46 = arith.constant 1 : index
    %c1_47 = arith.constant 1 : index
    %c0_48 = arith.constant 0 : index
    %c0_49 = arith.constant 0 : index
    %245 = vector.load %arg0[%c1_46, %c1_47, %c0_48, %c0_49] : memref<2x5x32x32xf32, #tpu.memory_space<vmem>>, vector<1x1x32x32xf32>
    %246 = vector.shape_cast %245 : vector<1x1x32x32xf32> to vector<32x32xf32>
    %c1_50 = arith.constant 1 : index
    %c2_51 = arith.constant 2 : index
    %c0_52 = arith.constant 0 : index
    %c0_53 = arith.constant 0 : index
    %247 = vector.load %arg0[%c1_50, %c2_51, %c0_52, %c0_53] : memref<2x5x32x32xf32, #tpu.memory_space<vmem>>, vector<1x1x32x32xf32>
    %248 = vector.shape_cast %247 : vector<1x1x32x32xf32> to vector<32x32xf32>
    %c1_54 = arith.constant 1 : index
    %c3_55 = arith.constant 3 : index
    %c0_56 = arith.constant 0 : index
    %c0_57 = arith.constant 0 : index
    %249 = vector.load %arg0[%c1_54, %c3_55, %c0_56, %c0_57] : memref<2x5x32x32xf32, #tpu.memory_space<vmem>>, vector<1x1x32x32xf32>
    %250 = vector.shape_cast %249 : vector<1x1x32x32xf32> to vector<32x32xf32>
    %c1_58 = arith.constant 1 : index
    %c4_59 = arith.constant 4 : index
    %c0_60 = arith.constant 0 : index
    %c0_61 = arith.constant 0 : index
    %251 = vector.load %arg0[%c1_58, %c4_59, %c0_60, %c0_61] : memref<2x5x32x32xf32, #tpu.memory_space<vmem>>, vector<1x1x32x32xf32>
    %252 = vector.shape_cast %251 : vector<1x1x32x32xf32> to vector<32x32xf32>
    %253 = vector.broadcast %0 : f32 to vector<32x32xf32>
    %254 = arith.mulf %244, %253 : vector<32x32xf32>
    %255 = vector.broadcast %9 : f32 to vector<32x32xf32>
    %256 = arith.mulf %246, %255 : vector<32x32xf32>
    %257 = arith.addf %254, %256 : vector<32x32xf32>
    %258 = vector.broadcast %18 : f32 to vector<32x32xf32>
    %259 = arith.mulf %248, %258 : vector<32x32xf32>
    %260 = arith.addf %257, %259 : vector<32x32xf32>
    %261 = vector.broadcast %27 : f32 to vector<32x32xf32>
    %262 = arith.mulf %250, %261 : vector<32x32xf32>
    %263 = arith.addf %260, %262 : vector<32x32xf32>
    %264 = vector.broadcast %36 : f32 to vector<32x32xf32>
    %265 = arith.mulf %252, %264 : vector<32x32xf32>
    %266 = arith.addf %263, %265 : vector<32x32xf32>
    %267 = vector.broadcast %1 : f32 to vector<32x32xf32>
    %268 = arith.mulf %244, %267 : vector<32x32xf32>
    %269 = vector.broadcast %10 : f32 to vector<32x32xf32>
    %270 = arith.mulf %246, %269 : vector<32x32xf32>
    %271 = arith.addf %268, %270 : vector<32x32xf32>
    %272 = vector.broadcast %19 : f32 to vector<32x32xf32>
    %273 = arith.mulf %248, %272 : vector<32x32xf32>
    %274 = arith.addf %271, %273 : vector<32x32xf32>
    %275 = vector.broadcast %28 : f32 to vector<32x32xf32>
    %276 = arith.mulf %250, %275 : vector<32x32xf32>
    %277 = arith.addf %274, %276 : vector<32x32xf32>
    %278 = vector.broadcast %37 : f32 to vector<32x32xf32>
    %279 = arith.mulf %252, %278 : vector<32x32xf32>
    %280 = arith.addf %277, %279 : vector<32x32xf32>
    %281 = vector.broadcast %2 : f32 to vector<32x32xf32>
    %282 = arith.mulf %244, %281 : vector<32x32xf32>
    %283 = vector.broadcast %11 : f32 to vector<32x32xf32>
    %284 = arith.mulf %246, %283 : vector<32x32xf32>
    %285 = arith.addf %282, %284 : vector<32x32xf32>
    %286 = vector.broadcast %20 : f32 to vector<32x32xf32>
    %287 = arith.mulf %248, %286 : vector<32x32xf32>
    %288 = arith.addf %285, %287 : vector<32x32xf32>
    %289 = vector.broadcast %29 : f32 to vector<32x32xf32>
    %290 = arith.mulf %250, %289 : vector<32x32xf32>
    %291 = arith.addf %288, %290 : vector<32x32xf32>
    %292 = vector.broadcast %38 : f32 to vector<32x32xf32>
    %293 = arith.mulf %252, %292 : vector<32x32xf32>
    %294 = arith.addf %291, %293 : vector<32x32xf32>
    %c0_i32_62 = arith.constant 0 : i32
    %295 = vector.broadcast %c0_i32_62 : i32 to vector<32x32xi32>
    %296 = arith.cmpi eq, %46, %295 : vector<32x32xi32>
    %c1_i32_63 = arith.constant 1 : i32
    %297 = tpu.dynamic_rotate %266 by %c1_i32_63 dim 1 : vector<32x32xf32>, i32 -> vector<32x32xf32>
    %298 = arith.select %296, %48, %297 : vector<32x32xi1>, vector<32x32xf32>
    %c31_i32_64 = arith.constant 31 : i32
    %299 = vector.broadcast %c31_i32_64 : i32 to vector<32x32xi32>
    %300 = arith.cmpi eq, %46, %299 : vector<32x32xi32>
    %c31_i32_65 = arith.constant 31 : i32
    %301 = tpu.dynamic_rotate %294 by %c31_i32_65 dim 1 : vector<32x32xf32>, i32 -> vector<32x32xf32>
    %302 = arith.select %300, %48, %301 : vector<32x32xi1>, vector<32x32xf32>
    %303 = arith.addf %298, %280 : vector<32x32xf32>
    %304 = arith.addf %303, %302 : vector<32x32xf32>
    %305 = vector.broadcast %3 : f32 to vector<32x32xf32>
    %306 = arith.mulf %244, %305 : vector<32x32xf32>
    %307 = vector.broadcast %12 : f32 to vector<32x32xf32>
    %308 = arith.mulf %246, %307 : vector<32x32xf32>
    %309 = arith.addf %306, %308 : vector<32x32xf32>
    %310 = vector.broadcast %21 : f32 to vector<32x32xf32>
    %311 = arith.mulf %248, %310 : vector<32x32xf32>
    %312 = arith.addf %309, %311 : vector<32x32xf32>
    %313 = vector.broadcast %30 : f32 to vector<32x32xf32>
    %314 = arith.mulf %250, %313 : vector<32x32xf32>
    %315 = arith.addf %312, %314 : vector<32x32xf32>
    %316 = vector.broadcast %39 : f32 to vector<32x32xf32>
    %317 = arith.mulf %252, %316 : vector<32x32xf32>
    %318 = arith.addf %315, %317 : vector<32x32xf32>
    %319 = vector.broadcast %4 : f32 to vector<32x32xf32>
    %320 = arith.mulf %244, %319 : vector<32x32xf32>
    %321 = vector.broadcast %13 : f32 to vector<32x32xf32>
    %322 = arith.mulf %246, %321 : vector<32x32xf32>
    %323 = arith.addf %320, %322 : vector<32x32xf32>
    %324 = vector.broadcast %22 : f32 to vector<32x32xf32>
    %325 = arith.mulf %248, %324 : vector<32x32xf32>
    %326 = arith.addf %323, %325 : vector<32x32xf32>
    %327 = vector.broadcast %31 : f32 to vector<32x32xf32>
    %328 = arith.mulf %250, %327 : vector<32x32xf32>
    %329 = arith.addf %326, %328 : vector<32x32xf32>
    %330 = vector.broadcast %40 : f32 to vector<32x32xf32>
    %331 = arith.mulf %252, %330 : vector<32x32xf32>
    %332 = arith.addf %329, %331 : vector<32x32xf32>
    %333 = vector.broadcast %5 : f32 to vector<32x32xf32>
    %334 = arith.mulf %244, %333 : vector<32x32xf32>
    %335 = vector.broadcast %14 : f32 to vector<32x32xf32>
    %336 = arith.mulf %246, %335 : vector<32x32xf32>
    %337 = arith.addf %334, %336 : vector<32x32xf32>
    %338 = vector.broadcast %23 : f32 to vector<32x32xf32>
    %339 = arith.mulf %248, %338 : vector<32x32xf32>
    %340 = arith.addf %337, %339 : vector<32x32xf32>
    %341 = vector.broadcast %32 : f32 to vector<32x32xf32>
    %342 = arith.mulf %250, %341 : vector<32x32xf32>
    %343 = arith.addf %340, %342 : vector<32x32xf32>
    %344 = vector.broadcast %41 : f32 to vector<32x32xf32>
    %345 = arith.mulf %252, %344 : vector<32x32xf32>
    %346 = arith.addf %343, %345 : vector<32x32xf32>
    %c0_i32_66 = arith.constant 0 : i32
    %347 = vector.broadcast %c0_i32_66 : i32 to vector<32x32xi32>
    %348 = arith.cmpi eq, %46, %347 : vector<32x32xi32>
    %c1_i32_67 = arith.constant 1 : i32
    %349 = tpu.dynamic_rotate %318 by %c1_i32_67 dim 1 : vector<32x32xf32>, i32 -> vector<32x32xf32>
    %350 = arith.select %348, %48, %349 : vector<32x32xi1>, vector<32x32xf32>
    %c31_i32_68 = arith.constant 31 : i32
    %351 = vector.broadcast %c31_i32_68 : i32 to vector<32x32xi32>
    %352 = arith.cmpi eq, %46, %351 : vector<32x32xi32>
    %c31_i32_69 = arith.constant 31 : i32
    %353 = tpu.dynamic_rotate %346 by %c31_i32_69 dim 1 : vector<32x32xf32>, i32 -> vector<32x32xf32>
    %354 = arith.select %352, %48, %353 : vector<32x32xi1>, vector<32x32xf32>
    %355 = arith.addf %350, %332 : vector<32x32xf32>
    %356 = arith.addf %355, %354 : vector<32x32xf32>
    %357 = vector.broadcast %6 : f32 to vector<32x32xf32>
    %358 = arith.mulf %244, %357 : vector<32x32xf32>
    %359 = vector.broadcast %15 : f32 to vector<32x32xf32>
    %360 = arith.mulf %246, %359 : vector<32x32xf32>
    %361 = arith.addf %358, %360 : vector<32x32xf32>
    %362 = vector.broadcast %24 : f32 to vector<32x32xf32>
    %363 = arith.mulf %248, %362 : vector<32x32xf32>
    %364 = arith.addf %361, %363 : vector<32x32xf32>
    %365 = vector.broadcast %33 : f32 to vector<32x32xf32>
    %366 = arith.mulf %250, %365 : vector<32x32xf32>
    %367 = arith.addf %364, %366 : vector<32x32xf32>
    %368 = vector.broadcast %42 : f32 to vector<32x32xf32>
    %369 = arith.mulf %252, %368 : vector<32x32xf32>
    %370 = arith.addf %367, %369 : vector<32x32xf32>
    %371 = vector.broadcast %7 : f32 to vector<32x32xf32>
    %372 = arith.mulf %244, %371 : vector<32x32xf32>
    %373 = vector.broadcast %16 : f32 to vector<32x32xf32>
    %374 = arith.mulf %246, %373 : vector<32x32xf32>
    %375 = arith.addf %372, %374 : vector<32x32xf32>
    %376 = vector.broadcast %25 : f32 to vector<32x32xf32>
    %377 = arith.mulf %248, %376 : vector<32x32xf32>
    %378 = arith.addf %375, %377 : vector<32x32xf32>
    %379 = vector.broadcast %34 : f32 to vector<32x32xf32>
    %380 = arith.mulf %250, %379 : vector<32x32xf32>
    %381 = arith.addf %378, %380 : vector<32x32xf32>
    %382 = vector.broadcast %43 : f32 to vector<32x32xf32>
    %383 = arith.mulf %252, %382 : vector<32x32xf32>
    %384 = arith.addf %381, %383 : vector<32x32xf32>
    %385 = vector.broadcast %8 : f32 to vector<32x32xf32>
    %386 = arith.mulf %244, %385 : vector<32x32xf32>
    %387 = vector.broadcast %17 : f32 to vector<32x32xf32>
    %388 = arith.mulf %246, %387 : vector<32x32xf32>
    %389 = arith.addf %386, %388 : vector<32x32xf32>
    %390 = vector.broadcast %26 : f32 to vector<32x32xf32>
    %391 = arith.mulf %248, %390 : vector<32x32xf32>
    %392 = arith.addf %389, %391 : vector<32x32xf32>
    %393 = vector.broadcast %35 : f32 to vector<32x32xf32>
    %394 = arith.mulf %250, %393 : vector<32x32xf32>
    %395 = arith.addf %392, %394 : vector<32x32xf32>
    %396 = vector.broadcast %44 : f32 to vector<32x32xf32>
    %397 = arith.mulf %252, %396 : vector<32x32xf32>
    %398 = arith.addf %395, %397 : vector<32x32xf32>
    %c0_i32_70 = arith.constant 0 : i32
    %399 = vector.broadcast %c0_i32_70 : i32 to vector<32x32xi32>
    %400 = arith.cmpi eq, %46, %399 : vector<32x32xi32>
    %c1_i32_71 = arith.constant 1 : i32
    %401 = tpu.dynamic_rotate %370 by %c1_i32_71 dim 1 : vector<32x32xf32>, i32 -> vector<32x32xf32>
    %402 = arith.select %400, %48, %401 : vector<32x32xi1>, vector<32x32xf32>
    %c31_i32_72 = arith.constant 31 : i32
    %403 = vector.broadcast %c31_i32_72 : i32 to vector<32x32xi32>
    %404 = arith.cmpi eq, %46, %403 : vector<32x32xi32>
    %c31_i32_73 = arith.constant 31 : i32
    %405 = tpu.dynamic_rotate %398 by %c31_i32_73 dim 1 : vector<32x32xf32>, i32 -> vector<32x32xf32>
    %406 = arith.select %404, %48, %405 : vector<32x32xi1>, vector<32x32xf32>
    %407 = arith.addf %402, %384 : vector<32x32xf32>
    %408 = arith.addf %407, %406 : vector<32x32xf32>
    %c0_i32_74 = arith.constant 0 : i32
    %409 = vector.broadcast %c0_i32_74 : i32 to vector<32x32xi32>
    %410 = arith.cmpi eq, %47, %409 : vector<32x32xi32>
    %c1_i32_75 = arith.constant 1 : i32
    %411 = tpu.dynamic_rotate %304 by %c1_i32_75 dim 0 : vector<32x32xf32>, i32 -> vector<32x32xf32>
    %412 = arith.select %410, %48, %411 : vector<32x32xi1>, vector<32x32xf32>
    %c31_i32_76 = arith.constant 31 : i32
    %413 = vector.broadcast %c31_i32_76 : i32 to vector<32x32xi32>
    %414 = arith.cmpi eq, %47, %413 : vector<32x32xi32>
    %c31_i32_77 = arith.constant 31 : i32
    %415 = tpu.dynamic_rotate %408 by %c31_i32_77 dim 0 : vector<32x32xf32>, i32 -> vector<32x32xf32>
    %416 = arith.select %414, %48, %415 : vector<32x32xi1>, vector<32x32xf32>
    %417 = arith.addf %412, %356 : vector<32x32xf32>
    %418 = arith.addf %417, %416 : vector<32x32xf32>
    %419 = vector.broadcast %45 : f32 to vector<32x32xf32>
    %420 = arith.addf %418, %419 : vector<32x32xf32>
    %cst_78 = arith.constant 5.000000e-01 : f32
    %421 = vector.broadcast %cst_78 : f32 to vector<32x32xf32>
    %422 = arith.mulf %420, %421 : vector<32x32xf32>
    %423 = arith.mulf %420, %420 : vector<32x32xf32>
    %424 = arith.mulf %423, %420 : vector<32x32xf32>
    %cst_79 = arith.constant 4.471500e-02 : f32
    %425 = vector.broadcast %cst_79 : f32 to vector<32x32xf32>
    %426 = arith.mulf %424, %425 : vector<32x32xf32>
    %427 = arith.addf %420, %426 : vector<32x32xf32>
    %cst_80 = arith.constant 0.797884583 : f32
    %428 = vector.broadcast %cst_80 : f32 to vector<32x32xf32>
    %429 = arith.mulf %427, %428 : vector<32x32xf32>
    %430 = math.tanh %429 : vector<32x32xf32>
    %cst_81 = arith.constant 1.000000e+00 : f32
    %431 = vector.broadcast %cst_81 : f32 to vector<32x32xf32>
    %432 = arith.addf %430, %431 : vector<32x32xf32>
    %433 = arith.mulf %422, %432 : vector<32x32xf32>
    %c1_82 = arith.constant 1 : index
    %c0_83 = arith.constant 0 : index
    %c0_84 = arith.constant 0 : index
    %c0_85 = arith.constant 0 : index
    %434 = vector.load %arg3[%c1_82, %c0_83, %c0_84, %c0_85] : memref<2x1x32x32xf32, #tpu.memory_space<vmem>>, vector<1x1x32x32xf32>
    %435 = vector.shape_cast %434 : vector<1x1x32x32xf32> to vector<32x32xf32>
    %436 = vector.shape_cast %433 : vector<32x32xf32> to vector<1x1x32x32xf32>
    tpu.vector_store %arg3[%c1_82, %c0_83, %c0_84, %c0_85], %436 {strides = array<i32>} : memref<2x1x32x32xf32, #tpu.memory_space<vmem>>, vector<1x1x32x32xf32>,
    return
  }
}

</mosaic_0001>

<bundles_post_ra>
// kernel: conv_gelu.1
= control target key start
LH: loop header
LB: loop body
LE: loop exit
PB: predicated region body
PF: predicated region fallthrough
CT: control target
= control target key end

     0   :  { %9 = vsyncpa [#allocation4], 0  ;;  %s3783_s0 = inlined_call_operand.hbm [shape: f32[2,5,32,32], index: 0, kind: input, shape index: {}]   ;;  %s3784_s1 = inlined_call_operand.vmem [shape: f32[45], index: 1, kind: input, shape index: {}]   ;;  %s3785_s2 = inlined_call_operand.<no memory space> [shape: f32[1], index: 2, kind: input, shape index: {}]   ;;  %s3786_s3 = inlined_call_operand.hbm [shape: f32[2,1,32,32], index: 3, kind: output, shape index: {}]  }
   0x1   :  { %10 = vsyncpa [#allocation6], 0 }
   0x2   :  { %11 = vsyncpa [#allocation5], 0  ;;  %s1770_s12 = smov [#allocation3]   ;;  %s30_s16 = sshll.u32 %s3784_s1, 4  ;;  %s31_s16 = int_to_ptr.vmem [resolvable:$true] %s30_s16 }
   0x3   :  { %s17_s13 = sshll.u32 %s1770_s12, 4  ;;  %s1708_s19 = scalar_lea.hbm %s3783_s0, 5120  ;;  %s18_s13 = int_to_ptr.vmem [resolvable:$true] %s17_s13 }
   0x4   :  { %p1709_p0 = scmp.ne.s32.totalorder %s3783_s0, %s1708_s19  ;;  %p1712_p1 = scmp.lt.u32.totalorder %s1708_s19, %s3783_s0 }
   0x6   :  { %p1714_p2 = pnand %p1712_p1, %p1709_p0 }
   0x8   :  { %1717 = shalt.err (!%p1714_p2)
}
   0x9   :  { %s1718_s24 = scalar_lea.vmem %s18_s13, 5120  ;;  %p1723_p4 = scmp.lt.s32.totalorder %s18_s13, %s18_s13 }
   0xa   :  { %p1719_p3 = scmp.ne.s32.totalorder %s18_s13, %s1718_s24  ;;  %p1724_p5 = scmp.lt.s32.totalorder %s1718_s24, %s1718_s24 }
   0xc   :  { %p1725_p6 = por %p1724_p5, %p1723_p4 }
   0xe   :  { %p1726_p7 = pnand %p1725_p6, %p1719_p3 }
  0x10   :  { %1729 = shalt.err (!%p1726_p7)
}
  0x11   :  { %s1771_s1 = smov 128   ;;  %s1772_s25 = smov 8  }
  0x12   :  { %23 = dma.hbm_to_vmem [thread:$0]  %s3783_s0, 5120, %s18_s13, [#allocation4], %s1771_s1, %s1771_s1, %s1772_s25  }
  0x13   :  { %s1730_s28 = scalar_lea.vmem %s31_s16, 16  ;;  %p1735_p9 = scmp.lt.s32.totalorder %s31_s16, %s31_s16 }
  0x14   :  { %p1731_p8 = scmp.ne.s32.totalorder %s31_s16, %s1730_s28  ;;  %p1736_p10 = scmp.lt.s32.totalorder %s1730_s28, %s1730_s28 }
  0x16   :  { %p1737_p11 = por %p1736_p10, %p1735_p9 }
  0x18   :  { %p1738_p12 = pnand %p1737_p11, %p1731_p8 }
  0x1a   :  { %1741 = shalt.err (!%p1738_p12)
}
  0x1b   :  { %s1773_s29 = smov [#allocation7]  }
  0x1c   :  { %33 = dma.vmem_to_smem %s31_s16, 16, %s1773_s29, [#allocation6]  }
  0x1d   :  { %1764 = dma.done.wait [#allocation4], 5120  }
  0x1e   :  { %1765 = vsyncadd [#allocation4], 4294962176 }
  0x1f   :  { %1766 = dma.done.wait [#allocation6], 16  }
  0x20   :  { %1767 = vsyncadd [#allocation6], 4294967280 }
  0x21   :  { %42 = sfence }
  0x22   :  { %s43_s30 = sld [smem:[#allocation7]]  ;;  %s1608_s4 = sld [smem:[#allocation7 + $0x9]]  ;;  %v1816_v0 = vld [vmem:[#allocation3] sm:$0xff]  ;;  %v1826_v5 = vld [vmem:[#allocation3 + $0x10] sm:$0xff]  ;;  %v1850_v16 = vld [vmem:[#allocation3 + $0x8] sm:$0xff]  ;;  %vm244_vm0 = vcmask 1047808  }
  0x23   :  { %s1617_s5 = sld [smem:[#allocation7 + $0x12]]  ;;  %s1626_s6 = sld [smem:[#allocation7 + $0x1b]]  ;;  %v1818_v1 = vld [vmem:[#allocation3 + $0x20] sm:$0xff]  ;;  %3919 = vst [vmem:[#allocation12_spill] sm:$0xff] %v1826_v5  ;;  %v1832_v8 = vld [vmem:[#allocation3 + $0x30] sm:$0xff]  ;;  %v1852_v17 = vld [vmem:[#allocation3 + $0x28] sm:$0xff] }
  0x24   :  { %s1635_s0 = sld [smem:[#allocation7 + $0x24]]  ;;  %v1820_v2 = vld [vmem:[#allocation3 + $0x40] sm:$0xff]  ;;  %3920 = vst [vmem:[#allocation13_spill] sm:$0xff] %v1832_v8  ;;  %v1834_v9 = vld [vmem:[#allocation3 + $0x50] sm:$0xff]  ;;  %s1838_s7 = sld [smem:[#allocation7 + $0x2]]  ;;  %v1864_v22 = vld [vmem:[#allocation3 + $0x48] sm:$0xff] }
  0x25   :  { %v1822_v3 = vld [vmem:[#allocation3 + $0x60] sm:$0xff]  ;;  %3921 = vst [vmem:[#allocation14_spill] sm:$0xff] %v1834_v9  ;;  %v1836_v10 = vld [vmem:[#allocation3 + $0x70] sm:$0xff]  ;;  %s1854_s8 = sld [smem:[#allocation7 + $0xb]]  ;;  %v1866_v23 = vld [vmem:[#allocation3 + $0x68] sm:$0xff]  ;;  %s1870_s9 = sld [smem:[#allocation7 + $0x14]] }
  0x26   :  { %v1824_v4 = vld [vmem:[#allocation3 + $0x80] sm:$0xff]  ;;  %3922 = vst [vmem:[#allocation15_spill] sm:$0xff] %v1836_v10  ;;  %v1848_v15 = vld [vmem:[#allocation3 + $0x90] sm:$0xff]  ;;  %3924 = vst [vmem:[#allocation17_spill] sm:$0xff] %v1866_v23  ;;  %s1882_s10 = sld [smem:[#allocation7 + $0x1d]]  ;;  %s1884_s11 = sld [smem:[#allocation7 + $0x26]] }
  0x27   :  { %3923 = vst [vmem:[#allocation16_spill] sm:$0xff] %v1848_v15  ;;  %v1868_v24 = vld [vmem:[#allocation3 + $0x88] sm:$0xff]  ;;  %v1878_v29 = vld [vmem:[#allocation3 + $0x18] sm:$0xff]  ;;  %s1931_s12 = sld [smem:[#allocation7 + $0x3]]  ;;  %s1774_s13 = smov 32   ;;  %vm863_vm7 = vcmask 261120  }
  0x28   :  { %v1828_v6 = vstv %s43_s30  ;;  %v1830_v7 = vstv %s1608_s4  ;;  %v1880_v30 = vld [vmem:[#allocation3 + $0x38] sm:$0xff]  ;;  %s1945_s14 = sld [smem:[#allocation7 + $0xc]]  ;;  %s1951_s15 = sld [smem:[#allocation7 + $0x15]] }
  0x29   :  { %v121_v11 = vmul.f32 %v1828_v6, %v1816_v0  ;;  %v126_v12 = vmul.f32 %v1830_v7, %v1818_v1  ;;  %v1844_v13 = vstv %s1617_s5  ;;  %v1846_v14 = vstv %s1626_s6  ;;  %v1894_v35 = vld [vmem:[#allocation3 + $0x58] sm:$0xff]  ;;  %s1953_s16 = sld [smem:[#allocation7 + $0x1e]]  ;;  %s1971_s17 = sld [smem:[#allocation7 + $0x27]] }
  0x2a   :  { %v135_v18 = vmul.f32 %v1844_v13, %v1820_v2  ;;  %v144_v19 = vmul.f32 %v1846_v14, %v1822_v3  ;;  %v1860_v20 = vstv %s1635_s0  ;;  %v123_v21 = vmul.f32 %v1828_v6, %v1826_v5  ;;  %v1896_v36 = vld [vmem:[#allocation3 + $0x78] sm:$0xff]  ;;  %s2090_s18 = sld [smem:[#allocation7 + $0x6]]  ;;  %s2104_s19 = sld [smem:[#allocation7 + $0xf]] }
  0x2b   :  { %v130_v25 = vadd.f32 %v126_v12, %v121_v11  ;;  %v153_v26 = vmul.f32 %v1860_v20, %v1824_v4  ;;  %v128_v27 = vmul.f32 %v1830_v7, %v1832_v8  ;;  %v137_v28 = vmul.f32 %v1844_v13, %v1834_v9  ;;  %3925 = vst [vmem:[#allocation18_spill] sm:$0xff] %v1896_v36  ;;  %v1902_v41 = vld [vmem:[#allocation3 + $0x98] sm:$0xff]  ;;  %s2116_s20 = sld [smem:[#allocation7 + $0x18]]  ;;  %s2118_s21 = sld [smem:[#allocation7 + $0x21]] }
  0x2c   :  { %v146_v31 = vmul.f32 %v1846_v14, %v1836_v10  ;;  %v155_v32 = vmul.f32 %v1860_v20, %v1848_v15  ;;  %v122_v33 = vmul.f32 %v1828_v6, %v1850_v16  ;;  %v127_v34 = vmul.f32 %v1830_v7, %v1852_v17  ;;  %3926 = vst [vmem:[#allocation19_spill] sm:$0xff] %v1902_v41  ;;  %s2142_s22 = sld [smem:[#allocation7 + $0x2a]]  ;;  %s2311_s23 = sld [smem:[#allocation7 + $0x8]] }
  0x2d   :  { %v139_v37 = vadd.f32 %v135_v18, %v130_v25  ;;  %v132_v38 = vadd.f32 %v128_v27, %v123_v21  ;;  %v136_v39 = vmul.f32 %v1844_v13, %v1864_v22  ;;  %v145_v40 = vmul.f32 %v1846_v14, %v1866_v23  ;;  %s2321_s24 = sld [smem:[#allocation7 + $0x11]]  ;;  %s2323_s26 = sld [smem:[#allocation7 + $0x1a]] }
  0x2e   :  { %v131_v42 = vadd.f32 %v127_v34, %v122_v33  ;;  %v154_v43 = vmul.f32 %v1860_v20, %v1868_v24  ;;  %v124_v44 = vmul.f32 %v1828_v6, %v1878_v29  ;;  %v129_v45 = vmul.f32 %v1830_v7, %v1880_v30  ;;  %s2339_s27 = sld [smem:[#allocation7 + $0x23]]  ;;  %s2341_s28 = sld [smem:[#allocation7 + $0x2c]] }
  0x2f   :  { %v148_v46 = vadd.f32 %v144_v19, %v139_v37  ;;  %v141_v47 = vadd.f32 %v137_v28, %v132_v38  ;;  %v138_v48 = vmul.f32 %v1844_v13, %v1894_v35  ;;  %v147_v49 = vmul.f32 %v1846_v14, %v1896_v36  ;;  %s2502_s29 = sld [smem:[#allocation7 + $0x5]]  ;;  %s2514_s30 = sld [smem:[#allocation7 + $0xe]] }
  0x30   :  { %v140_v50 = vadd.f32 %v136_v39, %v131_v42  ;;  %v133_v51 = vadd.f32 %v129_v45, %v124_v44  ;;  %v156_v52 = vmul.f32 %v1860_v20, %v1902_v41  ;;  %v1917_v53 = vstv %s1838_s7  ;;  %s2518_s4 = sld [smem:[#allocation7 + $0x17]]  ;;  %s2520_s5 = sld [smem:[#allocation7 + $0x20]] }
  0x31   :  { %v1919_v54 = vadd.f32 %v153_v26, %v148_v46  ;;  %v150_v55 = vadd.f32 %v146_v31, %v141_v47  ;;  %v203_v56 = vmul.f32 %v1917_v53, %v1816_v0  ;;  %v1924_v57 = vstv %s1854_s8  ;;  %s2534_s6 = sld [smem:[#allocation7 + $0x29]]  ;;  %s1775_s0 = smov 97  }
  0x32   :  { %v149_v58 = vadd.f32 %v145_v40, %v140_v50  ;;  %v142_v59 = vadd.f32 %v138_v48, %v133_v51  ;;  %v208_v60 = vmul.f32 %v1924_v57, %v1818_v1  ;;  %v1929_v61 = vstv %s1870_s9  ;;  %s1776_s7 = smov 127   ;;  %s1600_s8 = sld [smem:[#allocation7 + $0x1]] }
  0x33   :  { %3927 = vst [vmem:[#allocation20_spill] sm:$0xff] %v1919_v54  ;;  %245 = vrot.lane.b32.xlu0 %v1919_v54, %s1774_s13  ;;  %v1935_v62 = vadd.f32 %v155_v32, %v150_v55  ;;  %v217_v63 = vmul.f32 %v1929_v61, %v1820_v2  ;;  %v1940_v11 = vstv %s1882_s10  ;;  %v1943_v12 = vstv %s1884_s11  ;;  %v2112_v54 = vld [vmem:[#allocation3 + $0xc8] sm:$0xff]  ;;  %s1609_s9 = sld [smem:[#allocation7 + $0xa]]  ;;  %s1618_s10 = sld [smem:[#allocation7 + $0x13]] }
  0x34   :  { %v1947_v18 = vadd.f32 %v154_v43, %v149_v58  ;;  %v151_v19 = vadd.f32 %v147_v49, %v142_v59  ;;  %v212_v21 = vadd.f32 %v208_v60, %v203_v56  ;;  %v226_v25 = vmul.f32 %v1940_v11, %v1822_v3  ;;  %3946 = vst [vmem:[#allocation39_spill] sm:$0xff] %v2112_v54  ;;  %s1627_s11 = sld [smem:[#allocation7 + $0x1c]] }
  0x35   :  { %3928 = vst [vmem:[#allocation21_spill] sm:$0xff] %v1935_v62  ;;  %251 = vrot.lane.b32.xlu1 %v1935_v62, %s1774_s13  ;;  %v235_v26 = vmul.f32 %v1943_v12, %v1824_v4  ;;  %v204_v27 = vmul.f32 %v1917_v53, %v1850_v16  ;;  %v209_v28 = vmul.f32 %v1924_v57, %v1852_v17  ;;  %v2000_v56 = vstv %s1931_s12  ;;  %s2994_s12 = sld [smem:[#allocation7 + $0x25]] }
  0x36   :  { %3929 = vst [vmem:[#allocation22_spill] sm:$0xff] %v1947_v18  ;;  %v218_v31 = vmul.f32 %v1929_v61, %v1864_v22  ;;  %v1965_v32 = vadd.f32 %v156_v52, %v151_v19  ;;  %v221_v33 = vadd.f32 %v217_v63, %v212_v21  ;;  %v227_v34 = vmul.f32 %v1940_v11, %v1866_v23 }
  0x37   :  { %v236_v37 = vmul.f32 %v1943_v12, %v1868_v24  ;;  %248 = vrot.lane.b32.xlu0 %v1947_v18, %s1774_s13  ;;  %v213_v38 = vadd.f32 %v209_v28, %v204_v27  ;;  %v205_v39 = vmul.f32 %v1917_v53, %v1826_v5  ;;  %v210_v40 = vmul.f32 %v1924_v57, %v1832_v8 }
  0x38   :  { %3930 = vst [vmem:[#allocation23_spill] sm:$0xff] %v1965_v32  ;;  %v219_v42 = vmul.f32 %v1929_v61, %v1834_v9  ;;  %v230_v43 = vadd.f32 %v226_v25, %v221_v33  ;;  %v228_v44 = vmul.f32 %v1940_v11, %v1836_v10  ;;  %v237_v45 = vmul.f32 %v1943_v12, %v1848_v15 }
  0x39   :  { %v206_v46 = vmul.f32 %v1917_v53, %v1878_v29  ;;  %254 = vrot.lane.b32.xlu1 %v1965_v32, %s1774_s13  ;;  %v222_v47 = vadd.f32 %v218_v31, %v213_v38  ;;  %v214_v48 = vadd.f32 %v210_v40, %v205_v39  ;;  %v211_v49 = vmul.f32 %v1924_v57, %v1880_v30  ;;  %v2088_v32 = vld [vmem:[#allocation3 + $0x118] sm:$0xff] }
  0x3a   :  { %v220_v50 = vmul.f32 %v1929_v61, %v1894_v35  ;;  %v1993_v51 = vadd.f32 %v235_v26, %v230_v43  ;;  %v229_v52 = vmul.f32 %v1940_v11, %v1896_v36  ;;  %v238_v55 = vmul.f32 %v1943_v12, %v1902_v41  ;;  %3932 = vst [vmem:[#allocation25_spill] sm:$0xff] %v2000_v56 }
  0x3b   :  { %v231_v58 = vadd.f32 %v227_v34, %v222_v47  ;;  %v223_v59 = vadd.f32 %v219_v42, %v214_v48  ;;  %v215_v60 = vadd.f32 %v211_v49, %v206_v46  ;;  %v343_v63 = vmul.f32 %v2000_v56, %v1816_v0  ;;  %3942 = vst [vmem:[#allocation35_spill] sm:$0xff] %v2088_v32 }
  0x3c   :  { %3931 = vst [vmem:[#allocation24_spill] sm:$0xff] %v1993_v51  ;;  %290 = vrot.lane.b32.xlu0 %v1993_v51, %s1774_s13  ;;  %v2007_v19 = vstv %s1945_s14  ;;  %v2010_v21 = vstv %s1951_s15  ;;  %v2013_v25 = vstv %s1953_s16  ;;  %v344_v26 = vmul.f32 %v2000_v56, %v1850_v16  ;;  %v2086_v51 = vld [vmem:[#allocation3 + $0xf8] sm:$0xff]  ;;  %s1612_s14 = sld [smem:[#allocation7 + $0xd]]  ;;  %s1621_s15 = sld [smem:[#allocation7 + $0x16]] }
  0x3d   :  { %3933 = vst [vmem:[#allocation26_spill] sm:$0xff] %v2007_v19  ;;  %3934 = vst [vmem:[#allocation27_spill] sm:$0xff] %v2010_v21  ;;  %v2017_v27 = vadd.f32 %v236_v37, %v231_v58  ;;  %v232_v28 = vadd.f32 %v228_v44, %v223_v59  ;;  %v224_v31 = vadd.f32 %v220_v50, %v215_v60  ;;  %v2026_v39 = vstv %s1971_s17  ;;  %s1630_s16 = sld [smem:[#allocation7 + $0x1f]]  ;;  %s1639_s17 = sld [smem:[#allocation7 + $0x28]] }
  0x3e   :  { %3935 = vst [vmem:[#allocation28_spill] sm:$0xff] %v2013_v25  ;;  %v348_v33 = vmul.f32 %v2007_v19, %v1818_v1  ;;  %v357_v34 = vmul.f32 %v2010_v21, %v1820_v2  ;;  %v366_v38 = vmul.f32 %v2013_v25, %v1822_v3  ;;  %3937 = vst [vmem:[#allocation30_spill] sm:$0xff] %v2026_v39 }
  0x3f   :  { %3936 = vst [vmem:[#allocation29_spill] sm:$0xff] %v2017_v27  ;;  %v349_v40 = vmul.f32 %v2007_v19, %v1852_v17  ;;  %293 = vrot.lane.b32.xlu1 %v2017_v27, %s1774_s13  ;;  %v2032_v37 = vadd.f32 %v237_v45, %v232_v28  ;;  %v233_v42 = vadd.f32 %v229_v52, %v224_v31  ;;  %v2056_v28 = vld [vmem:[#allocation3 + $0xa0] sm:$0xff] }
  0x40   :  { %v352_v43 = vadd.f32 %v348_v33, %v343_v63  ;;  %v375_v44 = vmul.f32 %v2026_v39, %v1824_v4  ;;  %v358_v47 = vmul.f32 %v2010_v21, %v1864_v22  ;;  %v367_v48 = vmul.f32 %v2013_v25, %v1866_v23 }
  0x41   :  { %3938 = vst [vmem:[#allocation31_spill] sm:$0xff] %v2032_v37  ;;  %v353_v46 = vadd.f32 %v349_v40, %v344_v26  ;;  %v376_v49 = vmul.f32 %v2026_v39, %v1868_v24  ;;  %296 = vrot.lane.b32.xlu0 %v2032_v37, %s1774_s13  ;;  %v2044_v45 = vadd.f32 %v238_v55, %v233_v42  ;;  %v2064_v40 = vld [vmem:[#allocation3 + $0xc0] sm:$0xff] }
  0x42   :  { %v361_v50 = vadd.f32 %v357_v34, %v352_v43  ;;  %v345_v52 = vmul.f32 %v2000_v56, %v1826_v5  ;;  %v350_v58 = vmul.f32 %v2007_v19, %v1832_v8  ;;  %v359_v60 = vmul.f32 %v2010_v21, %v1834_v9  ;;  %v2066_v42 = vld [vmem:[#allocation3 + $0xe0] sm:$0xff] }
  0x43   :  { %3939 = vst [vmem:[#allocation32_spill] sm:$0xff] %v2044_v45  ;;  %v362_v59 = vadd.f32 %v358_v47, %v353_v46  ;;  %v368_v63 = vmul.f32 %v2013_v25, %v1836_v10  ;;  %v377_v26 = vmul.f32 %v2026_v39, %v1848_v15  ;;  %299 = vrot.lane.b32.xlu1 %v2044_v45, %s1774_s13  ;;  %v2068_v43 = vld [vmem:[#allocation3 + $0x100] sm:$0xff] }
  0x44   :  { %v370_v55 = vadd.f32 %v366_v38, %v361_v50  ;;  %v354_v31 = vadd.f32 %v350_v58, %v345_v52  ;;  %v346_v33 = vmul.f32 %v2000_v56, %v1878_v29  ;;  %v351_v34 = vmul.f32 %v2007_v19, %v1880_v30  ;;  %3940 = vst [vmem:[#allocation33_spill] sm:$0xff] %v2068_v43  ;;  %v2076_v52 = vld [vmem:[#allocation3 + $0x120] sm:$0xff]  ;;  %v2078_v58 = vld [vmem:[#allocation3 + $0xb8] sm:$0xff] }
  0x45   :  { %v371_v46 = vadd.f32 %v367_v48, %v362_v59  ;;  %v360_v47 = vmul.f32 %v2010_v21, %v1894_v35  ;;  %v369_v38 = vmul.f32 %v2013_v25, %v1896_v36  ;;  %v378_v50 = vmul.f32 %v2026_v39, %v1902_v41  ;;  %v2084_v59 = vld [vmem:[#allocation3 + $0xd8] sm:$0xff]  ;;  %v2114_v39 = vld [vmem:[#allocation3 + $0xe8] sm:$0xff]  ;;  %v2132_v21 = vld [vmem:[#allocation3 + $0xb0] sm:$0xff] }
  0x46   :  { %v2080_v45 = vadd.f32 %v375_v44, %v370_v55  ;;  %v363_v37 = vadd.f32 %v359_v60, %v354_v31  ;;  %v355_v27 = vadd.f32 %v351_v34, %v346_v33  ;;  %v893_v48 = vmul.f32 %v2056_v28, %v1828_v6  ;;  %v2100_v55 = vld [vmem:[#allocation3 + $0x138] sm:$0xff]  ;;  %v2102_v31 = vld [vmem:[#allocation3 + $0xa8] sm:$0xff]  ;;  %3947 = vst [vmem:[#allocation40_spill] sm:$0xff] %v2114_v39 }
  0x47   :  { %v2092_v18 = vadd.f32 %v376_v49, %v371_v46  ;;  %v897_v62 = vmul.f32 %v2064_v40, %v1830_v7  ;;  %v905_v44 = vmul.f32 %v2066_v42, %v1844_v13  ;;  %v913_v60 = vmul.f32 %v2068_v43, %v1846_v14  ;;  %3944 = vst [vmem:[#allocation37_spill] sm:$0xff] %v2100_v55  ;;  %v2130_v25 = vld [vmem:[#allocation3 + $0x128] sm:$0xff] }
  0x48   :  { %3941 = vst [vmem:[#allocation34_spill] sm:$0xff] %v2080_v45  ;;  %3945 = vst [vmem:[#allocation38_spill] sm:$0xff] %v2102_v31  ;;  %465 = vrot.lane.b32.xlu0 %v2080_v45, %s1774_s13  ;;  %v372_v49 = vadd.f32 %v368_v63, %v363_v37  ;;  %v364_v33 = vadd.f32 %v360_v47, %v355_v27  ;;  %v921_v34 = vmul.f32 %v2076_v52, %v1860_v20  ;;  %v2128_v47 = vld [vmem:[#allocation3 + $0x108] sm:$0xff] }
  0x49   :  { %3943 = vst [vmem:[#allocation36_spill] sm:$0xff] %v2092_v18  ;;  %v896_v46 = vmul.f32 %v2078_v58, %v1828_v6  ;;  %468 = vrot.lane.b32.xlu1 %v2092_v18, %s1774_s13  ;;  %v901_v45 = vadd.f32 %v897_v62, %v893_v48  ;;  %v900_v27 = vmul.f32 %v2084_v59, %v1830_v7  ;;  %3948 = vst [vmem:[#allocation41_spill] sm:$0xff] %v2132_v21  ;;  %v2140_v18 = vld [vmem:[#allocation3 + $0xd0] sm:$0xff] }
  0x4a   :  { %v908_v37 = vmul.f32 %v2086_v51, %v1844_v13  ;;  %v916_v63 = vmul.f32 %v2088_v32, %v1846_v14  ;;  %v2134_v19 = vadd.f32 %v377_v26, %v372_v49  ;;  %v373_v56 = vadd.f32 %v369_v38, %v364_v33  ;;  %v2148_v49 = vld [vmem:[#allocation3 + $0xf0] sm:$0xff] }
  0x4b   :  { %v924_v62 = vmul.f32 %v2100_v55, %v1860_v20  ;;  %v894_v48 = vmul.f32 %v2102_v31, %v1828_v6  ;;  %v909_v15 = vadd.f32 %v905_v44, %v901_v45  ;;  %v904_v10 = vadd.f32 %v900_v27, %v896_v46  ;;  %v2150_v38 = vld [vmem:[#allocation3 + $0x110] sm:$0xff] }
  0x4c   :  { %3949 = vst [vmem:[#allocation42_spill] sm:$0xff] %v2134_v19  ;;  %v898_v9 = vmul.f32 %v2112_v54, %v1830_v7  ;;  %v906_v26 = vmul.f32 %v2114_v39, %v1844_v13  ;;  %v2152_v33 = vld [vmem:[#allocation3 + $0x130] sm:$0xff]  ;;  %471 = vrot.lane.b32.xlu0 %v2134_v19, %s1774_s13  ;;  %v2156_v31 = vadd.f32 %v378_v50, %v373_v56 }
  0x4d   :  { %v914_v45 = vmul.f32 %v2128_v47, %v1846_v14  ;;  %v922_v44 = vmul.f32 %v2130_v25, %v1860_v20  ;;  %v895_v46 = vmul.f32 %v2132_v21, %v1828_v6  ;;  %v917_v27 = vadd.f32 %v913_v60, %v909_v15 }
  0x4e   :  { %3950 = vst [vmem:[#allocation43_spill] sm:$0xff] %v2156_v31  ;;  %v912_v39 = vadd.f32 %v908_v37, %v904_v10  ;;  %v902_v54 = vadd.f32 %v898_v9, %v894_v48  ;;  %v899_v19 = vmul.f32 %v2140_v18, %v1830_v7  ;;  %474 = vrot.lane.b32.xlu1 %v2156_v31, %s1774_s13  ;;  %v2175_v21 = vstv %s2090_s18  ;;  %s1606_s18 = sld [smem:[#allocation7 + $0x7]] }
  0x4f   :  { %v907_v56 = vmul.f32 %v2148_v49, %v1844_v13  ;;  %v915_v50 = vmul.f32 %v2150_v38, %v1846_v14  ;;  %v923_v6 = vmul.f32 %v2152_v33, %v1860_v20  ;;  %v2177_v10 = vadd.f32 %v921_v34, %v917_v27 }
  0x50   :  { %v920_v9 = vadd.f32 %v916_v63, %v912_v39  ;;  %v910_v15 = vadd.f32 %v906_v26, %v902_v54  ;;  %v903_v7 = vadd.f32 %v899_v19, %v895_v46  ;;  %v562_v60 = vmul.f32 %v2175_v21, %v1816_v0 }
  0x51   :  { %3951 = vst [vmem:[#allocation44_spill] sm:$0xff] %v2177_v10  ;;  %v2182_v37 = vstv %s2104_s19  ;;  %v2185_v13 = vstv %s2116_s20  ;;  %v2188_v48 = vstv %s2118_s21  ;;  %1001 = vrot.lane.b32.xlu0 %v2177_v10, %s1774_s13  ;;  %v565_v26 = vmul.f32 %v2175_v21, %v1878_v29  ;;  %s1615_s19 = sld [smem:[#allocation7 + $0x10]]  ;;  %s3167_s20 = sld [smem:[#allocation7 + $0x19]] }
  0x52   :  { %v2192_v14 = vadd.f32 %v924_v62, %v920_v9  ;;  %v918_v20 = vadd.f32 %v914_v45, %v910_v15  ;;  %v911_v34 = vadd.f32 %v907_v56, %v903_v7  ;;  %v567_v54 = vmul.f32 %v2182_v37, %v1818_v1  ;;  %s3203_s21 = sld [smem:[#allocation7 + $0x22]] }
  0x53   :  { %v576_v19 = vmul.f32 %v2185_v13, %v1820_v2  ;;  %v585_v39 = vmul.f32 %v2188_v48, %v1822_v3  ;;  %v2201_v63 = vstv %s2142_s22  ;;  %v570_v56 = vmul.f32 %v2182_v37, %v1880_v30  ;;  %s3253_s22 = sld [smem:[#allocation7 + $0x2b]] }
  0x54   :  { %3952 = vst [vmem:[#allocation45_spill] sm:$0xff] %v2192_v14  ;;  %1010 = vrot.lane.b32.xlu1 %v2192_v14, %s1774_s13  ;;  %v2207_v62 = vadd.f32 %v922_v44, %v918_v20  ;;  %v919_v45 = vadd.f32 %v915_v50, %v911_v34  ;;  %v571_v46 = vadd.f32 %v567_v54, %v562_v60 }
  0x55   :  { %v594_v27 = vmul.f32 %v2201_v63, %v1824_v4  ;;  %v579_v9 = vmul.f32 %v2185_v13, %v1894_v35  ;;  %v588_v15 = vmul.f32 %v2188_v48, %v1896_v36  ;;  %v597_v7 = vmul.f32 %v2201_v63, %v1902_v41 }
  0x56   :  { %3953 = vst [vmem:[#allocation46_spill] sm:$0xff] %v2207_v62  ;;  %1004 = vrot.lane.b32.xlu0 %v2207_v62, %s1774_s13  ;;  %v2221_v44 = vadd.f32 %v923_v6, %v919_v45  ;;  %v580_v50 = vadd.f32 %v576_v19, %v571_v46  ;;  %v965_v60 = vmul.f32 %v2056_v28, %v1917_v53 }
  0x57   :  { %v969_v20 = vmul.f32 %v2064_v40, %v1924_v57  ;;  %v574_v34 = vadd.f32 %v570_v56, %v565_v26  ;;  %v977_v54 = vmul.f32 %v2066_v42, %v1929_v61  ;;  %v985_v14 = vmul.f32 %v2068_v43, %v1940_v11 }
  0x58   :  { %3954 = vst [vmem:[#allocation47_spill] sm:$0xff] %v2221_v44  ;;  %v993_v10 = vmul.f32 %v2076_v52, %v1943_v12  ;;  %1007 = vrot.lane.b32.xlu1 %v2221_v44, %s1774_s13  ;;  %v589_v6 = vadd.f32 %v585_v39, %v580_v50  ;;  %v968_v45 = vmul.f32 %v2078_v58, %v1917_v53 }
  0x59   :  { %v973_v19 = vadd.f32 %v969_v20, %v965_v60  ;;  %v972_v26 = vmul.f32 %v2084_v59, %v1924_v57  ;;  %v583_v46 = vadd.f32 %v579_v9, %v574_v34  ;;  %v980_v56 = vmul.f32 %v2086_v51, %v1929_v61 }
  0x5a   :  { %v988_v62 = vmul.f32 %v2088_v32, %v1940_v11  ;;  %v996_v31 = vmul.f32 %v2100_v55, %v1943_v12  ;;  %v2245_v41 = vadd.f32 %v594_v27, %v589_v6  ;;  %v1301_v60 = vmul.f32 %v2056_v28, %v2175_v21 }
  0x5b   :  { %v981_v39 = vadd.f32 %v977_v54, %v973_v19  ;;  %v976_v50 = vadd.f32 %v972_v26, %v968_v45  ;;  %v592_v20 = vadd.f32 %v588_v15, %v583_v46  ;;  %v1305_v9 = vmul.f32 %v2064_v40, %v2182_v37 }
  0x5c   :  { %3955 = vst [vmem:[#allocation48_spill] sm:$0xff] %v2245_v41  ;;  %v1313_v34 = vmul.f32 %v2066_v42, %v2185_v13  ;;  %v1321_v44 = vmul.f32 %v2068_v43, %v2188_v48  ;;  %684 = vrot.lane.b32.xlu0 %v2245_v41, %s1774_s13  ;;  %v1329_v54 = vmul.f32 %v2076_v52, %v2201_v63 }
  0x5d   :  { %v989_v27 = vadd.f32 %v985_v14, %v981_v39  ;;  %v984_v6 = vadd.f32 %v980_v56, %v976_v50  ;;  %v1304_v15 = vmul.f32 %v2078_v58, %v2175_v21  ;;  %v2261_v19 = vadd.f32 %v597_v7, %v592_v20 }
  0x5e   :  { %v1309_v45 = vadd.f32 %v1305_v9, %v1301_v60  ;;  %v1308_v26 = vmul.f32 %v2084_v59, %v2182_v37  ;;  %v1316_v46 = vmul.f32 %v2086_v51, %v2185_v13  ;;  %v1324_v14 = vmul.f32 %v2088_v32, %v2188_v48 }
  0x5f   :  { %3956 = vst [vmem:[#allocation49_spill] sm:$0xff] %v2261_v19  ;;  %v2267_v43 = vadd.f32 %v993_v10, %v989_v27  ;;  %v992_v41 = vadd.f32 %v988_v62, %v984_v6  ;;  %v1332_v56 = vmul.f32 %v2100_v55, %v2201_v63  ;;  %693 = vrot.lane.b32.xlu1 %v2261_v19, %s1774_s13  ;;  %v3961_v19 = vld [vmem:[#allocation16_spill] sm:$0xff] }
  0x60   :  { %v1317_v7 = vadd.f32 %v1313_v34, %v1309_v45  ;;  %v1312_v39 = vadd.f32 %v1308_v26, %v1304_v15  ;;  %v563_v50 = vmul.f32 %v2175_v21, %v1850_v16  ;;  %v568_v60 = vmul.f32 %v2182_v37, %v1852_v17  ;;  %v3960_v26 = vld [vmem:[#allocation15_spill] sm:$0xff] }
  0x61   :  { %3957 = vst [vmem:[#allocation50_spill] sm:$0xff] %v2267_v43  ;;  %1045 = vrot.lane.b32.xlu0 %v2267_v43, %s1774_s13  ;;  %v2281_v10 = vadd.f32 %v996_v31, %v992_v41  ;;  %v577_v62 = vmul.f32 %v2185_v13, %v1864_v22  ;;  %v586_v20 = vmul.f32 %v2188_v48, %v1866_v23  ;;  %v3959_v41 = vld [vmem:[#allocation14_spill] sm:$0xff] }
  0x62   :  { %v595_v9 = vmul.f32 %v2201_v63, %v1868_v24  ;;  %v1325_v34 = vadd.f32 %v1321_v44, %v1317_v7  ;;  %v1320_v27 = vadd.f32 %v1316_v46, %v1312_v39  ;;  %v572_v6 = vadd.f32 %v568_v60, %v563_v50  ;;  %v3963_v39 = vld [vmem:[#allocation38_spill] sm:$0xff] }
  0x63   :  { %3958 = vst [vmem:[#allocation51_spill] sm:$0xff] %v2281_v10  ;;  %v564_v15 = vmul.f32 %v2175_v21, %v1826_v5  ;;  %v569_v45 = vmul.f32 %v2182_v37, %v1832_v8  ;;  %v578_v31 = vmul.f32 %v2185_v13, %v3959_v41  ;;  %v587_v43 = vmul.f32 %v2188_v48, %v3960_v26  ;;  %v3964_v8 = vld [vmem:[#allocation39_spill] sm:$0xff]  ;;  %v3965_v5 = vld [vmem:[#allocation40_spill] sm:$0xff] }
  0x64   :  { %v596_v23 = vmul.f32 %v2201_v63, %v3961_v19  ;;  %1054 = vrot.lane.b32.xlu1 %v2281_v10, %s1774_s13  ;;  %v2301_v44 = vadd.f32 %v1329_v54, %v1325_v34  ;;  %v1328_v46 = vadd.f32 %v1324_v14, %v1320_v27  ;;  %v581_v7 = vadd.f32 %v577_v62, %v572_v6  ;;  %v3967_v34 = vld [vmem:[#allocation41_spill] sm:$0xff] }
  0x65   :  { %v966_v50 = vmul.f32 %v3963_v39, %v1917_v53  ;;  %v573_v60 = vadd.f32 %v569_v45, %v564_v15  ;;  %v970_v41 = vmul.f32 %v3964_v8, %v1924_v57  ;;  %v978_v26 = vmul.f32 %v3965_v5, %v1929_v61 }
  0x66   :  { %3962 = vst [vmem:[#allocation52_spill] sm:$0xff] %v2301_v44  ;;  %v986_v19 = vmul.f32 %v2128_v47, %v1940_v11  ;;  %1409 = vrot.lane.b32.xlu0 %v2301_v44, %s1774_s13  ;;  %v2315_v54 = vadd.f32 %v1332_v56, %v1328_v46  ;;  %v590_v14 = vadd.f32 %v586_v20, %v581_v7 }
  0x67   :  { %v994_v62 = vmul.f32 %v2130_v25, %v1943_v12  ;;  %v967_v27 = vmul.f32 %v3967_v34, %v1917_v53  ;;  %v582_v6 = vadd.f32 %v578_v31, %v573_v60  ;;  %v974_v15 = vadd.f32 %v970_v41, %v966_v50 }
  0x68   :  { %3966 = vst [vmem:[#allocation38_spill] sm:$0xff] %v2315_v54  ;;  %v971_v45 = vmul.f32 %v2140_v18, %v1924_v57  ;;  %v979_v56 = vmul.f32 %v2148_v49, %v1929_v61  ;;  %1418 = vrot.lane.b32.xlu1 %v2315_v54, %s1774_s13  ;;  %v2331_v20 = vadd.f32 %v595_v9, %v590_v14 }
  0x69   :  { %v987_v53 = vmul.f32 %v2150_v38, %v1940_v11  ;;  %v995_v46 = vmul.f32 %v2152_v33, %v1943_v12  ;;  %v1302_v41 = vmul.f32 %v3963_v39, %v2175_v21  ;;  %v591_v57 = vadd.f32 %v587_v43, %v582_v6 }
  0x6a   :  { %3968 = vst [vmem:[#allocation39_spill] sm:$0xff] %v2331_v20  ;;  %v982_v61 = vadd.f32 %v978_v26, %v974_v15  ;;  %v975_v31 = vadd.f32 %v971_v45, %v967_v27  ;;  %v1306_v9 = vmul.f32 %v3964_v8, %v2182_v37  ;;  %687 = vrot.lane.b32.xlu0 %v2331_v20, %s1774_s13  ;;  %v3979_v20 = vld [vmem:[#allocation33_spill] sm:$0xff] }
  0x6b   :  { %v1314_v11 = vmul.f32 %v3965_v5, %v2185_v13  ;;  %v1322_v12 = vmul.f32 %v2128_v47, %v2188_v48  ;;  %v1330_v7 = vmul.f32 %v2130_v25, %v2201_v63  ;;  %v1303_v43 = vmul.f32 %v3967_v34, %v2175_v21 }
  0x6c   :  { %v2355_v26 = vadd.f32 %v596_v23, %v591_v57  ;;  %v990_v50 = vadd.f32 %v986_v19, %v982_v61  ;;  %v983_v60 = vadd.f32 %v979_v56, %v975_v31  ;;  %v1310_v14 = vadd.f32 %v1306_v9, %v1302_v41 }
  0x6d   :  { %v1307_v27 = vmul.f32 %v2140_v18, %v2182_v37  ;;  %v1315_v6 = vmul.f32 %v2148_v49, %v2185_v13  ;;  %v1323_v15 = vmul.f32 %v2150_v38, %v2188_v48  ;;  %v1331_v45 = vmul.f32 %v2152_v33, %v2201_v63 }
  0x6e   :  { %3969 = vst [vmem:[#allocation40_spill] sm:$0xff] %v2355_v26  ;;  %690 = vrot.lane.b32.xlu1 %v2355_v26, %s1774_s13  ;;  %v2367_v23 = vadd.f32 %v994_v62, %v990_v50  ;;  %v991_v21 = vadd.f32 %v987_v53, %v983_v60  ;;  %v1318_v19 = vadd.f32 %v1314_v11, %v1310_v14  ;;  %v2370_v56 = vstv %s2311_s23  ;;  %v3978_v26 = vld [vmem:[#allocation28_spill] sm:$0xff] }
  0x6f   :  { %v1311_v37 = vadd.f32 %v1307_v27, %v1303_v43  ;;  %v644_v13 = vmul.f32 %v2370_v56, %v1816_v0  ;;  %v2375_v41 = vstv %s2321_s24  ;;  %v2378_v48 = vstv %s2323_s26 }
  0x70   :  { %3970 = vst [vmem:[#allocation41_spill] sm:$0xff] %v2367_v23  ;;  %1048 = vrot.lane.b32.xlu0 %v2367_v23, %s1774_s13  ;;  %v2382_v63 = vadd.f32 %v995_v46, %v991_v21  ;;  %v1326_v57 = vadd.f32 %v1322_v12, %v1318_v19  ;;  %v649_v62 = vmul.f32 %v2375_v41, %v1818_v1  ;;  %v2389_v31 = vstv %s2339_s27  ;;  %v3973_v21 = vld [vmem:[#allocation19_spill] sm:$0xff] }
  0x71   :  { %v658_v53 = vmul.f32 %v2378_v48, %v1820_v2  ;;  %v1319_v61 = vadd.f32 %v1315_v6, %v1311_v37  ;;  %v2392_v9 = vstv %s2341_s28  ;;  %v647_v11 = vmul.f32 %v2370_v56, %v1878_v29  ;;  %v3974_v37 = vld [vmem:[#allocation25_spill] sm:$0xff] }
  0x72   :  { %3971 = vst [vmem:[#allocation53_spill] sm:$0xff] %v2382_v63  ;;  %1051 = vrot.lane.b32.xlu1 %v2382_v63, %s1774_s13  ;;  %v2398_v46 = vadd.f32 %v1330_v7, %v1326_v57  ;;  %v653_v12 = vadd.f32 %v649_v62, %v644_v13  ;;  %v667_v43 = vmul.f32 %v2389_v31, %v1822_v3  ;;  %v3977_v63 = vld [vmem:[#allocation27_spill] sm:$0xff] }
  0x73   :  { %v676_v50 = vmul.f32 %v2392_v9, %v1824_v4  ;;  %v1327_v60 = vadd.f32 %v1323_v15, %v1319_v61  ;;  %v652_v14 = vmul.f32 %v2375_v41, %v1880_v30  ;;  %v661_v27 = vmul.f32 %v2378_v48, %v1894_v35  ;;  %v3975_v15 = vld [vmem:[#allocation26_spill] sm:$0xff] }
  0x74   :  { %3972 = vst [vmem:[#allocation54_spill] sm:$0xff] %v2398_v46  ;;  %v670_v6 = vmul.f32 %v2389_v31, %v1896_v36  ;;  %1412 = vrot.lane.b32.xlu0 %v2398_v46, %s1774_s13  ;;  %v662_v7 = vadd.f32 %v658_v53, %v653_v12  ;;  %v679_v19 = vmul.f32 %v2392_v9, %v3973_v21  ;;  %v3980_v12 = vld [vmem:[#allocation30_spill] sm:$0xff] }
  0x75   :  { %v1097_v13 = vmul.f32 %v2056_v28, %v3974_v37  ;;  %v1101_v57 = vmul.f32 %v2064_v40, %v3975_v15  ;;  %v2418_v62 = vadd.f32 %v1331_v45, %v1327_v60  ;;  %v656_v61 = vadd.f32 %v652_v14, %v647_v11 }
  0x76   :  { %v1109_v23 = vmul.f32 %v2066_v42, %v3977_v63  ;;  %v1117_v54 = vmul.f32 %v3979_v20, %v3978_v26  ;;  %v671_v46 = vadd.f32 %v667_v43, %v662_v7  ;;  %v1125_v44 = vmul.f32 %v2076_v52, %v3980_v12 }
  0x77   :  { %3976 = vst [vmem:[#allocation25_spill] sm:$0xff] %v2418_v62  ;;  %v1105_v53 = vadd.f32 %v1101_v57, %v1097_v13  ;;  %v1098_v10 = vmul.f32 %v3963_v39, %v3974_v37  ;;  %1415 = vrot.lane.b32.xlu1 %v2418_v62, %s1774_s13  ;;  %v665_v45 = vadd.f32 %v661_v27, %v656_v61 }
  0x78   :  { %v1102_v11 = vmul.f32 %v3964_v8, %v3975_v15  ;;  %v1110_v60 = vmul.f32 %v3965_v5, %v3977_v63  ;;  %v1118_v43 = vmul.f32 %v2128_v47, %v3978_v26  ;;  %v2436_v14 = vadd.f32 %v676_v50, %v671_v46 }
  0x79   :  { %v1113_v7 = vadd.f32 %v1109_v23, %v1105_v53  ;;  %v1126_v13 = vmul.f32 %v2130_v25, %v3980_v12  ;;  %v1099_v57 = vmul.f32 %v3967_v34, %v3974_v37  ;;  %v674_v62 = vadd.f32 %v670_v6, %v665_v45 }
  0x7a   :  { %3981 = vst [vmem:[#allocation26_spill] sm:$0xff] %v2436_v14  ;;  %v1106_v27 = vadd.f32 %v1102_v11, %v1098_v10  ;;  %v1103_v61 = vmul.f32 %v2140_v18, %v3975_v15  ;;  %v1111_v21 = vmul.f32 %v2148_v49, %v3977_v63  ;;  %728 = vrot.lane.b32.xlu0 %v2436_v14, %s1774_s13 }
  0x7b   :  { %v1121_v46 = vadd.f32 %v1117_v54, %v1113_v7  ;;  %v1119_v23 = vmul.f32 %v2150_v38, %v3978_v26  ;;  %v1127_v50 = vmul.f32 %v2152_v33, %v3980_v12  ;;  %v1100_v6 = vmul.f32 %v2078_v58, %v3974_v37 }
  0x7c   :  { %v2454_v10 = vadd.f32 %v679_v19, %v674_v62  ;;  %v1114_v53 = vadd.f32 %v1110_v60, %v1106_v27  ;;  %v1107_v45 = vadd.f32 %v1103_v61, %v1099_v57  ;;  %v1104_v11 = vmul.f32 %v2084_v59, %v3975_v15 }
  0x7d   :  { %v2458_v36 = vadd.f32 %v1125_v44, %v1121_v46  ;;  %v1112_v54 = vmul.f32 %v2086_v51, %v3977_v63  ;;  %v1120_v7 = vmul.f32 %v2088_v32, %v3978_v26  ;;  %v1128_v14 = vmul.f32 %v2100_v55, %v3980_v12 }
  0x7e   :  { %3982 = vst [vmem:[#allocation27_spill] sm:$0xff] %v2454_v10  ;;  %737 = vrot.lane.b32.xlu1 %v2454_v10, %s1774_s13  ;;  %v1122_v19 = vadd.f32 %v1118_v43, %v1114_v53  ;;  %v1115_v37 = vadd.f32 %v1111_v21, %v1107_v45  ;;  %v1108_v62 = vadd.f32 %v1104_v11, %v1100_v6 }
  0x7f   :  { %3983 = vst [vmem:[#allocation28_spill] sm:$0xff] %v2458_v36  ;;  %v1373_v15 = vmul.f32 %v2056_v28, %v2370_v56  ;;  %1205 = vrot.lane.b32.xlu0 %v2458_v36, %s1774_s13  ;;  %v1377_v44 = vmul.f32 %v2064_v40, %v2375_v41  ;;  %v1385_v26 = vmul.f32 %v2066_v42, %v2378_v48  ;;  %v3992_v36 = vld [vmem:[#allocation16_spill] sm:$0xff] }
  0x80   :  { %v1393_v63 = vmul.f32 %v3979_v20, %v2389_v31  ;;  %v1401_v12 = vmul.f32 %v2076_v52, %v2392_v9  ;;  %v2480_v21 = vadd.f32 %v1126_v13, %v1122_v19  ;;  %v1123_v60 = vadd.f32 %v1119_v23, %v1115_v37 }
  0x81   :  { %v1116_v43 = vadd.f32 %v1112_v54, %v1108_v62  ;;  %v1376_v57 = vmul.f32 %v2078_v58, %v2370_v56  ;;  %v1381_v27 = vadd.f32 %v1377_v44, %v1373_v15  ;;  %v1380_v61 = vmul.f32 %v2084_v59, %v2375_v41  ;;  %v3988_v44 = vld [vmem:[#allocation12_spill] sm:$0xff] }
  0x82   :  { %3984 = vst [vmem:[#allocation33_spill] sm:$0xff] %v2480_v21  ;;  %v1388_v46 = vmul.f32 %v2086_v51, %v2378_v48  ;;  %v1396_v6 = vmul.f32 %v2088_v32, %v2389_v31  ;;  %1208 = vrot.lane.b32.xlu1 %v2480_v21, %s1774_s13  ;;  %v2492_v13 = vadd.f32 %v1127_v50, %v1123_v60 }
  0x83   :  { %v1124_v23 = vadd.f32 %v1120_v7, %v1116_v43  ;;  %v1404_v53 = vmul.f32 %v2100_v55, %v2392_v9  ;;  %v645_v45 = vmul.f32 %v2370_v56, %v1850_v16  ;;  %v1389_v11 = vadd.f32 %v1385_v26, %v1381_v27  ;;  %v3987_v7 = vld [vmem:[#allocation17_spill] sm:$0xff] }
  0x84   :  { %3985 = vst [vmem:[#allocation30_spill] sm:$0xff] %v2492_v13  ;;  %v1384_v54 = vadd.f32 %v1380_v61, %v1376_v57  ;;  %v650_v19 = vmul.f32 %v2375_v41, %v1852_v17  ;;  %v659_v37 = vmul.f32 %v2378_v48, %v1864_v22  ;;  %1211 = vrot.lane.b32.xlu0 %v2492_v13, %s1774_s13  ;;  %v3989_v27 = vld [vmem:[#allocation13_spill] sm:$0xff]  ;;  %v3991_v13 = vld [vmem:[#allocation15_spill] sm:$0xff] }
  0x85   :  { %v2506_v50 = vadd.f32 %v1128_v14, %v1124_v23  ;;  %v668_v62 = vmul.f32 %v2389_v31, %v3987_v7  ;;  %v677_v15 = vmul.f32 %v2392_v9, %v1868_v24  ;;  %v646_v26 = vmul.f32 %v2370_v56, %v3988_v44  ;;  %v3990_v14 = vld [vmem:[#allocation14_spill] sm:$0xff] }
  0x86   :  { %v1397_v60 = vadd.f32 %v1393_v63, %v1389_v11  ;;  %v1392_v43 = vadd.f32 %v1388_v46, %v1384_v54  ;;  %v654_v57 = vadd.f32 %v650_v19, %v645_v45  ;;  %v651_v61 = vmul.f32 %v2375_v41, %v3989_v27 }
  0x87   :  { %3986 = vst [vmem:[#allocation55_spill] sm:$0xff] %v2506_v50  ;;  %1214 = vrot.lane.b32.xlu1 %v2506_v50, %s1774_s13  ;;  %v660_v23 = vmul.f32 %v2378_v48, %v3990_v14  ;;  %v669_v21 = vmul.f32 %v2389_v31, %v3991_v13  ;;  %v678_v63 = vmul.f32 %v2392_v9, %v3992_v36 }
  0x88   :  { %v1374_v46 = vmul.f32 %v3963_v39, %v2370_v56  ;;  %v2532_v45 = vadd.f32 %v1401_v12, %v1397_v60  ;;  %v1400_v11 = vadd.f32 %v1396_v6, %v1392_v43  ;;  %v663_v54 = vadd.f32 %v659_v37, %v654_v57 }
  0x89   :  { %v655_v19 = vadd.f32 %v651_v61, %v646_v26  ;;  %v1378_v50 = vmul.f32 %v3964_v8, %v2375_v41  ;;  %v1386_v10 = vmul.f32 %v3965_v5, %v2378_v48  ;;  %v1394_v55 = vmul.f32 %v2128_v47, %v2389_v31 }
  0x8a   :  { %v1402_v32 = vmul.f32 %v2130_v25, %v2392_v9  ;;  %1453 = vrot.lane.b32.xlu0 %v2532_v45, %s1774_s13  ;;  %v2546_v12 = vadd.f32 %v1404_v53, %v1400_v11  ;;  %v672_v6 = vadd.f32 %v668_v62, %v663_v54  ;;  %v1375_v26 = vmul.f32 %v3967_v34, %v2370_v56 }
  0x8b   :  { %v664_v37 = vadd.f32 %v660_v23, %v655_v19  ;;  %v1382_v60 = vadd.f32 %v1378_v50, %v1374_v46  ;;  %v1379_v43 = vmul.f32 %v2140_v18, %v2375_v41  ;;  %v1387_v57 = vmul.f32 %v2148_v49, %v2378_v48 }
  0x8c   :  { %v1395_v61 = vmul.f32 %v2150_v38, %v2389_v31  ;;  %1462 = vrot.lane.b32.xlu1 %v2546_v12, %s1774_s13  ;;  %v2558_v53 = vadd.f32 %v677_v15, %v672_v6  ;;  %v1403_v56 = vmul.f32 %v2152_v33, %v2392_v9  ;;  %v2563_v50 = vstv %s2502_s29 }
  0x8d   :  { %v673_v62 = vadd.f32 %v669_v21, %v664_v37  ;;  %v1390_v41 = vadd.f32 %v1386_v10, %v1382_v60  ;;  %v1383_v23 = vadd.f32 %v1379_v43, %v1375_v26  ;;  %v425_v48 = vmul.f32 %v2563_v50, %v1816_v0 }
  0x8e   :  { %v2568_v46 = vstv %s2514_s30  ;;  %731 = vrot.lane.b32.xlu0 %v2558_v53, %s1774_s13  ;;  %v2577_v15 = vstv %s2518_s4  ;;  %v2580_v9 = vstv %s2520_s5 }
  0x8f   :  { %v2572_v31 = vadd.f32 %v678_v63, %v673_v62  ;;  %v430_v21 = vmul.f32 %v2568_v46, %v1818_v1  ;;  %v1398_v11 = vadd.f32 %v1394_v55, %v1390_v41  ;;  %v1391_v10 = vadd.f32 %v1387_v57, %v1383_v23 }
  0x90   :  { %v439_v54 = vmul.f32 %v2577_v15, %v1820_v2  ;;  %v448_v0 = vmul.f32 %v2580_v9, %v1822_v3  ;;  %v2589_v19 = vstv %s2534_s6  ;;  %v426_v1 = vmul.f32 %v2563_v50, %v1850_v16 }
  0x91   :  { %734 = vrot.lane.b32.xlu1 %v2572_v31, %s1774_s13  ;;  %v434_v63 = vadd.f32 %v430_v21, %v425_v48  ;;  %v431_v6 = vmul.f32 %v2568_v46, %v1852_v17  ;;  %v2595_v55 = vadd.f32 %v1402_v32, %v1398_v11  ;;  %v1399_v37 = vadd.f32 %v1395_v61, %v1391_v10  ;;  %v3994_v11 = vld [vmem:[#allocation19_spill] sm:$0xff] }
  0x92   :  { %v440_v2 = vmul.f32 %v2577_v15, %v1864_v22  ;;  %v457_v3 = vmul.f32 %v2589_v19, %v1824_v4  ;;  %v449_v43 = vmul.f32 %v2580_v9, %v3987_v7  ;;  %v427_v17 = vmul.f32 %v2563_v50, %v3988_v44 }
  0x93   :  { %v443_v26 = vadd.f32 %v439_v54, %v434_v63  ;;  %v435_v60 = vadd.f32 %v431_v6, %v426_v1  ;;  %1456 = vrot.lane.b32.xlu0 %v2595_v55, %s1774_s13  ;;  %v2605_v16 = vadd.f32 %v1403_v56, %v1399_v37  ;;  %v432_v32 = vmul.f32 %v2568_v46, %v3989_v27 }
  0x94   :  { %v441_v22 = vmul.f32 %v2577_v15, %v3990_v14  ;;  %v458_v61 = vmul.f32 %v2589_v19, %v1868_v24  ;;  %v450_v7 = vmul.f32 %v2580_v9, %v3991_v13  ;;  %v428_v44 = vmul.f32 %v2563_v50, %v1878_v29  ;;  %v3993_v13 = vld [vmem:[#allocation18_spill] sm:$0xff] }
  0x95   :  { %v452_v57 = vadd.f32 %v448_v0, %v443_v26  ;;  %v444_v4 = vadd.f32 %v440_v2, %v435_v60  ;;  %1459 = vrot.lane.b32.xlu1 %v2605_v16, %s1774_s13  ;;  %v436_v62 = vadd.f32 %v432_v32, %v427_v17  ;;  %v433_v27 = vmul.f32 %v2568_v46, %v1880_v30 }
  0x96   :  { %v442_v14 = vmul.f32 %v2577_v15, %v1894_v35  ;;  %v459_v24 = vmul.f32 %v2589_v19, %v3992_v36  ;;  %v451_v23 = vmul.f32 %v2580_v9, %v3993_v13  ;;  %v1169_v29 = vmul.f32 %v2056_v28, %v2563_v50  ;;  %v3999_v13 = vld [vmem:[#allocation22_spill] sm:$0xff] }
  0x97   :  { %v2625_v56 = vadd.f32 %v457_v3, %v452_v57  ;;  %v453_v41 = vadd.f32 %v449_v43, %v444_v4  ;;  %v445_v48 = vadd.f32 %v441_v22, %v436_v62  ;;  %v437_v21 = vadd.f32 %v433_v27, %v428_v44  ;;  %v3997_v44 = vld [vmem:[#allocation20_spill] sm:$0xff] }
  0x98   :  { %v1173_v30 = vmul.f32 %v2064_v40, %v2568_v46  ;;  %v460_v10 = vmul.f32 %v2589_v19, %v3994_v11  ;;  %v1181_v36 = vmul.f32 %v2066_v42, %v2577_v15  ;;  %v1189_v54 = vmul.f32 %v3979_v20, %v2580_v9  ;;  %v4001_v11 = vld [vmem:[#allocation24_spill] sm:$0xff] }
  0x99   :  { %509 = vrot.lane.b32.xlu0 %v2625_v56, %s1774_s13  ;;  %v2637_v35 = vadd.f32 %v458_v61, %v453_v41  ;;  %v454_v0 = vadd.f32 %v450_v7, %v445_v48  ;;  %v446_v63 = vadd.f32 %v442_v14, %v437_v21  ;;  %v1170_v40 = vmul.f32 %v3963_v39, %v2563_v50  ;;  %v3998_v14 = vld [vmem:[#allocation21_spill] sm:$0xff]  ;;  %v4000_v21 = vld [vmem:[#allocation23_spill] sm:$0xff] }
  0x9a   :  { %v1177_v28 = vadd.f32 %v1173_v30, %v1169_v29  ;;  %v1197_v1 = vmul.f32 %v2076_v52, %v2589_v19  ;;  %v1174_v6 = vmul.f32 %v3964_v8, %v2568_v46  ;;  %v1182_v42 = vmul.f32 %v3965_v5, %v2577_v15 }
  0x9b   :  { %512 = vrot.lane.b32.xlu1 %v2637_v35, %s1774_s13  ;;  %v1190_v20 = vmul.f32 %v2128_v47, %v2580_v9  ;;  %v2657_v37 = vadd.f32 %v459_v24, %v454_v0  ;;  %v455_v2 = vadd.f32 %v451_v23, %v446_v63  ;;  %v1171_v39 = vmul.f32 %v3967_v34, %v2563_v50 }
  0x9c   :  { %v1185_v26 = vadd.f32 %v1181_v36, %v1177_v28  ;;  %v1178_v3 = vadd.f32 %v1174_v6, %v1170_v40  ;;  %v1198_v52 = vmul.f32 %v2130_v25, %v2589_v19  ;;  %v1175_v8 = vmul.f32 %v2140_v18, %v2568_v46  ;;  %v4003_v28 = vld [vmem:[#allocation31_spill] sm:$0xff]  ;;  %v4004_v6 = vld [vmem:[#allocation32_spill] sm:$0xff] }
  0x9d   :  { %v1183_v5 = vmul.f32 %v2148_v49, %v2577_v15  ;;  %515 = vrot.lane.b32.xlu0 %v2657_v37, %s1774_s13  ;;  %v2669_v47 = vadd.f32 %v460_v10, %v455_v2  ;;  %v1191_v43 = vmul.f32 %v2150_v38, %v2580_v9  ;;  %v1172_v34 = vmul.f32 %v2078_v58, %v2563_v50  ;;  %v3995_v58 = vld [vmem:[#allocation35_spill] sm:$0xff]  ;;  %v4005_v2 = vld [vmem:[#allocation34_spill] sm:$0xff] }
  0x9e   :  { %v1193_v60 = vadd.f32 %v1189_v54, %v1185_v26  ;;  %v1186_v17 = vadd.f32 %v1182_v42, %v1178_v3  ;;  %v1179_v25 = vadd.f32 %v1175_v8, %v1171_v39  ;;  %v1176_v18 = vmul.f32 %v2084_v59, %v2568_v46  ;;  %v4002_v54 = vld [vmem:[#allocation29_spill] sm:$0xff]  ;;  %v4006_v3 = vld [vmem:[#allocation36_spill] sm:$0xff] }
  0x9f   :  { %v1184_v49 = vmul.f32 %v2086_v51, %v2577_v15  ;;  %518 = vrot.lane.b32.xlu1 %v2669_v47, %s1774_s13  ;;  %v1199_v22 = vmul.f32 %v2152_v33, %v2589_v19  ;;  %v1192_v50 = vmul.f32 %v3995_v58, %v2580_v9  ;;  %v3996_v15 = vld [vmem:[#allocation37_spill] sm:$0xff]  ;;  %v4011_v58 = vld [vmem:[#allocation46_spill] sm:$0xff] }
  0xa0   :  { %v2681_v32 = vadd.f32 %v1197_v1, %v1193_v60  ;;  %v1194_v38 = vadd.f32 %v1190_v20, %v1186_v17  ;;  %v1187_v57 = vadd.f32 %v1183_v5, %v1179_v25  ;;  %v1180_v4 = vadd.f32 %v1176_v18, %v1172_v34  ;;  %v4007_v5 = vld [vmem:[#allocation42_spill] sm:$0xff]  ;;  %v4008_v34 = vld [vmem:[#allocation43_spill] sm:$0xff]  ;;  %v4009_v18 = vld [vmem:[#allocation44_spill] sm:$0xff] }
  0xa1   :  { %v1200_v61 = vmul.f32 %v3996_v15, %v2589_v19 }
  0xa2   :  { %1249 = vrot.lane.b32.xlu0 %v2681_v32, %s1774_s13  ;;  %v2689_v59 = vadd.f32 %v1198_v52, %v1194_v38  ;;  %v1195_v51 = vadd.f32 %v1191_v43, %v1187_v57  ;;  %v1188_v46 = vadd.f32 %v1184_v49, %v1180_v4  ;;  %v4010_v38 = vld [vmem:[#allocation45_spill] sm:$0xff] }
  0xa4   :  { %1252 = vrot.lane.b32.xlu1 %v2689_v59, %s1774_s13  ;;  %v2695_v33 = vadd.f32 %v1199_v22, %v1195_v51  ;;  %v1196_v7 = vadd.f32 %v1192_v50, %v1188_v46  ;;  %v4012_v46 = vld [vmem:[#allocation47_spill] sm:$0xff] }
  0xa5   :  { %v246_v62 = vpop.permute.xlu0 %245 }
  0xa6   :  { %1255 = vrot.lane.b32.xlu0 %v2695_v33, %s1774_s13  ;;  %v2699_v9 = vadd.f32 %v1200_v61, %v1196_v7  ;;  %v247_v27 = vsel %vm244_vm0, %v246_v62, %v3997_v44  ;;  %v4013_v7 = vld [vmem:[#allocation48_spill] sm:$0xff] }
  0xa7   :  { %v252_v19 = vpop.permute.xlu1 %251 }
  0xa8   :  { %1258 = vrot.lane.b32.xlu1 %v2699_v9, %s1774_s13  ;;  %v253_v41 = vsel %vm244_vm0, %v252_v19, %v3998_v14 }
  0xa9   :  { %v249_v24 = vpop.permute.xlu0 %248 }
  0xaa   :  { %257 = vrot.lane.b32.xlu0 %v247_v27, %s1774_s13  ;;  %v250_v23 = vsel %vm244_vm0, %v249_v24, %v3999_v13 }
  0xab   :  { %v255_v48 = vpop.permute.xlu1 %254 }
  0xac   :  { %259 = vrot.lane.b32.xlu1 %v250_v23, %s1774_s13  ;;  %v256_v29 = vsel %vm244_vm0, %v255_v48, %v4000_v21  ;;  %v4015_v23 = vld [vmem:[#allocation50_spill] sm:$0xff] }
  0xae   :  { %261 = vrot.lane.b32.xlu0 %v253_v41, %s1774_s13  ;;  %v291_v30 = vpop.permute.xlu0 %290  ;;  %v4014_v41 = vld [vmem:[#allocation49_spill] sm:$0xff] }
  0xaf   :  { %v292_v10 = vsel %vm244_vm0, %v291_v30, %v4001_v11  ;;  %v4016_v30 = vld [vmem:[#allocation51_spill] sm:$0xff] }
  0xb0   :  { %263 = vrot.lane.b32.xlu1 %v256_v29, %s1774_s13 }
  0xb1   :  { %v294_v36 = vpop.permute.xlu1 %293 }
  0xb2   :  { %302 = vrot.lane.b32.xlu0 %v292_v10, %s1774_s13  ;;  %v295_v0 = vsel %vm244_vm0, %v294_v36, %v4002_v54 }
  0xb3   :  { %v297_v63 = vpop.permute.xlu0 %296 }
  0xb4   :  { %304 = vrot.lane.b32.xlu1 %v295_v0, %s1774_s13  ;;  %v298_v40 = vsel %vm244_vm0, %v297_v63, %v4003_v28  ;;  %v4017_v0 = vld [vmem:[#allocation52_spill] sm:$0xff] }
  0xb5   :  { %v300_v1 = vpop.permute.xlu1 %299 }
  0xb6   :  { %306 = vrot.lane.b32.xlu0 %v298_v40, %s1774_s13  ;;  %v301_v42 = vsel %vm244_vm0, %v300_v1, %v4004_v6  ;;  %v4018_v1 = vld [vmem:[#allocation38_spill] sm:$0xff] }
  0xb8   :  { %308 = vrot.lane.b32.xlu1 %v301_v42, %s1774_s13 }
  0xba   :  { %v466_v20 = vpop.permute.xlu0 %465 }
  0xbb   :  { %v467_v26 = vsel %vm244_vm0, %v466_v20, %v4005_v2  ;;  %v469_v39 = vpop.permute.xlu1 %468 }
  0xbc   :  { %477 = vrot.lane.b32.xlu0 %v467_v26, %s1774_s13  ;;  %v470_v52 = vsel %vm244_vm0, %v469_v39, %v4006_v3  ;;  %v4019_v26 = vld [vmem:[#allocation39_spill] sm:$0xff] }
  0xbd   :  { %479 = vrot.lane.b32.xlu1 %v470_v52, %s1774_s13 }
  0xbe   :  { %v472_v8 = vpop.permute.xlu0 %471 }
  0xbf   :  { %v473_v60 = vsel %vm244_vm0, %v472_v8, %v4007_v5  ;;  %v4020_v8 = vld [vmem:[#allocation40_spill] sm:$0xff] }
  0xc0   :  { %481 = vrot.lane.b32.xlu0 %v473_v60, %s1774_s13  ;;  %v475_v43 = vpop.permute.xlu1 %474 }
  0xc1   :  { %v476_v17 = vsel %vm244_vm0, %v475_v43, %v4008_v34 }
  0xc2   :  { %483 = vrot.lane.b32.xlu1 %v476_v17, %s1774_s13  ;;  %v4021_v17 = vld [vmem:[#allocation41_spill] sm:$0xff] }
  0xc3   :  { %v1002_v25 = vpop.permute.xlu0 %1001 }
  0xc4   :  { %v1003_v49 = vsel %vm244_vm0, %v1002_v25, %v4009_v18 }
  0xc5   :  { %1013 = vrot.lane.b32.xlu0 %v1003_v49, %s1774_s13 }
  0xc6   :  { %v1011_v22 = vpop.permute.xlu1 %1010 }
  0xc7   :  { %v1012_v57 = vsel %vm244_vm0, %v1011_v22, %v4010_v38  ;;  %v4022_v22 = vld [vmem:[#allocation53_spill] sm:$0xff] }
  0xc8   :  { %v1005_v4 = vpop.permute.xlu0 %1004  ;;  %1019 = vrot.lane.b32.xlu1 %v1012_v57, %s1774_s13 }
  0xc9   :  { %v1006_v50 = vsel %vm244_vm0, %v1005_v4, %v4011_v58 }
  0xca   :  { %1015 = vrot.lane.b32.xlu0 %v1006_v50, %s1774_s13  ;;  %v1008_v51 = vpop.permute.xlu1 %1007  ;;  %v4023_v50 = vld [vmem:[#allocation54_spill] sm:$0xff] }
  0xcb   :  { %v1009_v15 = vsel %vm244_vm0, %v1008_v51, %v4012_v46 }
  0xcc   :  { %1017 = vrot.lane.b32.xlu1 %v1009_v15, %s1774_s13 }
  0xce   :  { %v685_v61 = vpop.permute.xlu0 %684 }
  0xcf   :  { %v686_v62 = vsel %vm244_vm0, %v685_v61, %v4013_v7  ;;  %v4024_v61 = vld [vmem:[#allocation25_spill] sm:$0xff] }
  0xd0   :  { %696 = vrot.lane.b32.xlu0 %v686_v62, %s1774_s13 }
  0xd1   :  { %v694_v27 = vpop.permute.xlu1 %693 }
  0xd2   :  { %v695_v24 = vsel %vm244_vm0, %v694_v27, %v4014_v41 }
  0xd3   :  { %v1046_v19 = vpop.permute.xlu0 %1045  ;;  %702 = vrot.lane.b32.xlu1 %v695_v24, %s1774_s13 }
  0xd4   :  { %v1047_v48 = vsel %vm244_vm0, %v1046_v19, %v4015_v23  ;;  %v4025_v19 = vld [vmem:[#allocation26_spill] sm:$0xff] }
  0xd5   :  { %1057 = vrot.lane.b32.xlu0 %v1047_v48, %s1774_s13 }
  0xd6   :  { %v1055_v29 = vpop.permute.xlu1 %1054 }
  0xd7   :  { %v1056_v10 = vsel %vm244_vm0, %v1055_v29, %v4016_v30 }
  0xd8   :  { %v1410_v36 = vpop.permute.xlu0 %1409  ;;  %1063 = vrot.lane.b32.xlu1 %v1056_v10, %s1774_s13  ;;  %v4026_v10 = vld [vmem:[#allocation27_spill] sm:$0xff] }
  0xd9   :  { %v1411_v63 = vsel %vm244_vm0, %v1410_v36, %v4017_v0 }
  0xda   :  { %1421 = vrot.lane.b32.xlu0 %v1411_v63, %s1774_s13  ;;  %v1419_v40 = vpop.permute.xlu1 %1418  ;;  %v4027_v63 = vld [vmem:[#allocation28_spill] sm:$0xff] }
  0xdb   :  { %v1420_v42 = vsel %vm244_vm0, %v1419_v40, %v4018_v1 }
  0xdc   :  { %v688_v20 = vpop.permute.xlu0 %687  ;;  %1427 = vrot.lane.b32.xlu1 %v1420_v42, %s1774_s13 }
  0xdd   :  { %v689_v39 = vsel %vm244_vm0, %v688_v20, %v4019_v26  ;;  %v4028_v20 = vld [vmem:[#allocation33_spill] sm:$0xff] }
  0xde   :  { %698 = vrot.lane.b32.xlu0 %v689_v39, %s1774_s13 }
  0xe0   :  { %v691_v52 = vpop.permute.xlu1 %690 }
  0xe1   :  { %v692_v60 = vsel %vm244_vm0, %v691_v52, %v4020_v8 }
  0xe2   :  { %v1049_v43 = vpop.permute.xlu0 %1048  ;;  %700 = vrot.lane.b32.xlu1 %v692_v60, %s1774_s13  ;;  %v4029_v60 = vld [vmem:[#allocation30_spill] sm:$0xff] }
  0xe3   :  { %v1050_v25 = vsel %vm244_vm0, %v1049_v43, %v4021_v17 }
  0xe4   :  { %1059 = vrot.lane.b32.xlu0 %v1050_v25, %s1774_s13  ;;  %v1052_v49 = vpop.permute.xlu1 %1051 }
  0xe5   :  { %v1053_v57 = vsel %vm244_vm0, %v1052_v49, %v4022_v22  ;;  %v4030_v49 = vld [vmem:[#allocation55_spill] sm:$0xff] }
  0xe6   :  { %v1413_v4 = vpop.permute.xlu0 %1412  ;;  %1061 = vrot.lane.b32.xlu1 %v1053_v57, %s1774_s13 }
  0xe7   :  { %v1414_v51 = vsel %vm244_vm0, %v1413_v4, %v4023_v50 }
  0xe8   :  { %1423 = vrot.lane.b32.xlu0 %v1414_v51, %s1774_s13 }
  0xe9   :  { %v1416_v15 = vpop.permute.xlu1 %1415 }
  0xea   :  { %v1417_v62 = vsel %vm244_vm0, %v1416_v15, %v4024_v61 }
  0xeb   :  { %1425 = vrot.lane.b32.xlu1 %v1417_v62, %s1774_s13 }
  0xec   :  { %v729_v27 = vpop.permute.xlu0 %728 }
  0xed   :  { %v730_v24 = vsel %vm244_vm0, %v729_v27, %v4025_v19 }
  0xee   :  { %740 = vrot.lane.b32.xlu0 %v730_v24, %s1774_s13 }
  0xf0   :  { %v738_v48 = vpop.permute.xlu1 %737 }
  0xf1   :  { %v1206_v29 = vpop.permute.xlu0 %1205  ;;  %v739_v36 = vsel %vm244_vm0, %v738_v48, %v4026_v10 }
  0xf2   :  { %746 = vrot.lane.b32.xlu1 %v739_v36, %s1774_s13  ;;  %v1207_v40 = vsel %vm244_vm0, %v1206_v29, %v4027_v63 }
  0xf3   :  { %1217 = vrot.lane.b32.xlu0 %v1207_v40, %s1774_s13 }
  0xf4   :  { %v1209_v42 = vpop.permute.xlu1 %1208 }
  0xf5   :  { %v1210_v39 = vsel %vm244_vm0, %v1209_v42, %v4028_v20 }
  0xf6   :  { %v1212_v52 = vpop.permute.xlu0 %1211  ;;  %1219 = vrot.lane.b32.xlu1 %v1210_v39, %s1774_s13 }
  0xf7   :  { %v1213_v43 = vsel %vm244_vm0, %v1212_v52, %v4029_v60 }
  0xf8   :  { %1221 = vrot.lane.b32.xlu0 %v1213_v43, %s1774_s13 }
  0xf9   :  { %v1215_v25 = vpop.permute.xlu1 %1214 }
  0xfa   :  { %v1216_v57 = vsel %vm244_vm0, %v1215_v25, %v4030_v49 }
  0xfb   :  { %1223 = vrot.lane.b32.xlu1 %v1216_v57, %s1774_s13 }
  0xfc   :  { %v1454_v4 = vpop.permute.xlu0 %1453 }
  0xfd   :  { %v1455_v51 = vsel %vm244_vm0, %v1454_v4, %v2532_v45 }
  0xfe   :  { %1465 = vrot.lane.b32.xlu0 %v1455_v51, %s1774_s13  ;;  %v1463_v15 = vpop.permute.xlu1 %1462 }
  0xff   :  { %v1464_v62 = vsel %vm244_vm0, %v1463_v15, %v2546_v12 }
 0x100   :  { %v732_v27 = vpop.permute.xlu0 %731  ;;  %1471 = vrot.lane.b32.xlu1 %v1464_v62, %s1774_s13 }
 0x101   :  { %v733_v24 = vsel %vm244_vm0, %v732_v27, %v2558_v53 }
 0x102   :  { %742 = vrot.lane.b32.xlu0 %v733_v24, %s1774_s13 }
 0x103   :  { %v735_v48 = vpop.permute.xlu1 %734 }
 0x104   :  { %v736_v29 = vsel %vm244_vm0, %v735_v48, %v2572_v31 }
 0x105   :  { %744 = vrot.lane.b32.xlu1 %v736_v29, %s1774_s13  ;;  %v1457_v36 = vpop.permute.xlu0 %1456 }
 0x106   :  { %v1458_v40 = vsel %vm244_vm0, %v1457_v36, %v2595_v55 }
 0x107   :  { %1467 = vrot.lane.b32.xlu0 %v1458_v40, %s1774_s13  ;;  %v1460_v42 = vpop.permute.xlu1 %1459 }
 0x108   :  { %v1461_v39 = vsel %vm244_vm0, %v1460_v42, %v2605_v16 }
 0x109   :  { %1469 = vrot.lane.b32.xlu1 %v1461_v39, %s1774_s13 }
 0x10b   :  { %v510_v52 = vpop.permute.xlu0 %509 }
 0x10c   :  { %v511_v43 = vsel %vm244_vm0, %v510_v52, %v2625_v56 }
 0x10d   :  { %521 = vrot.lane.b32.xlu0 %v511_v43, %s1774_s13  ;;  %v513_v25 = vpop.permute.xlu1 %512 }
 0x10e   :  { %v514_v57 = vsel %vm244_vm0, %v513_v25, %v2637_v35 }
 0x10f   :  { %523 = vrot.lane.b32.xlu1 %v514_v57, %s1774_s13  ;;  %v516_v4 = vpop.permute.xlu0 %515 }
 0x110   :  { %v517_v51 = vsel %vm244_vm0, %v516_v4, %v2657_v37 }
 0x111   :  { %525 = vrot.lane.b32.xlu0 %v517_v51, %s1774_s13  ;;  %v519_v15 = vpop.permute.xlu1 %518 }
 0x112   :  { %v520_v62 = vsel %vm244_vm0, %v519_v15, %v2669_v47 }
 0x113   :  { %527 = vrot.lane.b32.xlu1 %v520_v62, %s1774_s13 }
 0x114   :  { %v1250_v27 = vpop.permute.xlu0 %1249 }
 0x115   :  { %v1251_v24 = vsel %vm244_vm0, %v1250_v27, %v2681_v32 }
 0x116   :  { %1261 = vrot.lane.b32.xlu0 %v1251_v24, %s1774_s13  ;;  %v1253_v48 = vpop.permute.xlu1 %1252 }
 0x117   :  { %v1254_v29 = vsel %vm244_vm0, %v1253_v48, %v2689_v59 }
 0x118   :  { %v1256_v36 = vpop.permute.xlu0 %1255  ;;  %1263 = vrot.lane.b32.xlu1 %v1254_v29, %s1774_s13 }
 0x119   :  { %v1257_v40 = vsel %vm244_vm0, %v1256_v36, %v2695_v33 }
 0x11a   :  { %1265 = vrot.lane.b32.xlu0 %v1257_v40, %s1774_s13  ;;  %v1259_v42 = vpop.permute.xlu1 %1258 }
 0x11b   :  { %v1260_v39 = vsel %vm244_vm0, %v1259_v42, %v2699_v9 }
 0x11c   :  { %1267 = vrot.lane.b32.xlu1 %v1260_v39, %s1774_s13  ;;  %v258_v52 = vpop.permute.xlu0 %257  ;;  %s1603_s13 = sld [smem:[#allocation7 + $0x4]] }
 0x11d   :  { %v265_v43 = vsel %vm244_vm0, %v258_v52, %v3997_v44 }
 0x11e   :  { %273 = vrot.lane.b32.xlu0 %v265_v43, %s1775_s0  ;;  %v260_v25 = vpop.permute.xlu1 %259 }
 0x11f   :  { %v266_v51 = vsel %vm244_vm0, %v260_v25, %v3999_v13 }
 0x120   :  { %v262_v57 = vpop.permute.xlu0 %261  ;;  %275 = vrot.lane.b32.xlu1 %v266_v51, %s1775_s0 }
 0x121   :  { %v267_v4 = vsel %vm244_vm0, %v262_v57, %v3998_v14 }
 0x122   :  { %277 = vrot.lane.b32.xlu0 %v267_v4, %s1775_s0  ;;  %v264_v15 = vpop.permute.xlu1 %263 }
 0x123   :  { %v268_v62 = vsel %vm244_vm0, %v264_v15, %v4000_v21 }
 0x124   :  { %v303_v44 = vpop.permute.xlu0 %302  ;;  %279 = vrot.lane.b32.xlu1 %v268_v62, %s1775_s0 }
 0x125   :  { %v310_v27 = vsel %vm244_vm0, %v303_v44, %v4001_v11 }
 0x126   :  { %318 = vrot.lane.b32.xlu0 %v310_v27, %s1776_s7  ;;  %v305_v14 = vpop.permute.xlu1 %304 }
 0x127   :  { %v311_v13 = vsel %vm244_vm0, %v305_v14, %v4002_v54 }
 0x128   :  { %v307_v24 = vpop.permute.xlu0 %306  ;;  %320 = vrot.lane.b32.xlu1 %v311_v13, %s1776_s7 }
 0x129   :  { %v312_v48 = vsel %vm244_vm0, %v307_v24, %v4003_v28 }
 0x12a   :  { %322 = vrot.lane.b32.xlu0 %v312_v48, %s1776_s7  ;;  %v309_v21 = vpop.permute.xlu1 %308 }
 0x12b   :  { %v313_v11 = vsel %vm244_vm0, %v309_v21, %v4004_v6 }
 0x12c   :  { %324 = vrot.lane.b32.xlu1 %v313_v11, %s1776_s7 }
 0x12e   :  { %v478_v29 = vpop.permute.xlu0 %477 }
 0x12f   :  { %v485_v36 = vsel %vm244_vm0, %v478_v29, %v4005_v2  ;;  %v480_v40 = vpop.permute.xlu1 %479 }
 0x130   :  { %493 = vrot.lane.b32.xlu0 %v485_v36, %s1775_s0  ;;  %v486_v54 = vsel %vm244_vm0, %v480_v40, %v4006_v3 }
 0x131   :  { %495 = vrot.lane.b32.xlu1 %v486_v54, %s1775_s0 }
 0x132   :  { %v482_v28 = vpop.permute.xlu0 %481 }
 0x133   :  { %v487_v42 = vsel %vm244_vm0, %v482_v28, %v4007_v5 }
 0x134   :  { %497 = vrot.lane.b32.xlu0 %v487_v42, %s1775_s0  ;;  %v484_v6 = vpop.permute.xlu1 %483 }
 0x135   :  { %v488_v39 = vsel %vm244_vm0, %v484_v6, %v4008_v34 }
 0x136   :  { %499 = vrot.lane.b32.xlu1 %v488_v39, %s1775_s0 }
 0x137   :  { %v1014_v2 = vpop.permute.xlu0 %1013 }
 0x138   :  { %v1021_v52 = vsel %vm244_vm0, %v1014_v2, %v4009_v18 }
 0x139   :  { %1029 = vrot.lane.b32.xlu0 %v1021_v52, %s1775_s0 }
 0x13a   :  { %v1020_v3 = vpop.permute.xlu1 %1019 }
 0x13b   :  { %v1024_v43 = vsel %vm244_vm0, %v1020_v3, %v4010_v38 }
 0x13c   :  { %v1016_v25 = vpop.permute.xlu0 %1015  ;;  %1035 = vrot.lane.b32.xlu1 %v1024_v43, %s1775_s0 }
 0x13d   :  { %v1022_v5 = vsel %vm244_vm0, %v1016_v25, %v4011_v58 }
 0x13e   :  { %1031 = vrot.lane.b32.xlu0 %v1022_v5, %s1775_s0  ;;  %v1018_v34 = vpop.permute.xlu1 %1017 }
 0x13f   :  { %v1023_v57 = vsel %vm244_vm0, %v1018_v34, %v4012_v46 }
 0x140   :  { %1033 = vrot.lane.b32.xlu1 %v1023_v57, %s1775_s0  ;;  %v2976_v57 = vstv %s1600_s8 }
 0x142   :  { %v697_v18 = vpop.permute.xlu0 %696 }
 0x143   :  { %v704_v4 = vsel %vm244_vm0, %v697_v18, %v4013_v7 }
 0x144   :  { %712 = vrot.lane.b32.xlu0 %v704_v4, %s1775_s0 }
 0x145   :  { %v703_v38 = vpop.permute.xlu1 %702 }
 0x146   :  { %v707_v51 = vsel %vm244_vm0, %v703_v38, %v4014_v41  ;;  %v2985_v38 = vld [vmem:[#allocation3] sm:$0xff] }
 0x147   :  { %v1058_v15 = vpop.permute.xlu0 %1057  ;;  %718 = vrot.lane.b32.xlu1 %v707_v51, %s1775_s0  ;;  %v2989_v51 = vld [vmem:[#allocation3 + $0x20] sm:$0xff] }
 0x148   :  { %v1065_v58 = vsel %vm244_vm0, %v1058_v15, %v4015_v23 }
 0x149   :  { %1073 = vrot.lane.b32.xlu0 %v1065_v58, %s1776_s7 }
 0x14a   :  { %v1064_v46 = vpop.permute.xlu1 %1063 }
 0x14b   :  { %v1068_v62 = vsel %vm244_vm0, %v1064_v46, %v4016_v30  ;;  %v3000_v46 = vld [vmem:[#allocation3 + $0x8] sm:$0xff] }
 0x14c   :  { %v1422_v44 = vpop.permute.xlu0 %1421  ;;  %1079 = vrot.lane.b32.xlu1 %v1068_v62, %s1776_s7  ;;  %v163_v62 = vmul.f32 %v3000_v46, %v2976_v57 }
 0x14d   :  { %v1429_v7 = vsel %vm244_vm0, %v1422_v44, %v4017_v0  ;;  %v3004_v44 = vld [vmem:[#allocation3 + $0x28] sm:$0xff] }
 0x14e   :  { %1437 = vrot.lane.b32.xlu0 %v1429_v7, %s1775_s0  ;;  %v1428_v41 = vpop.permute.xlu1 %1427 }
 0x14f   :  { %v1432_v23 = vsel %vm244_vm0, %v1428_v41, %v4018_v1 }
 0x150   :  { %v699_v27 = vpop.permute.xlu0 %698  ;;  %1443 = vrot.lane.b32.xlu1 %v1432_v23, %s1775_s0 }
 0x151   :  { %v705_v14 = vsel %vm244_vm0, %v699_v27, %v4019_v26  ;;  %v3009_v27 = vld [vmem:[#allocation3 + $0x40] sm:$0xff] }
 0x152   :  { %714 = vrot.lane.b32.xlu0 %v705_v14, %s1775_s0 }
 0x154   :  { %v701_v30 = vpop.permute.xlu1 %700 }
 0x155   :  { %v706_v13 = vsel %vm244_vm0, %v701_v30, %v4020_v8  ;;  %v3015_v30 = vstv %s1627_s11 }
 0x156   :  { %v1060_v24 = vpop.permute.xlu0 %1059  ;;  %716 = vrot.lane.b32.xlu1 %v706_v13, %s1775_s0  ;;  %v3017_v13 = vld [vmem:[#allocation3 + $0x10] sm:$0xff] }
 0x157   :  { %v1066_v0 = vsel %vm244_vm0, %v1060_v24, %v4021_v17  ;;  %v164_v24 = vmul.f32 %v3017_v13, %v2976_v57 }
 0x158   :  { %1075 = vrot.lane.b32.xlu0 %v1066_v0, %s1776_s7  ;;  %v1062_v1 = vpop.permute.xlu1 %1061  ;;  %v3021_v0 = vld [vmem:[#allocation3 + $0x30] sm:$0xff] }
 0x159   :  { %v1067_v48 = vsel %vm244_vm0, %v1062_v1, %v4022_v22 }
 0x15a   :  { %v1424_v21 = vpop.permute.xlu0 %1423  ;;  %1077 = vrot.lane.b32.xlu1 %v1067_v48, %s1776_s7 }
 0x15b   :  { %v1430_v26 = vsel %vm244_vm0, %v1424_v21, %v4023_v50  ;;  %v89_v21 = vlaneseq }
 0x15c   :  { %1439 = vrot.lane.b32.xlu0 %v1430_v26, %s1775_s0  ;;  %v3026_v26 = vld [vmem:[#allocation3 + $0x48] sm:$0xff] }
 0x15d   :  { %v1426_v8 = vpop.permute.xlu1 %1425 }
 0x15e   :  { %v1431_v11 = vsel %vm244_vm0, %v1426_v8, %v4024_v61 }
 0x15f   :  { %1441 = vrot.lane.b32.xlu1 %v1431_v11, %s1775_s0 }
 0x160   :  { %v741_v17 = vpop.permute.xlu0 %740 }
 0x161   :  { %v748_v29 = vsel %vm244_vm0, %v741_v17, %v4025_v19  ;;  %v3032_v17 = vld [vmem:[#allocation3 + $0x18] sm:$0xff] }
 0x162   :  { %756 = vrot.lane.b32.xlu0 %v748_v29, %s1776_s7  ;;  %v165_v29 = vmul.f32 %v3032_v17, %v2976_v57 }
 0x164   :  { %v747_v22 = vpop.permute.xlu1 %746 }
 0x165   :  { %v751_v36 = vsel %vm244_vm0, %v747_v22, %v4026_v10  ;;  %v1218_v40 = vpop.permute.xlu0 %1217  ;;  %v3036_v22 = vld [vmem:[#allocation3 + $0x38] sm:$0xff] }
 0x166   :  { %v1225_v50 = vsel %vm244_vm0, %v1218_v40, %v4027_v63  ;;  %762 = vrot.lane.b32.xlu1 %v751_v36, %s1776_s7 }
 0x167   :  { %1233 = vrot.lane.b32.xlu0 %v1225_v50, %s1775_s0  ;;  %v3041_v50 = vld [vmem:[#allocation3 + $0x60] sm:$0xff] }
 0x168   :  { %v1220_v61 = vpop.permute.xlu1 %1219 }
 0x169   :  { %v1226_v54 = vsel %vm244_vm0, %v1220_v61, %v4028_v20  ;;  %v185_v61 = vmul.f32 %v3041_v50, %v3015_v30 }
 0x16a   :  { %v1222_v28 = vpop.permute.xlu0 %1221  ;;  %1235 = vrot.lane.b32.xlu1 %v1226_v54, %s1775_s0 }
 0x16b   :  { %v1227_v19 = vsel %vm244_vm0, %v1222_v28, %v4029_v60  ;;  %v3048_v28 = vld [vmem:[#allocation3 + $0x50] sm:$0xff] }
 0x16c   :  { %1237 = vrot.lane.b32.xlu0 %v1227_v19, %s1775_s0  ;;  %4031 = vst [vmem:[#allocation17_spill] sm:$0xff] %v3048_v28 }
 0x16d   :  { %v1224_v10 = vpop.permute.xlu1 %1223 }
 0x16e   :  { %v1228_v63 = vsel %vm244_vm0, %v1224_v10, %v4030_v49  ;;  %v3052_v10 = vand.u32 127, %v89_v21 }
 0x16f   :  { %1239 = vrot.lane.b32.xlu1 %v1228_v63, %s1775_s0 }
 0x170   :  { %v1466_v42 = vpop.permute.xlu0 %1465  ;;  %4032 = vst [vmem:[#allocation12_spill] sm:$0xff] %v3052_v10  ;;  %vm243_vm1 = vcmp.eq.s32.totalorder %v3052_v10, 0  ;;  %vm289_vm2 = vcmp.eq.s32.totalorder %v3052_v10, 31  ;;  %v3235_v10 = vld [vmem:[#allocation3 + $0xd0] sm:$0xff] }
 0x171   :  { %v1473_v6 = vsel %vm244_vm0, %v1466_v42, %v2532_v45 }
 0x172   :  { %1481 = vrot.lane.b32.xlu0 %v1473_v6, %s1776_s7  ;;  %v1472_v20 = vpop.permute.xlu1 %1471  ;;  %v3054_v6 = vld [vmem:[#allocation3 + $0x68] sm:$0xff] }
 0x173   :  { %v1476_v39 = vsel %vm244_vm0, %v1472_v20, %v2546_v12  ;;  %v186_v20 = vmul.f32 %v3054_v6, %v3015_v30 }
 0x174   :  { %v743_v2 = vpop.permute.xlu0 %742  ;;  %1487 = vrot.lane.b32.xlu1 %v1476_v39, %s1776_s7 }
 0x175   :  { %v749_v60 = vsel %vm244_vm0, %v743_v2, %v2558_v53  ;;  %v3058_v2 = vld [vmem:[#allocation3 + $0x58] sm:$0xff] }
 0x176   :  { %758 = vrot.lane.b32.xlu0 %v749_v60, %s1776_s7 }
 0x177   :  { %v745_v49 = vpop.permute.xlu1 %744 }
 0x178   :  { %v750_v52 = vsel %vm244_vm0, %v745_v49, %v2572_v31 }
 0x179   :  { %760 = vrot.lane.b32.xlu1 %v750_v52, %s1776_s7  ;;  %v1468_v45 = vpop.permute.xlu0 %1467  ;;  %v3062_v52 = vld [vmem:[#allocation3 + $0x80] sm:$0xff] }
 0x17a   :  { %v1474_v3 = vsel %vm244_vm0, %v1468_v45, %v2595_v55 }
 0x17b   :  { %1483 = vrot.lane.b32.xlu0 %v1474_v3, %s1776_s7  ;;  %v1470_v12 = vpop.permute.xlu1 %1469 }
 0x17c   :  { %v1475_v43 = vsel %vm244_vm0, %v1470_v12, %v2605_v16  ;;  %v3066_v12 = vld [vmem:[#allocation3 + $0x70] sm:$0xff] }
 0x17d   :  { %1485 = vrot.lane.b32.xlu1 %v1475_v43, %s1776_s7  ;;  %4033 = vst [vmem:[#allocation13_spill] sm:$0xff] %v3066_v12  ;;  %v187_v43 = vmul.f32 %v3066_v12, %v3015_v30 }
 0x17f   :  { %v522_v53 = vpop.permute.xlu0 %521 }
 0x180   :  { %v529_v31 = vsel %vm244_vm0, %v522_v53, %v2625_v56  ;;  %v2978_v56 = vstv %s1609_s9 }
 0x181   :  { %537 = vrot.lane.b32.xlu0 %v529_v31, %s1776_s7  ;;  %v524_v25 = vpop.permute.xlu1 %523  ;;  %v167_v15 = vmul.f32 %v2989_v51, %v2978_v56  ;;  %v168_v7 = vmul.f32 %v3004_v44, %v2978_v56  ;;  %v169_v1 = vmul.f32 %v3021_v0, %v2978_v56  ;;  %v170_v36 = vmul.f32 %v3036_v22, %v2978_v56  ;;  %v3071_v31 = vld [vmem:[#allocation3 + $0x88] sm:$0xff] }
 0x182   :  { %v530_v55 = vsel %vm244_vm0, %v524_v25, %v2637_v35  ;;  %4034 = vst [vmem:[#allocation14_spill] sm:$0xff] %v3071_v31 }
 0x183   :  { %539 = vrot.lane.b32.xlu1 %v530_v55, %s1776_s7  ;;  %v526_v5 = vpop.permute.xlu0 %525  ;;  %v172_v11 = vadd.f32 %v168_v7, %v163_v62  ;;  %v173_v54 = vadd.f32 %v169_v1, %v164_v24  ;;  %v174_v39 = vadd.f32 %v170_v36, %v165_v29  ;;  %v3086_v7 = vld [vmem:[#allocation3 + $0x98] sm:$0xff] }
 0x184   :  { %v531_v16 = vsel %vm244_vm0, %v526_v5, %v2657_v37  ;;  %v162_v37 = vmul.f32 %v2985_v38, %v2976_v57 }
 0x185   :  { %541 = vrot.lane.b32.xlu0 %v531_v16, %s1776_s7  ;;  %v528_v34 = vpop.permute.xlu1 %527 }
 0x186   :  { %v532_v18 = vsel %vm244_vm0, %v528_v34, %v2669_v47  ;;  %v2996_v47 = vstv %s1618_s10  ;;  %v171_v23 = vadd.f32 %v167_v15, %v162_v37  ;;  %v3075_v34 = vld [vmem:[#allocation3 + $0x78] sm:$0xff]  ;;  %v3081_v15 = vld [vmem:[#allocation3 + $0x90] sm:$0xff] }
 0x187   :  { %543 = vrot.lane.b32.xlu1 %v532_v18, %s1776_s7  ;;  %v176_v14 = vmul.f32 %v3009_v27, %v2996_v47  ;;  %v178_v19 = vmul.f32 %v3048_v28, %v2996_v47  ;;  %v179_v60 = vmul.f32 %v3058_v2, %v2996_v47  ;;  %v188_v18 = vmul.f32 %v3075_v34, %v3015_v30 }
 0x188   :  { %v1262_v4 = vpop.permute.xlu0 %1261  ;;  %4035 = vst [vmem:[#allocation15_spill] sm:$0xff] %v3081_v15 }
 0x189   :  { %v1269_v35 = vsel %vm244_vm0, %v1262_v4, %v2681_v32  ;;  %v180_v40 = vadd.f32 %v176_v14, %v171_v23  ;;  %v182_v3 = vadd.f32 %v178_v19, %v173_v54  ;;  %v183_v16 = vadd.f32 %v179_v60, %v174_v39 }
 0x18a   :  { %1277 = vrot.lane.b32.xlu0 %v1269_v35, %s1776_s7  ;;  %v1264_v58 = vpop.permute.xlu1 %1263 }
 0x18b   :  { %v1270_v32 = vsel %vm244_vm0, %v1264_v58, %v2689_v59  ;;  %v189_v49 = vadd.f32 %v185_v61, %v180_v40  ;;  %v191_v37 = vadd.f32 %v187_v43, %v182_v3  ;;  %v192_v62 = vadd.f32 %v188_v18, %v183_v16 }
 0x18c   :  { %v1266_v41 = vpop.permute.xlu0 %1265  ;;  %1279 = vrot.lane.b32.xlu1 %v1270_v32, %s1776_s7 }
 0x18d   :  { %v1271_v59 = vsel %vm244_vm0, %v1266_v41, %v2695_v33  ;;  %v177_v33 = vmul.f32 %v3026_v26, %v2996_v47 }
 0x18e   :  { %1281 = vrot.lane.b32.xlu0 %v1271_v59, %s1776_s7  ;;  %v1268_v48 = vpop.permute.xlu1 %1267 }
 0x18f   :  { %v1272_v8 = vsel %vm244_vm0, %v1268_v48, %v2699_v9  ;;  %v3046_v9 = vstv %s2994_s12  ;;  %v181_v42 = vadd.f32 %v177_v33, %v172_v11  ;;  %v3096_v11 = vshrl.u32 %v89_v21, 7 }
 0x190   :  { %1283 = vrot.lane.b32.xlu1 %v1272_v8, %s1776_s7  ;;  %v274_v63 = vpop.permute.xlu0 %273  ;;  %v194_v45 = vmul.f32 %v3062_v52, %v3046_v9  ;;  %v195_v25 = vmul.f32 %v3071_v31, %v3046_v9  ;;  %v196_v58 = vmul.f32 %v3081_v15, %v3046_v9  ;;  %v197_v41 = vmul.f32 %v3086_v7, %v3046_v9 }
 0x191   :  { %v190_v53 = vadd.f32 %v186_v20, %v181_v42  ;;  %v285_v35 = vsel %vm243_vm1, 0.0, %v274_v63  ;;  %4036 = vst [vmem:[#allocation16_spill] sm:$0xff] %v3096_v11  ;;  %vm788_vm3 = vcmp.lt.s32.totalorder %v3096_v11, 1 }
 0x192   :  { %v276_v55 = vpop.permute.xlu1 %275  ;;  %v198_v4 = vadd.f32 %v194_v45, %v189_v49  ;;  %v200_v1 = vadd.f32 %v196_v58, %v191_v37  ;;  %v201_v36 = vadd.f32 %v197_v41, %v192_v62  ;;  %v3127_v37 = vstv %s1603_s13 }
 0x193   :  { %v199_v32 = vadd.f32 %v195_v25, %v190_v53  ;;  %v286_v59 = vsel %vm243_vm1, 0.0, %v276_v55  ;;  %v3129_v58 = vstv %s1612_s14  ;;  %v384_v41 = vmul.f32 %v2985_v38, %v3127_v37 }
 0x194   :  { %v278_v5 = vpop.permute.xlu0 %277  ;;  %v334_v14 = vadd.f32 %v285_v35, %v198_v4  ;;  %4043 = vst [vmem:[#allocation22_spill] sm:$0xff] %v3129_v58 }
 0x195   :  { %v287_v33 = vsel %vm243_vm1, 0.0, %v278_v5  ;;  %v335_v29 = vadd.f32 %v286_v59, %v199_v32 }
 0x196   :  { %v280_v23 = vpop.permute.xlu1 %279  ;;  %v336_v19 = vadd.f32 %v287_v33, %v200_v1  ;;  %v390_v33 = vmul.f32 %v3004_v44, %v3129_v58 }
 0x197   :  { %v288_v61 = vsel %vm243_vm1, 0.0, %v280_v23  ;;  %v389_v23 = vmul.f32 %v2989_v51, %v3129_v58 }
 0x198   :  { %v319_v24 = vpop.permute.xlu0 %318  ;;  %v337_v39 = vadd.f32 %v288_v61, %v201_v36  ;;  %v386_v61 = vmul.f32 %v3017_v13, %v3127_v37 }
 0x199   :  { %v330_v48 = vsel %vm289_vm2, 0.0, %v319_v24  ;;  %v393_v24 = vadd.f32 %v389_v23, %v384_v41 }
 0x19a   :  { %v338_v8 = vadd.f32 %v334_v14, %v330_v48  ;;  %v321_v40 = vpop.permute.xlu1 %320  ;;  %v3139_v14 = vstv %s1621_s15  ;;  %v385_v48 = vmul.f32 %v3000_v46, %v3127_v37 }
 0x19b   :  { %v331_v54 = vsel %vm289_vm2, 0.0, %v321_v40  ;;  %4046 = vst [vmem:[#allocation29_spill] sm:$0xff] %v3139_v14  ;;  %v398_v1 = vmul.f32 %v3009_v27, %v3139_v14  ;;  %v3155_v40 = vstv %s1639_s17 }
 0x19c   :  { %v339_v63 = vadd.f32 %v335_v29, %v331_v54  ;;  %v323_v42 = vpop.permute.xlu0 %322  ;;  %v784_v21 = vrot.slane %v338_v8, 7  ;;  %v3151_v29 = vstv %s1630_s16  ;;  %4051 = vst [vmem:[#allocation42_spill] sm:$0xff] %v3155_v40  ;;  %v391_v54 = vmul.f32 %v3021_v0, %v3129_v58 }
 0x19d   :  { %v332_v20 = vsel %vm289_vm2, 0.0, %v323_v42  ;;  %4049 = vst [vmem:[#allocation34_spill] sm:$0xff] %v3151_v29  ;;  %v394_v42 = vadd.f32 %v390_v33, %v385_v48  ;;  %v409_v23 = vmul.f32 %v3066_v12, %v3151_v29  ;;  %v3195_v48 = vld [vmem:[#allocation3 + $0xa0] sm:$0xff]  ;;  %v3262_v12 = vld [vmem:[#allocation3 + $0xe8] sm:$0xff] }
 0x19e   :  { %v785_v60 = vrot.slane %v339_v63, 7  ;;  %v340_v49 = vadd.f32 %v336_v19, %v332_v20  ;;  %v325_v45 = vpop.permute.xlu1 %324  ;;  %v402_v19 = vadd.f32 %v398_v1, %v393_v24  ;;  %v407_v63 = vmul.f32 %v3041_v50, %v3151_v29  ;;  %4057 = vst [vmem:[#allocation48_spill] sm:$0xff] %v3262_v12 }
 0x19f   :  { %v333_v3 = vsel %vm289_vm2, 0.0, %v325_v45  ;;  %v399_v20 = vmul.f32 %v3026_v26, %v3139_v14  ;;  %v395_v45 = vadd.f32 %v391_v54, %v386_v61  ;;  %v3191_v24 = vmul.f32 %v3081_v15, %v3155_v40  ;;  %v3199_v61 = vld [vmem:[#allocation3 + $0xc0] sm:$0xff] }
 0x1a0   :  { %v786_v43 = vrot.slane %v340_v49, 7  ;;  %v341_v53 = vadd.f32 %v337_v39, %v333_v3  ;;  %v3109_v25 = vsel %vm788_vm3, %v784_v21, %v785_v60  ;;  %v3177_v49 = vmul.f32 %v3071_v31, %v3155_v40  ;;  %4054 = vst [vmem:[#allocation45_spill] sm:$0xff] %v3199_v61  ;;  %v3249_v15 = vld [vmem:[#allocation3 + $0xe0] sm:$0xff] }
 0x1a1   :  { %4037 = vst [vmem:[#allocation18_spill] sm:$0xff] %v3109_v25  ;;  %v400_v3 = vmul.f32 %v3048_v28, %v3139_v14  ;;  %v403_v41 = vadd.f32 %v399_v20, %v394_v42  ;;  %v929_v33 = vmul.f32 %v3195_v48, %v2976_v57  ;;  %v933_v54 = vmul.f32 %v3199_v61, %v2978_v56  ;;  %v3209_v42 = vld [vmem:[#allocation3 + $0xb8] sm:$0xff]  ;;  %v3217_v25 = vld [vmem:[#allocation3 + $0xa8] sm:$0xff]  ;;  %v3272_v28 = vld [vmem:[#allocation3 + $0xf0] sm:$0xff] }
 0x1a2   :  { %v787_v55 = vrot.slane %v341_v53, 7  ;;  %v3111_v5 = vpop.permute.xlu0 %493  ;;  %v3115_v16 = vsel %vm788_vm3, %v785_v60, %v786_v43  ;;  %v408_v60 = vmul.f32 %v3054_v6, %v3151_v29  ;;  %v392_v53 = vmul.f32 %v3036_v22, %v3129_v58  ;;  %4059 = vst [vmem:[#allocation50_spill] sm:$0xff] %v3272_v28 }
 0x1a3   :  { %4038 = vst [vmem:[#allocation19_spill] sm:$0xff] %v3111_v5  ;;  %4039 = vst [vmem:[#allocation35_spill] sm:$0xff] %v3115_v16  ;;  %v3117_v18 = vpop.permute.xlu1 %495  ;;  %v932_v20 = vmul.f32 %v3209_v42, %v2976_v57 }
 0x1a4   :  { %4040 = vst [vmem:[#allocation37_spill] sm:$0xff] %v3117_v18  ;;  %v3121_v4 = vsel %vm788_vm3, %v787_v55, %v784_v21  ;;  %v3125_v35 = vsel %vm788_vm3, %v786_v43, %v787_v55  ;;  %v3171_v21 = vmul.f32 %v3062_v52, %v3155_v40  ;;  %v387_v43 = vmul.f32 %v3032_v17, %v3127_v37 }
 0x1a5   :  { %4041 = vst [vmem:[#allocation20_spill] sm:$0xff] %v3121_v4  ;;  %4042 = vst [vmem:[#allocation21_spill] sm:$0xff] %v3125_v35  ;;  %v3185_v55 = vadd.f32 %v407_v63, %v402_v19  ;;  %v3205_v19 = vstv %s1606_s18  ;;  %v3207_v63 = vstv %s1615_s19  ;;  %v3213_v35 = vld [vmem:[#allocation3 + $0xd8] sm:$0xff]  ;;  %v401_v18 = vmul.f32 %v3058_v2, %v3139_v14 }
 0x1a6   :  { %v3131_v32 = vpop.permute.xlu0 %497  ;;  %v936_v16 = vmul.f32 %v3213_v35, %v2978_v56  ;;  %v606_v31 = vmul.f32 %v3032_v17, %v3205_v19 }
 0x1a7   :  { %4044 = vst [vmem:[#allocation23_spill] sm:$0xff] %v3131_v32  ;;  %v3221_v32 = vld [vmem:[#allocation3 + $0xc8] sm:$0xff]  ;;  %v3340_v58 = vadd.f32 %v3171_v21, %v3185_v55 }
 0x1a8   :  { %v3133_v62 = vpop.permute.xlu1 %499  ;;  %v934_v4 = vmul.f32 %v3221_v32, %v2978_v56 }
 0x1a9   :  { %4045 = vst [vmem:[#allocation24_spill] sm:$0xff] %v3133_v62  ;;  %v930_v62 = vmul.f32 %v3217_v25, %v2976_v57 }
 0x1ab   :  { %v3141_v59 = vpop.permute.xlu0 %1029 }
 0x1ac   :  { %4047 = vst [vmem:[#allocation31_spill] sm:$0xff] %v3141_v59  ;;  %v3231_v59 = vld [vmem:[#allocation3 + $0xb0] sm:$0xff] }
 0x1ad   :  { %v931_v11 = vmul.f32 %v3231_v59, %v2976_v57  ;;  %v941_v57 = vmul.f32 %v3249_v15, %v2996_v47 }
 0x1ae   :  { %v3149_v8 = vpop.permute.xlu1 %1035 }
 0x1af   :  { %4048 = vst [vmem:[#allocation32_spill] sm:$0xff] %v3149_v8  ;;  %v937_v8 = vadd.f32 %v933_v54, %v929_v33  ;;  %v942_v33 = vmul.f32 %v3262_v12, %v2996_v47  ;;  %v412_v54 = vadd.f32 %v408_v60, %v403_v41 }
 0x1b0   :  { %v3153_v36 = vpop.permute.xlu0 %1031 }
 0x1b1   :  { %4050 = vst [vmem:[#allocation36_spill] sm:$0xff] %v3153_v36  ;;  %v410_v36 = vmul.f32 %v3075_v34, %v3151_v29  ;;  %v3258_v29 = vld [vmem:[#allocation3 + $0xf8] sm:$0xff]  ;;  %v945_v41 = vadd.f32 %v941_v57, %v937_v8  ;;  %v1341_v57 = vmul.f32 %v3199_v61, %v3207_v63 }
 0x1b2   :  { %v3165_v39 = vpop.permute.xlu1 %1033 }
 0x1b3   :  { %4052 = vst [vmem:[#allocation43_spill] sm:$0xff] %v3165_v39  ;;  %v396_v39 = vadd.f32 %v392_v53, %v387_v43  ;;  %v608_v43 = vmul.f32 %v2989_v51, %v3207_v63  ;;  %v944_v51 = vmul.f32 %v3258_v29, %v2996_v47 }
 0x1b5   :  { %v405_v60 = vadd.f32 %v401_v18, %v396_v39  ;;  %v1337_v39 = vmul.f32 %v3195_v48, %v3205_v19 }
 0x1b6   :  { %v3193_v1 = vpop.permute.xlu0 %712 }
 0x1b7   :  { %4053 = vst [vmem:[#allocation44_spill] sm:$0xff] %v3193_v1  ;;  %v404_v1 = vadd.f32 %v400_v3, %v395_v45  ;;  %v935_v45 = vmul.f32 %v3235_v10, %v2978_v56  ;;  %v603_v3 = vmul.f32 %v2985_v38, %v3205_v19  ;;  %v3256_v56 = vstv %s3167_s20 }
 0x1b8   :  { %v940_v38 = vadd.f32 %v936_v16, %v932_v20  ;;  %v611_v16 = vmul.f32 %v3036_v22, %v3207_v63  ;;  %v617_v12 = vmul.f32 %v3009_v27, %v3256_v56  ;;  %v3283_v22 = vstv %s3203_s21 }
 0x1b9   :  { %v3229_v5 = vpop.permute.xlu1 %718  ;;  %v939_v14 = vadd.f32 %v935_v45, %v931_v11  ;;  %v3287_v45 = vld [vmem:[#allocation3 + $0x118] sm:$0xff]  ;;  %v620_v8 = vmul.f32 %v3058_v2, %v3256_v56  ;;  %v3309_v2 = vld [vmem:[#allocation3 + $0x120] sm:$0xff]  ;;  %v1345_v61 = vadd.f32 %v1341_v57, %v1337_v39 }
 0x1ba   :  { %4055 = vst [vmem:[#allocation46_spill] sm:$0xff] %v3229_v5  ;;  %v3247_v5 = vmul.f32 %v3086_v7, %v3155_v40  ;;  %v413_v40 = vadd.f32 %v409_v23, %v404_v1  ;;  %v3278_v23 = vld [vmem:[#allocation3 + $0x100] sm:$0xff]  ;;  %v948_v11 = vadd.f32 %v944_v51, %v940_v38  ;;  %v615_v18 = vadd.f32 %v611_v16, %v606_v31 }
 0x1bb   :  { %v3243_v53 = vpop.permute.xlu0 %1073  ;;  %v949_v17 = vmul.f32 %v3278_v23, %v3015_v30  ;;  %v626_v31 = vmul.f32 %v3041_v50, %v3283_v22  ;;  %v414_v16 = vadd.f32 %v410_v36, %v405_v60  ;;  %v3326_v36 = vld [vmem:[#allocation3 + $0x130] sm:$0xff] }
 0x1bc   :  { %4056 = vst [vmem:[#allocation47_spill] sm:$0xff] %v3243_v53  ;;  %v938_v53 = vadd.f32 %v934_v4, %v930_v62  ;;  %v943_v4 = vmul.f32 %v3272_v28, %v2996_v47  ;;  %v612_v62 = vadd.f32 %v608_v43, %v603_v3  ;;  %v952_v47 = vmul.f32 %v3287_v45, %v3015_v30  ;;  %v3291_v43 = vld [vmem:[#allocation3 + $0x108] sm:$0xff] }
 0x1bd   :  { %4061 = vst [vmem:[#allocation52_spill] sm:$0xff] %v3291_v43  ;;  %v950_v27 = vmul.f32 %v3291_v43, %v3015_v30  ;;  %v3313_v43 = vld [vmem:[#allocation3 + $0x138] sm:$0xff]  ;;  %v959_v60 = vmul.f32 %v3326_v36, %v3046_v9  ;;  %v629_v28 = vmul.f32 %v3075_v34, %v3283_v22  ;;  %v1340_v34 = vmul.f32 %v3209_v42, %v3205_v19 }
 0x1be   :  { %v3270_v20 = vpop.permute.xlu1 %1079  ;;  %v946_v3 = vadd.f32 %v942_v33, %v938_v53  ;;  %v947_v51 = vadd.f32 %v943_v4, %v939_v14  ;;  %v3303_v53 = vld [vmem:[#allocation3 + $0x110] sm:$0xff]  ;;  %v960_v14 = vmul.f32 %v3313_v43, %v3046_v9  ;;  %v3318_v4 = vstv %s3253_s22 }
 0x1bf   :  { %4058 = vst [vmem:[#allocation49_spill] sm:$0xff] %v3270_v20  ;;  %4063 = vst [vmem:[#allocation39_spill] sm:$0xff] %v3303_v53  ;;  %v951_v33 = vmul.f32 %v3303_v53, %v3015_v30  ;;  %v957_v20 = vmul.f32 %v3309_v2, %v3046_v9  ;;  %v953_v30 = vadd.f32 %v949_v17, %v945_v41 }
 0x1c0   :  { %v3285_v1 = vpop.permute.xlu0 %1437  ;;  %v624_v53 = vadd.f32 %v620_v8, %v615_v18  ;;  %v954_v41 = vadd.f32 %v950_v27, %v946_v3  ;;  %v1344_v3 = vmul.f32 %v3213_v35, %v3207_v63  ;;  %v638_v55 = vmul.f32 %v3086_v7, %v3318_v4 }
 0x1c1   :  { %4060 = vst [vmem:[#allocation51_spill] sm:$0xff] %v3285_v1  ;;  %v621_v1 = vadd.f32 %v617_v12, %v612_v62  ;;  %v956_v12 = vadd.f32 %v952_v47, %v948_v11  ;;  %v3322_v62 = vld [vmem:[#allocation3 + $0x128] sm:$0xff]  ;;  %v955_v17 = vadd.f32 %v951_v33, %v947_v51  ;;  %v635_v47 = vmul.f32 %v3062_v52, %v3318_v4 }
 0x1c2   :  { %v3301_v38 = vpop.permute.xlu1 %1443  ;;  %4065 = vst [vmem:[#allocation41_spill] sm:$0xff] %v3322_v62  ;;  %v958_v50 = vmul.f32 %v3322_v62, %v3046_v9  ;;  %v3343_v9 = vadd.f32 %v3177_v49, %v412_v54  ;;  %v3353_v52 = vadd.f32 %v3247_v5, %v414_v16  ;;  %v3355_v27 = vadd.f32 %v957_v20, %v953_v30 }
 0x1c3   :  { %4062 = vst [vmem:[#allocation38_spill] sm:$0xff] %v3301_v38  ;;  %v630_v11 = vadd.f32 %v626_v31, %v621_v1  ;;  %v3350_v1 = vadd.f32 %v3191_v24, %v413_v40  ;;  %v3357_v18 = vadd.f32 %v960_v14, %v956_v12  ;;  %v633_v49 = vadd.f32 %v629_v28, %v624_v53 }
 0x1c4   :  { %v3320_v38 = vpop.permute.xlu0 %714  ;;  %v1357_v8 = vmul.f32 %v3278_v23, %v3283_v22  ;;  %v3365_v39 = vadd.f32 %v958_v50, %v954_v41  ;;  %v3367_v40 = vadd.f32 %v959_v60, %v955_v17  ;;  %v3373_v24 = vmul.f32 %v3309_v2, %v3318_v4  ;;  %v4066_v60 = vld [vmem:[#allocation22_spill] sm:$0xff]  ;;  %v4067_v41 = vld [vmem:[#allocation45_spill] sm:$0xff] }
 0x1c5   :  { %4064 = vst [vmem:[#allocation40_spill] sm:$0xff] %v3320_v38  ;;  %v1349_v38 = vmul.f32 %v3249_v15, %v3256_v56  ;;  %v3369_v5 = vadd.f32 %v635_v47, %v630_v11  ;;  %v1348_v28 = vadd.f32 %v1344_v3, %v1340_v34  ;;  %v1352_v7 = vmul.f32 %v3258_v29, %v3256_v56  ;;  %v4068_v3 = vld [vmem:[#allocation17_spill] sm:$0xff] }
 0x1c6   :  { %v3383_v57 = vmul.f32 %v3313_v43, %v3318_v4  ;;  %v609_v51 = vmul.f32 %v3004_v44, %v3207_v63  ;;  %v605_v53 = vmul.f32 %v3017_v13, %v3205_v19  ;;  %v610_v33 = vmul.f32 %v3021_v0, %v3207_v63 }
 0x1c7   :  { %v1353_v54 = vadd.f32 %v1349_v38, %v1345_v61  ;;  %v1360_v61 = vmul.f32 %v3287_v45, %v3283_v22  ;;  %v604_v38 = vmul.f32 %v3000_v46, %v3205_v19  ;;  %v3395_v16 = vadd.f32 %v638_v55, %v633_v49 }
 0x1c8   :  { %v3336_v62 = vpop.permute.xlu1 %716  ;;  %v618_v30 = vmul.f32 %v3026_v26, %v3256_v56  ;;  %v627_v46 = vmul.f32 %v3054_v6, %v3283_v22  ;;  %v1338_v44 = vmul.f32 %v3217_v25, %v3205_v19  ;;  %v1342_v13 = vmul.f32 %v3221_v32, %v3207_v63 }
 0x1c9   :  { %v3397_v14 = vadd.f32 %v1357_v8, %v1353_v54  ;;  %v1339_v0 = vmul.f32 %v3231_v59, %v3205_v19  ;;  %v1343_v12 = vmul.f32 %v3235_v10, %v3207_v63  ;;  %v1133_v26 = vmul.f32 %v3195_v48, %v3127_v37 }
 0x1ca   :  { %v3359_v21 = vpop.permute.xlu0 %1075  ;;  %v1137_v6 = vmul.f32 %v4067_v41, %v4066_v60  ;;  %v1134_v17 = vmul.f32 %v3217_v25, %v3127_v37  ;;  %v1138_v11 = vmul.f32 %v3221_v32, %v4066_v60  ;;  %v1356_v47 = vadd.f32 %v1352_v7, %v1348_v28  ;;  %v4069_v32 = vld [vmem:[#allocation48_spill] sm:$0xff]  ;;  %v4070_v7 = vld [vmem:[#allocation50_spill] sm:$0xff] }
 0x1cb   :  { %v613_v34 = vadd.f32 %v609_v51, %v604_v38  ;;  %v614_v19 = vadd.f32 %v610_v33, %v605_v53  ;;  %v619_v63 = vmul.f32 %v4068_v3, %v3256_v56  ;;  %v1135_v49 = vmul.f32 %v3231_v59, %v3127_v37  ;;  %v4071_v53 = vld [vmem:[#allocation29_spill] sm:$0xff] }
 0x1cc   :  { %v3375_v20 = vpop.permute.xlu1 %1077  ;;  %v1139_v48 = vmul.f32 %v3235_v10, %v4066_v60  ;;  %v1136_v55 = vmul.f32 %v3209_v42, %v3127_v37  ;;  %v1140_v25 = vmul.f32 %v3213_v35, %v4066_v60  ;;  %v1346_v54 = vadd.f32 %v1342_v13, %v1338_v44  ;;  %v4072_v35 = vld [vmem:[#allocation14_spill] sm:$0xff] }
 0x1cd   :  { %v1350_v8 = vmul.f32 %v4069_v32, %v3256_v56  ;;  %v1347_v28 = vadd.f32 %v1343_v12, %v1339_v0  ;;  %v1351_v38 = vmul.f32 %v4070_v7, %v3256_v56  ;;  %v1141_v59 = vadd.f32 %v1137_v6, %v1133_v26  ;;  %v4073_v0 = vld [vmem:[#allocation13_spill] sm:$0xff] }
 0x1ce   :  { %v3393_v31 = vpop.permute.xlu0 %1439  ;;  %v1145_v10 = vmul.f32 %v3249_v15, %v4071_v53  ;;  %v1142_v33 = vadd.f32 %v1138_v11, %v1134_v17  ;;  %v1146_v37 = vmul.f32 %v4069_v32, %v4071_v53  ;;  %v622_v42 = vadd.f32 %v618_v30, %v613_v34  ;;  %v4074_v30 = vld [vmem:[#allocation52_spill] sm:$0xff]  ;;  %v4075_v34 = vld [vmem:[#allocation39_spill] sm:$0xff]  ;;  %v4076_v32 = vld [vmem:[#allocation34_spill] sm:$0xff] }
 0x1cf   :  { %v636_v44 = vmul.f32 %v4072_v35, %v3318_v4  ;;  %v623_v13 = vadd.f32 %v619_v63, %v614_v19  ;;  %v628_v12 = vmul.f32 %v4073_v0, %v3283_v22  ;;  %v1143_v56 = vadd.f32 %v1139_v48, %v1135_v49 }
 0x1d0   :  { %v1147_v26 = vmul.f32 %v4070_v7, %v4071_v53  ;;  %v1144_v41 = vadd.f32 %v1140_v25, %v1136_v55  ;;  %v1148_v15 = vmul.f32 %v3258_v29, %v4071_v53  ;;  %v1354_v6 = vadd.f32 %v1350_v8, %v1346_v54  ;;  %v4077_v54 = vld [vmem:[#allocation15_spill] sm:$0xff] }
 0x1d1   :  { %v3411_v50 = vpop.permute.xlu1 %1441  ;;  %v1358_v17 = vmul.f32 %v4074_v30, %v3283_v22  ;;  %v1355_v11 = vadd.f32 %v1351_v38, %v1347_v28  ;;  %v1359_v19 = vmul.f32 %v4075_v34, %v3283_v22  ;;  %v1149_v63 = vadd.f32 %v1145_v10, %v1141_v59  ;;  %v4078_v28 = vld [vmem:[#allocation41_spill] sm:$0xff] }
 0x1d2   :  { %v1153_v49 = vmul.f32 %v3278_v23, %v4076_v32  ;;  %v1150_v48 = vadd.f32 %v1146_v37, %v1142_v33  ;;  %v1154_v55 = vmul.f32 %v4074_v30, %v4076_v32  ;;  %v1364_v25 = vadd.f32 %v1360_v61, %v1356_v47  ;;  %v4079_v37 = vld [vmem:[#allocation42_spill] sm:$0xff] }
 0x1d3   :  { %v631_v29 = vadd.f32 %v627_v46, %v622_v42  ;;  %v637_v8 = vmul.f32 %v4077_v54, %v3318_v4  ;;  %v1366_v7 = vmul.f32 %v4078_v28, %v3318_v4  ;;  %v1151_v22 = vadd.f32 %v1147_v26, %v1143_v56 }
 0x1d4   :  { %v3435_v51 = vpop.permute.xlu0 %756  ;;  %v1155_v59 = vmul.f32 %v4075_v34, %v4076_v32  ;;  %v1152_v53 = vadd.f32 %v1148_v15, %v1144_v41  ;;  %v1156_v23 = vmul.f32 %v3287_v45, %v4076_v32  ;;  %v632_v10 = vadd.f32 %v628_v12, %v623_v13  ;;  %v4080_v12 = vld [vmem:[#allocation32_spill] sm:$0xff]  ;;  %v4084_v34 = vld [vmem:[#allocation49_spill] sm:$0xff]  ;;  %v4085_v32 = vld [vmem:[#allocation19_spill] sm:$0xff] }
 0x1d5   :  { %v1362_v33 = vadd.f32 %v1358_v17, %v1354_v6  ;;  %v1363_v61 = vadd.f32 %v1359_v19, %v1355_v11  ;;  %v1367_v46 = vmul.f32 %v3326_v36, %v3318_v4  ;;  %v1157_v47 = vadd.f32 %v1153_v49, %v1149_v63  ;;  %v4083_v11 = vld [vmem:[#allocation31_spill] sm:$0xff] }
 0x1d6   :  { %v1161_v42 = vmul.f32 %v3309_v2, %v4079_v37  ;;  %v1158_v35 = vadd.f32 %v1154_v55, %v1150_v48  ;;  %v1162_v0 = vmul.f32 %v4078_v28, %v4079_v37  ;;  %v3481_v26 = vadd.f32 %v3373_v24, %v3397_v14  ;;  %v4086_v55 = vld [vmem:[#allocation36_spill] sm:$0xff] }
 0x1d7   :  { %v3484_v45 = vadd.f32 %v3383_v57, %v1364_v25  ;;  %v640_v13 = vadd.f32 %v636_v44, %v631_v29  ;;  %v1163_v4 = vmul.f32 %v3326_v36, %v4079_v37  ;;  %v1044_v2 = vsel %vm243_vm1, 0.0, %v4080_v12  ;;  %v4082_v44 = vld [vmem:[#allocation16_spill] sm:$0xff] }
 0x1d8   :  { %v3445_v60 = vpop.permute.xlu1 %762  ;;  %v1159_v15 = vadd.f32 %v1155_v59, %v1151_v22  ;;  %v1160_v6 = vadd.f32 %v1156_v23, %v1152_v53  ;;  %v1164_v30 = vmul.f32 %v3313_v43, %v4079_v37  ;;  %v641_v24 = vadd.f32 %v637_v8, %v632_v10  ;;  %v4087_v8 = vld [vmem:[#allocation37_spill] sm:$0xff]  ;;  %v4089_v23 = vld [vmem:[#allocation43_spill] sm:$0xff] }
 0x1d9   :  { %v3455_v3 = vpop.permute.xlu0 %1233  ;;  %v3495_v14 = vadd.f32 %v1366_v7, %v1362_v33  ;;  %v3497_v57 = vadd.f32 %v1367_v46, %v1363_v61  ;;  %vm780_vm4 = vcmp.eq.s32.totalorder %v4082_v44, 0  ;;  %v1041_v36 = vsel %vm243_vm1, 0.0, %v4083_v11  ;;  %v4088_v7 = vld [vmem:[#allocation47_spill] sm:$0xff]  ;;  %v4090_v33 = vld [vmem:[#allocation46_spill] sm:$0xff] }
 0x1da   :  { %v1088_v19 = vsel %vm289_vm2, 0.0, %v4084_v34  ;;  %v3506_v63 = vadd.f32 %v1161_v42, %v1157_v47  ;;  %v3508_v43 = vadd.f32 %v1162_v0, %v1158_v35  ;;  %v505_v49 = vsel %vm243_vm1, 0.0, %v4085_v32  ;;  %v4091_v0 = vld [vmem:[#allocation44_spill] sm:$0xff] }
 0x1db   :  { %v1092_v48 = vadd.f32 %v1044_v2, %v3357_v18  ;;  %v1042_v25 = vsel %vm243_vm1, 0.0, %v4086_v55  ;;  %v3520_v54 = vadd.s32 24, %v4082_v44  ;;  %v506_v28 = vsel %vm243_vm1, 0.0, %v4087_v8 }
 0x1dc   :  { %v3465_v38 = vpop.permute.xlu1 %1235  ;;  %v1085_v22 = vsel %vm289_vm2, 0.0, %v4088_v7  ;;  %v3528_v59 = vadd.f32 %v1163_v4, %v1159_v15  ;;  %v3530_v18 = vadd.f32 %v1164_v30, %v1160_v6  ;;  %v1089_v53 = vadd.f32 %v1041_v36, %v3355_v27  ;;  %v4092_v30 = vld [vmem:[#allocation20_spill] sm:$0xff]  ;;  %v4097_v7 = vld [vmem:[#allocation38_spill] sm:$0xff] }
 0x1dd   :  { %v1043_v10 = vsel %vm243_vm1, 0.0, %v4089_v23  ;;  %v727_v61 = vsel %vm243_vm1, 0.0, %v4090_v33  ;;  %v3539_v46 = vadd.f32 %v1092_v48, %v1088_v19  ;;  %v553_v37 = vadd.f32 %v505_v49, %v3340_v58  ;;  %v4094_v48 = vld [vmem:[#allocation23_spill] sm:$0xff] }
 0x1de   :  { %v3477_v56 = vpop.permute.xlu0 %1237  ;;  %v1090_v42 = vadd.f32 %v1042_v25, %v3365_v39  ;;  %v1086_v27 = vsel %vm289_vm2, 0.0, %v3359_v21  ;;  %v3551_v35 = vstv %s3785_s2  ;;  %v724_v4 = vsel %vm243_vm1, 0.0, %v4091_v0  ;;  %v4095_v25 = vld [vmem:[#allocation24_spill] sm:$0xff]  ;;  %s1777_s2 = smov [#allocation8]  }
 0x1df   :  { %v1093_v12 = vadd.f32 %v1089_v53, %v1085_v22  ;;  %v1087_v58 = vsel %vm289_vm2, 0.0, %v3375_v20  ;;  %vm805_vm5 = vcmp.lt.s32.totalorder %v4082_v44, 7  ;;  %v771_v21 = vsel %vm289_vm2, 0.0, %v3445_v60  ;;  %v4093_v20 = vld [vmem:[#allocation40_spill] sm:$0xff]  ;;  %s1587_s26 = sshll.u32 %s1777_s2, 4  ;;  %s1588_s26 = int_to_ptr.vmem [resolvable:$true] %s1587_s26 }
 0x1e0   :  { %v554_v2 = vadd.f32 %v506_v28, %v3343_v9  ;;  %v1091_v15 = vadd.f32 %v1043_v10, %v3367_v40  ;;  %v775_v6 = vadd.f32 %v727_v61, %v3395_v16  ;;  %v793_v11 = vsel %vm780_vm4, 0.0, %v4092_v30  ;;  %v4096_v28 = vld [vmem:[#allocation51_spill] sm:$0xff]  ;;  %s1742_s27 = scalar_lea.vmem %s1588_s26, 1024  ;;  %p1747_p0 = scmp.lt.s32.totalorder %s1588_s26, %s1588_s26 }
 0x1e1   :  { %v3493_v17 = vpop.permute.xlu1 %1239  ;;  %v1508_v36 = vrot.slane %v3539_v46, 7  ;;  %v725_v34 = vsel %vm243_vm1, 0.0, %v4093_v20  ;;  %v1094_v19 = vadd.f32 %v1090_v42, %v1086_v27  ;;  %v768_v60 = vsel %vm289_vm2, 0.0, %v3435_v51  ;;  %p1743_p13 = scmp.ne.s32.totalorder %s1588_s26, %s1742_s27  ;;  %p1748_p1 = scmp.lt.s32.totalorder %s1742_s27, %s1742_s27 }
 0x1e2   :  { %v772_v40 = vadd.f32 %v724_v4, %v3369_v5  ;;  %v726_v16 = vsel %vm243_vm1, 0.0, %v3336_v62  ;;  %v3580_v32 = vadd.f32 %v1091_v15, %v1087_v58  ;;  %v3582_v49 = vadd.f32 %v775_v6, %v771_v21 }
 0x1e3   :  { %vm800_vm6 = vcmp.eq.s32.totalorder %v3520_v54, 31  ;;  %v507_v55 = vsel %vm243_vm1, 0.0, %v4094_v48  ;;  %v508_v51 = vsel %vm243_vm1, 0.0, %v4095_v25  ;;  %v1505_v8 = vrot.slane %v1093_v12, 7  ;;  %p1749_p2 = por %p1748_p1, %p1747_p0 }
 0x1e4   :  { %v3517_v29 = vpop.permute.xlu0 %1481  ;;  %v1449_v62 = vsel %vm243_vm1, 0.0, %v4096_v28  ;;  %v1452_v22 = vsel %vm243_vm1, 0.0, %v4097_v7  ;;  %v773_v53 = vadd.f32 %v725_v34, %v640_v13  ;;  %v776_v23 = vadd.f32 %v772_v40, %v768_v60 }
 0x1e5   :  { %v774_v33 = vadd.f32 %v726_v16, %v641_v24  ;;  %v1506_v61 = vrot.slane %v1094_v19, 7  ;;  %v1512_v27 = vsel %vm788_vm3, %v1508_v36, %v1505_v8  ;;  %v1507_v0 = vrot.slane %v3580_v32, 7  ;;  %p1750_p3 = pnand %p1749_p2, %p1743_p13 }
 0x1e6   :  { %v3541_v47 = vpop.permute.xlu1 %1487  ;;  %v1450_v4 = vsel %vm243_vm1, 0.0, %v3393_v31  ;;  %v804_v13 = vrot.slane %v3582_v49, 1  ;;  %v555_v24 = vadd.f32 %v507_v55, %v3350_v1  ;;  %v556_v21 = vadd.f32 %v508_v51, %v3353_v52 }
 0x1e7   :  { %v1500_v15 = vadd.f32 %v1452_v22, %v3484_v45  ;;  %v1451_v6 = vsel %vm243_vm1, 0.0, %v3411_v50  ;;  %v801_v30 = vrot.slane %v776_v23, 1  ;;  %v1245_v31 = vsel %vm243_vm1, 0.0, %v3455_v3 }
 0x1e8   :  { %v759_v39 = vpop.permute.xlu0 %758  ;;  %v1498_v34 = vadd.f32 %v1450_v4, %v3495_v14  ;;  %v1246_v1 = vsel %vm243_vm1, 0.0, %v3465_v38  ;;  %v3628_v45 = vsel %vm788_vm3, %v1505_v8, %v1506_v61  ;;  %v3638_v38 = vsel %vm788_vm3, %v1506_v61, %v1507_v0 }
 0x1e9   :  { %v769_v5 = vsel %vm289_vm2, 0.0, %v759_v39  ;;  %v1497_v39 = vadd.f32 %v1449_v62, %v3481_v26  ;;  %v1513_v26 = vsel %vm780_vm4, 0.0, %v1512_v27  ;;  %v809_v50 = vsel %vm805_vm5, %v804_v13, %v801_v30 }
 0x1ea   :  { %v777_v12 = vadd.f32 %v773_v53, %v769_v5  ;;  %v1499_v14 = vadd.f32 %v1451_v6, %v3497_v57  ;;  %v1293_v60 = vadd.f32 %v1245_v31, %v3506_v63  ;;  %v1294_v49 = vadd.f32 %v1246_v1, %v3508_v43 }
 0x1eb   :  { %v761_v9 = vpop.permute.xlu1 %760  ;;  %v1493_v57 = vsel %vm289_vm2, 0.0, %v3517_v29  ;;  %v1248_v43 = vsel %vm243_vm1, 0.0, %v3493_v17  ;;  %v1496_v17 = vsel %vm289_vm2, 0.0, %v3541_v47  ;;  %v4099_v47 = vld [vmem:[#allocation35_spill] sm:$0xff]  ;;  %v1509_v41 = vsel %vm788_vm3, %v1507_v0, %v1508_v36 }
 0x1ec   :  { %v770_v42 = vsel %vm289_vm2, 0.0, %v761_v9  ;;  %v802_v19 = vrot.slane %v777_v12, 1  ;;  %v1247_v9 = vsel %vm243_vm1, 0.0, %v3477_v56  ;;  %v813_v56 = vsel %vm800_vm6, 0.0, %v809_v50 }
 0x1ed   :  { %v1484_v10 = vpop.permute.xlu0 %1483  ;;  %v778_v20 = vadd.f32 %v774_v33, %v770_v42  ;;  %v3666_v22 = vadd.f32 %v1497_v39, %v1493_v57  ;;  %v3679_v27 = vadd.f32 %v1248_v43, %v3530_v18 }
 0x1ee   :  { %v1494_v55 = vsel %vm289_vm2, 0.0, %v1484_v10  ;;  %v808_v5 = vsel %vm805_vm5, %v801_v30, %v802_v19 }
 0x1ef   :  { %v1486_v58 = vpop.permute.xlu1 %1485  ;;  %v803_v48 = vrot.slane %v778_v20, 1  ;;  %v1502_v62 = vadd.f32 %v1498_v34, %v1494_v55  ;;  %v1504_v20 = vadd.f32 %v1500_v15, %v1496_v17  ;;  %v4100_v34 = vld [vmem:[#allocation21_spill] sm:$0xff] }
 0x1f0   :  { %v1495_v8 = vsel %vm289_vm2, 0.0, %v1486_v58 }
 0x1f1   :  { %v1503_v10 = vadd.f32 %v1499_v14, %v1495_v8  ;;  %v806_v4 = vsel %vm805_vm5, %v803_v48, %v804_v13  ;;  %v1517_v13 = vrot.slane %v3666_v22, 1  ;;  %v1520_v57 = vrot.slane %v1504_v20, 1 }
 0x1f3   :  { %v538_v52 = vpop.permute.xlu0 %537  ;;  %v1519_v50 = vrot.slane %v1503_v10, 1 }
 0x1f4   :  { %v549_v3 = vsel %vm289_vm2, 0.0, %v538_v52 }
 0x1f5   :  { %v557_v40 = vadd.f32 %v553_v37, %v549_v3  ;;  %v540_v16 = vpop.permute.xlu1 %539  ;;  %v1295_v37 = vadd.f32 %v1247_v9, %v3528_v59  ;;  %v807_v59 = vsel %vm805_vm5, %v802_v19, %v803_v48 }
 0x1f6   :  { %v550_v25 = vsel %vm289_vm2, 0.0, %v540_v16 }
 0x1f7   :  { %v814_v63 = vadd.f32 %v793_v11, %v557_v40  ;;  %v558_v51 = vadd.f32 %v554_v2, %v550_v25  ;;  %v542_v28 = vpop.permute.xlu0 %541  ;;  %v4098_v11 = vld [vmem:[#allocation18_spill] sm:$0xff] }
 0x1f8   :  { %v551_v7 = vsel %vm289_vm2, 0.0, %v542_v28 }
 0x1f9   :  { %v818_v29 = vadd.f32 %v814_v63, %v808_v5  ;;  %v815_v2 = vadd.f32 %v4098_v11, %v558_v51  ;;  %v559_v53 = vadd.f32 %v555_v24, %v551_v7  ;;  %v544_v23 = vpop.permute.xlu1 %543  ;;  %v1518_v24 = vrot.slane %v1502_v62, 1 }
 0x1fa   :  { %v552_v42 = vsel %vm289_vm2, 0.0, %v544_v23  ;;  %v1521_v23 = vsel %vm805_vm5, %v1519_v50, %v1520_v57 }
 0x1fb   :  { %v3674_v33 = vadd.f32 %v3551_v35, %v818_v29  ;;  %v819_v61 = vadd.f32 %v815_v2, %v807_v59  ;;  %v816_v12 = vadd.f32 %v4099_v47, %v559_v53  ;;  %v560_v58 = vadd.f32 %v556_v21, %v552_v42 }
 0x1fc   :  { %v1278_v39 = vpop.permute.xlu0 %1277  ;;  %v1523_v48 = vsel %vm805_vm5, %v1517_v13, %v1518_v24  ;;  %v1522_v29 = vsel %vm805_vm5, %v1518_v24, %v1519_v50 }
 0x1fd   :  { %v831_v6 = vmul.f32 %v3674_v33, %v3674_v33  ;;  %v3687_v30 = vadd.f32 %v3551_v35, %v819_v61  ;;  %v1289_v31 = vsel %vm289_vm2, 0.0, %v1278_v39  ;;  %v820_v18 = vadd.f32 %v816_v12, %v806_v4 }
 0x1fe   :  { %v817_v1 = vadd.f32 %v4100_v34, %v560_v58  ;;  %v1297_v52 = vadd.f32 %v1293_v60, %v1289_v31  ;;  %v1280_v3 = vpop.permute.xlu1 %1279  ;;  %v1524_v58 = vsel %vm805_vm5, %v1520_v57, %v1517_v13 }
 0x1ff   :  { %v835_v21 = vmul.f32 %v831_v6, %v3674_v33  ;;  %v832_v19 = vmul.f32 %v3687_v30, %v3687_v30  ;;  %v3697_v14 = vadd.f32 %v3551_v35, %v820_v18  ;;  %v1290_v15 = vsel %vm289_vm2, 0.0, %v1280_v3 }
 0x200   :  { %v821_v9 = vadd.f32 %v817_v1, %v813_v56  ;;  %v1529_v40 = vadd.f32 %v1513_v26, %v1297_v52  ;;  %v1298_v55 = vadd.f32 %v1294_v49, %v1290_v15  ;;  %v1282_v25 = vpop.permute.xlu0 %1281 }
 0x201   :  { %v839_v16 = vmul.f32 0.044715, %v835_v21  ;;  %v836_v60 = vmul.f32 %v832_v19, %v3687_v30  ;;  %v833_v63 = vmul.f32 %v3697_v14, %v3697_v14  ;;  %v1291_v5 = vsel %vm289_vm2, 0.0, %v1282_v25 }
 0x202   :  { %v3707_v51 = vadd.f32 %v3551_v35, %v821_v9  ;;  %v1533_v56 = vadd.f32 %v1529_v40, %v1523_v48  ;;  %v1530_v8 = vadd.f32 %v3628_v45, %v1298_v55  ;;  %v1299_v22 = vadd.f32 %v1295_v37, %v1291_v5  ;;  %v1284_v45 = vpop.permute.xlu1 %1283 }
 0x203   :  { %v843_v26 = vadd.f32 %v839_v16, %v3674_v33  ;;  %v840_v43 = vmul.f32 0.044715, %v836_v60  ;;  %v837_v28 = vmul.f32 %v833_v63, %v3697_v14  ;;  %v1292_v12 = vsel %vm289_vm2, 0.0, %v1284_v45 }
 0x204   :  { %v834_v49 = vmul.f32 %v3707_v51, %v3707_v51  ;;  %v3717_v62 = vadd.f32 %v1533_v56, %v3551_v35  ;;  %v1534_v7 = vadd.f32 %v1530_v8, %v1522_v29  ;;  %v1531_v42 = vadd.f32 %v3638_v38, %v1299_v22 }
 0x205   :  { %v847_v11 = vmul.f32 0.7978846, %v843_v26  ;;  %v844_v2 = vadd.f32 %v840_v43, %v3687_v30  ;;  %v841_v17 = vmul.f32 0.044715, %v837_v28  ;;  %v1300_v20 = vadd.f32 %v3679_v27, %v1292_v12 }
 0x206   :  { %v838_v59 = vmul.f32 %v834_v49, %v3707_v51  ;;  %v1545_v53 = vmul.f32 %v3717_v62, %v3717_v62  ;;  %v3728_v61 = vadd.f32 %v1534_v7, %v3551_v35  ;;  %v1535_v24 = vadd.f32 %v1531_v42, %v1521_v23 }
 0x207   :  { %1652 = vtanh.f32 %v847_v11  ;;  %v848_v10 = vmul.f32 0.7978846, %v844_v2  ;;  %v845_v4 = vadd.f32 %v841_v17, %v3697_v14  ;;  %v1532_v13 = vadd.f32 %v1509_v41, %v1300_v20 }
 0x208   :  { %v842_v37 = vmul.f32 0.044715, %v838_v59  ;;  %v1549_v47 = vmul.f32 %v1545_v53, %v3717_v62  ;;  %v1546_v39 = vmul.f32 %v3728_v61, %v3728_v61  ;;  %v1539_v34 = vadd.f32 %v1535_v24, %v3551_v35 }
 0x209   :  { %1654 = vtanh.f32 %v848_v10  ;;  %v849_v6 = vmul.f32 0.7978846, %v845_v4  ;;  %v1528_v27 = vsel %vm800_vm6, 0.0, %v1524_v58  ;;  %v827_v40 = vmul.f32 0.5, %v3674_v33 }
 0x20a   :  { %v846_v31 = vadd.f32 %v842_v37, %v3707_v51  ;;  %v1553_v38 = vmul.f32 0.044715, %v1549_v47  ;;  %v1550_v18 = vmul.f32 %v1546_v39, %v3728_v61  ;;  %v1547_v21 = vmul.f32 %v1539_v34, %v1539_v34 }
 0x20b   :  { %1656 = vtanh.f32 %v849_v6  ;;  %v1536_v3 = vadd.f32 %v1532_v13, %v1528_v27  ;;  %v828_v55 = vmul.f32 0.5, %v3687_v30  ;;  %v829_v43 = vmul.f32 0.5, %v3697_v14 }
 0x20c   :  { %v850_v1 = vmul.f32 0.7978846, %v846_v31  ;;  %v1557_v52 = vadd.f32 %v1553_v38, %v3717_v62  ;;  %v1554_v50 = vmul.f32 0.044715, %v1550_v18  ;;  %v1551_v9 = vmul.f32 %v1547_v21, %v1539_v34 }
 0x20d   :  { %v1540_v44 = vadd.f32 %v1536_v3, %v3551_v35  ;;  %v830_v49 = vmul.f32 0.5, %v3707_v51  ;;  %v1541_v7 = vmul.f32 0.5, %v3717_v62  ;;  %v1542_v17 = vmul.f32 0.5, %v3728_v61 }
 0x20e   :  { %1658 = vtanh.f32 %v850_v1  ;;  %v1561_v19 = vmul.f32 0.7978846, %v1557_v52  ;;  %v1558_v46 = vadd.f32 %v1554_v50, %v3728_v61  ;;  %v1555_v0 = vmul.f32 0.044715, %v1551_v9 }
 0x20f   :  { %v1548_v16 = vmul.f32 %v1540_v44, %v1540_v44  ;;  %v1543_v23 = vmul.f32 0.5, %v1539_v34  ;;  %v1544_v62 = vmul.f32 0.5, %v1540_v44 }
 0x210   :  { %1660 = vtanh.f32 %v1561_v19  ;;  %v1562_v32 = vmul.f32 0.7978846, %v1558_v46  ;;  %v1559_v54 = vadd.f32 %v1555_v0, %v1539_v34 }
 0x211   :  { %v1653_v36 = vpop.eup %1652  ;;  %v1552_v57 = vmul.f32 %v1548_v16, %v1540_v44 }
 0x212   :  { %v855_v15 = vadd.f32 1.0, %v1653_v36  ;;  %1662 = vtanh.f32 %v1562_v32  ;;  %v1563_v63 = vmul.f32 0.7978846, %v1559_v54 }
 0x213   :  { %v1655_v60 = vpop.eup %1654  ;;  %v1556_v26 = vmul.f32 0.044715, %v1552_v57 }
 0x214   :  { %v859_v48 = vmul.f32 %v855_v15, %v827_v40  ;;  %v856_v25 = vadd.f32 1.0, %v1655_v60  ;;  %1664 = vtanh.f32 %v1563_v63 }
 0x215   :  { %v1657_v56 = vpop.eup %1656  ;;  %v1560_v5 = vadd.f32 %v1556_v26, %v1540_v44 }
 0x216   :  { %864 = vst.msk [vmem:[#allocation8] sm:$0xff] %vm863_vm7, %v859_v48  ;;  %v860_v35 = vmul.f32 %v856_v25, %v828_v55  ;;  %v857_v33 = vadd.f32 1.0, %v1657_v56 }
 0x217   :  { %v1564_v11 = vmul.f32 0.7978846, %v1560_v5 }
 0x218   :  { %v1659_v8 = vpop.eup %1658  ;;  %865 = vst.msk [vmem:[#allocation8 + $0x8] sm:$0xff] %vm863_vm7, %v860_v35  ;;  %v861_v28 = vmul.f32 %v857_v33, %v829_v43 }
 0x219   :  { %v858_v30 = vadd.f32 1.0, %v1659_v8  ;;  %1666 = vtanh.f32 %v1564_v11 }
 0x21a   :  { %v1661_v29 = vpop.eup %1660  ;;  %866 = vst.msk [vmem:[#allocation8 + $0x10] sm:$0xff] %vm863_vm7, %v861_v28 }
 0x21b   :  { %v862_v2 = vmul.f32 %v858_v30, %v830_v49  ;;  %v1569_v22 = vadd.f32 1.0, %v1661_v29 }
 0x21c   :  { %v1663_v14 = vpop.eup %1662 }
 0x21d   :  { %867 = vst.msk [vmem:[#allocation8 + $0x18] sm:$0xff] %vm863_vm7, %v862_v2  ;;  %v1573_v45 = vmul.f32 %v1569_v22, %v1541_v7  ;;  %v1570_v59 = vadd.f32 1.0, %v1663_v14 }
 0x21e   :  { %v1665_v53 = vpop.eup %1664 }
 0x21f   :  { %1578 = vst.msk [vmem:[#allocation8 + $0x20] sm:$0xff] %vm863_vm7, %v1573_v45  ;;  %v1574_v51 = vmul.f32 %v1570_v59, %v1542_v17  ;;  %v1571_v10 = vadd.f32 1.0, %v1665_v53 }
 0x221   :  { %1579 = vst.msk [vmem:[#allocation8 + $0x28] sm:$0xff] %vm863_vm7, %v1574_v51  ;;  %v1575_v42 = vmul.f32 %v1571_v10, %v1543_v23 }
 0x223   :  { %v1667_v4 = vpop.eup %1666  ;;  %1580 = vst.msk [vmem:[#allocation8 + $0x30] sm:$0xff] %vm863_vm7, %v1575_v42 }
 0x224   :  { %v1572_v37 = vadd.f32 1.0, %v1667_v4 }
 0x226   :  { %v1576_v47 = vmul.f32 %v1572_v37, %v1544_v62 }
 0x228   :  { %1581 = vst.msk [vmem:[#allocation8 + $0x38] sm:$0xff] %vm863_vm7, %v1576_v47 }
 0x229   :  { %1753 = shalt.err (!%p1750_p3)
}
 0x22a   :  { %s1754_s30 = scalar_lea.hbm %s3786_s3, 1024 }
 0x22b   :  { %p1755_p4 = scmp.ne.s32.totalorder %s3786_s3, %s1754_s30  ;;  %p1758_p5 = scmp.lt.u32.totalorder %s1754_s30, %s3786_s3 }
 0x22d   :  { %p1760_p6 = pnand %p1758_p5, %p1755_p4 }
 0x22f   :  { %1763 = shalt.err (!%p1760_p6)
}
 0x230   :  { %1593 = dma.vmem_to_hbm [thread:$0]  %s1588_s26, 1024, %s3786_s3, [#allocation5], %s1771_s1, %s1771_s1, %s1772_s25  }
 0x231   :  { %1768 = dma.done.wait [#allocation5], 1024  }
 0x232   :  { %1769 = vsyncadd [#allocation5], 4294966272 }
 0x233   :  { %1597 = vsyncpa [#allocation4], 1 }
 0x234   :  { %1598 = vsyncpa [#allocation5], 1 }
 0x235   :  { %1599 = vsyncpa [#allocation6], 1 }

</bundles_post_ra>
